<compile_context>
chip_gen: v7x
topology: tpu7x:2x2x1
jax: 0.10.0
libtpu: 0.0.40
codegen_flags: <defaults>
</compile_context>

<pallas_src>
import jax
import jax.numpy as jnp
from jax.experimental import pallas as pl
from jax.experimental.pallas import tpu as pltpu


def rnn_kernel(x_ref, wxh_ref, whh_ref, who_ref, y_ref):
    """Entire forward pass in one kernel invocation (no grid).

    x_ref  : (T, N, D)  time-major input, fully VMEM-resident (~480 B here)
    wxh_ref: (D, H)   whh_ref: (H, H)   who_ref: (H, O)
    y_ref  : (N, O)
    """
    T, N, _ = x_ref.shape
    H = whh_ref.shape[0]

    # Loop-invariant weights: load once, each fits in a single vreg.
    wxh = wxh_ref[...]                       # (D, H)
    whh = whh_ref[...]                       # (H, H)

    # Hidden state (N, H): a single vreg (2 sublanes x 8 lanes used).
    h = jnp.zeros((N, H), jnp.float32)

    # 60-step serial recurrence, fully unrolled (T is small and static).
    # All tiny matmuls run on the VPU + a small reduce; x is loaded per step
    # so nothing except h and the weights is live across the chain.
    for t in range(T):
        x_t = x_ref[t]                                               # (N, D)
        # x_t @ Wxh as multiply + reduce (D == 1 here, so the reduce is a
        # no-op and this is just a broadcast multiply).
        x_proj = jnp.sum(x_t[:, :, None] * wxh[None, :, :], axis=1)  # (N, H)
        # h @ Whh as multiply + cross-sublane reduce (VPU/XLU, no MXU).
        h_proj = jnp.sum(h[:, :, None] * whh[None, :, :], axis=1)    # (N, H)
        h = jnp.tanh(x_proj + h_proj)

    # Epilogue: y_hat = h_T @ Who, again as multiply + reduce; single store.
    who = who_ref[...]                                               # (H, O)
    y = jnp.sum(h[:, :, None] * who[None, :, :], axis=1)             # (N, O)
    y_ref[...] = y.astype(y_ref.dtype)


def vanilla_rnn_forward(x_ntd, wxh, whh, who):
    """x_ntd: (N, T, D) as in the PyTorch module. Returns y_hat: (N, O)."""
    N, T, D = x_ntd.shape
    O = who.shape[1]
    # Time-major layout so per-step slices inside the kernel hit the leading dim.
    x_tnd = jnp.transpose(x_ntd, (1, 0, 2)).astype(jnp.float32)

    vmem = lambda: pl.BlockSpec(memory_space=pltpu.MemorySpace.VMEM)
    # Total operand footprint is <5 KB: grid-less, fully VMEM-resident call.
    # No per-core batch split — splitting a 60-step serial chain across the
    # v7x TensorCores at N=2 is pure launch/sync overhead.
    return pl.pallas_call(
        rnn_kernel,
        out_shape=jax.ShapeDtypeStruct((N, O), jnp.float32),
        in_specs=[vmem(), vmem(), vmem(), vmem()],
        out_specs=vmem(),
    )(x_tnd, wxh.astype(jnp.float32), whh.astype(jnp.float32),
      who.astype(jnp.float32))


def vanilla_rnn_ref(x_ntd, wxh, whh, who):
    """Pure-JAX reference mirroring the PyTorch forward (in float32)."""
    N, T, D = x_ntd.shape
    H = wxh.shape[1]
    h = jnp.zeros((N, H), jnp.float32)
    for t in range(T):
        h = jnp.tanh(x_ntd[:, t, :] @ wxh + h @ whh)
    return h @ who


if __name__ == "__main__":
    D_, H_, O_, T_ = 1, 8, 1, 60
    N = 2

    key = jax.random.PRNGKey(0)
    # x follows the PyTorch convention (N, T, D)
    x = jax.random.normal(key, (N, T_, D_), dtype=jnp.float32)

    # Parameters exactly as the module's __init__ (all ones; f64 -> f32 on TPU).
    wxh = jnp.ones((D_, H_), jnp.float32)
    whh = jnp.ones((H_, H_), jnp.float32)
    who = jnp.ones((H_, O_), jnp.float32)

    y = jax.block_until_ready(vanilla_rnn_forward(x, wxh, whh, who))
    y_ref = vanilla_rnn_ref(x, wxh, whh, who)
    assert y.shape == (N, O_)
    assert jnp.allclose(y, y_ref, atol=1e-4, rtol=1e-4), (y, y_ref)

    # Second check with non-saturating random weights so the 60-step tanh
    # recurrence is numerically sensitive (all-ones weights saturate tanh).
    k1, k2, k3 = jax.random.split(jax.random.PRNGKey(1), 3)
    wxh_r = 0.3 * jax.random.normal(k1, (D_, H_), jnp.float32)
    whh_r = 0.3 * jax.random.normal(k2, (H_, H_), jnp.float32)
    who_r = 0.3 * jax.random.normal(k3, (H_, O_), jnp.float32)
    y2 = jax.block_until_ready(vanilla_rnn_forward(x, wxh_r, whh_r, who_r))
    y2_ref = vanilla_rnn_ref(x, wxh_r, whh_r, who_r)
    assert jnp.allclose(y2, y2_ref, atol=1e-4, rtol=1e-4), (y2, y2_ref)

    print("KERNEL_OK")
</pallas_src>

<mosaic_0001>
module attributes {stable_mosaic.version = 11 : i64} {
  func.func @rnn_kernel(%arg0: memref<60x2x1xf32, #tpu.memory_space<vmem>>, %arg1: memref<1x8xf32, #tpu.memory_space<vmem>>, %arg2: memref<8x8xf32, #tpu.memory_space<vmem>>, %arg3: memref<8x1xf32, #tpu.memory_space<vmem>>, %arg4: memref<2x1xf32, #tpu.memory_space<vmem>>) attributes {dimension_semantics = [], scalar_prefetch = 0 : i64, scratch_operands = 0 : i64, tpu.core_type = #tpu.core_type<tc>} {
    %c0 = arith.constant 0 : index
    %c0_0 = arith.constant 0 : index
    %0 = vector.load %arg1[%c0, %c0_0] : memref<1x8xf32, #tpu.memory_space<vmem>>, vector<1x8xf32>
    %c0_1 = arith.constant 0 : index
    %c0_2 = arith.constant 0 : index
    %1 = vector.load %arg2[%c0_1, %c0_2] : memref<8x8xf32, #tpu.memory_space<vmem>>, vector<8x8xf32>
    %cst = arith.constant 0.000000e+00 : f32
    %2 = vector.broadcast %cst : f32 to vector<2x8xf32>
    %c0_3 = arith.constant 0 : index
    %c0_4 = arith.constant 0 : index
    %c0_5 = arith.constant 0 : index
    %3 = vector.load %arg0[%c0_3, %c0_4, %c0_5] : memref<60x2x1xf32, #tpu.memory_space<vmem>>, vector<1x2x1xf32>
    %4 = vector.shape_cast %3 : vector<1x2x1xf32> to vector<2x1xf32>
    %5 = vector.shape_cast %4 : vector<2x1xf32> to vector<2x1x1xf32>
    %6 = vector.shape_cast %0 : vector<1x8xf32> to vector<1x1x8xf32>
    %7 = vector.broadcast %5 : vector<2x1x1xf32> to vector<2x1x8xf32>
    %8 = vector.broadcast %6 : vector<1x1x8xf32> to vector<2x1x8xf32>
    %9 = arith.mulf %7, %8 : vector<2x1x8xf32>
    %cst_6 = arith.constant dense<0.000000e+00> : vector<2x8xf32>
    %10 = vector.multi_reduction <add>, %9, %cst_6 [1] : vector<2x1x8xf32> to vector<2x8xf32>
    %11 = vector.shape_cast %2 : vector<2x8xf32> to vector<2x8x1xf32>
    %12 = vector.shape_cast %1 : vector<8x8xf32> to vector<1x8x8xf32>
    %13 = vector.broadcast %11 : vector<2x8x1xf32> to vector<2x8x8xf32>
    %14 = vector.broadcast %12 : vector<1x8x8xf32> to vector<2x8x8xf32>
    %15 = arith.mulf %13, %14 : vector<2x8x8xf32>
    %cst_7 = arith.constant dense<0.000000e+00> : vector<2x8xf32>
    %16 = vector.multi_reduction <add>, %15, %cst_7 [1] : vector<2x8x8xf32> to vector<2x8xf32>
    %17 = arith.addf %10, %16 : vector<2x8xf32>
    %18 = math.tanh %17 : vector<2x8xf32>
    %c1 = arith.constant 1 : index
    %c0_8 = arith.constant 0 : index
    %c0_9 = arith.constant 0 : index
    %19 = vector.load %arg0[%c1, %c0_8, %c0_9] : memref<60x2x1xf32, #tpu.memory_space<vmem>>, vector<1x2x1xf32>
    %20 = vector.shape_cast %19 : vector<1x2x1xf32> to vector<2x1xf32>
    %21 = vector.shape_cast %20 : vector<2x1xf32> to vector<2x1x1xf32>
    %22 = vector.shape_cast %0 : vector<1x8xf32> to vector<1x1x8xf32>
    %23 = vector.broadcast %21 : vector<2x1x1xf32> to vector<2x1x8xf32>
    %24 = vector.broadcast %22 : vector<1x1x8xf32> to vector<2x1x8xf32>
    %25 = arith.mulf %23, %24 : vector<2x1x8xf32>
    %cst_10 = arith.constant dense<0.000000e+00> : vector<2x8xf32>
    %26 = vector.multi_reduction <add>, %25, %cst_10 [1] : vector<2x1x8xf32> to vector<2x8xf32>
    %27 = vector.shape_cast %18 : vector<2x8xf32> to vector<2x8x1xf32>
    %28 = vector.shape_cast %1 : vector<8x8xf32> to vector<1x8x8xf32>
    %29 = vector.broadcast %27 : vector<2x8x1xf32> to vector<2x8x8xf32>
    %30 = vector.broadcast %28 : vector<1x8x8xf32> to vector<2x8x8xf32>
    %31 = arith.mulf %29, %30 : vector<2x8x8xf32>
    %cst_11 = arith.constant dense<0.000000e+00> : vector<2x8xf32>
    %32 = vector.multi_reduction <add>, %31, %cst_11 [1] : vector<2x8x8xf32> to vector<2x8xf32>
    %33 = arith.addf %26, %32 : vector<2x8xf32>
    %34 = math.tanh %33 : vector<2x8xf32>
    %c2 = arith.constant 2 : index
    %c0_12 = arith.constant 0 : index
    %c0_13 = arith.constant 0 : index
    %35 = vector.load %arg0[%c2, %c0_12, %c0_13] : memref<60x2x1xf32, #tpu.memory_space<vmem>>, vector<1x2x1xf32>
    %36 = vector.shape_cast %35 : vector<1x2x1xf32> to vector<2x1xf32>
    %37 = vector.shape_cast %36 : vector<2x1xf32> to vector<2x1x1xf32>
    %38 = vector.shape_cast %0 : vector<1x8xf32> to vector<1x1x8xf32>
    %39 = vector.broadcast %37 : vector<2x1x1xf32> to vector<2x1x8xf32>
    %40 = vector.broadcast %38 : vector<1x1x8xf32> to vector<2x1x8xf32>
    %41 = arith.mulf %39, %40 : vector<2x1x8xf32>
    %cst_14 = arith.constant dense<0.000000e+00> : vector<2x8xf32>
    %42 = vector.multi_reduction <add>, %41, %cst_14 [1] : vector<2x1x8xf32> to vector<2x8xf32>
    %43 = vector.shape_cast %34 : vector<2x8xf32> to vector<2x8x1xf32>
    %44 = vector.shape_cast %1 : vector<8x8xf32> to vector<1x8x8xf32>
    %45 = vector.broadcast %43 : vector<2x8x1xf32> to vector<2x8x8xf32>
    %46 = vector.broadcast %44 : vector<1x8x8xf32> to vector<2x8x8xf32>
    %47 = arith.mulf %45, %46 : vector<2x8x8xf32>
    %cst_15 = arith.constant dense<0.000000e+00> : vector<2x8xf32>
    %48 = vector.multi_reduction <add>, %47, %cst_15 [1] : vector<2x8x8xf32> to vector<2x8xf32>
    %49 = arith.addf %42, %48 : vector<2x8xf32>
    %50 = math.tanh %49 : vector<2x8xf32>
    %c3 = arith.constant 3 : index
    %c0_16 = arith.constant 0 : index
    %c0_17 = arith.constant 0 : index
    %51 = vector.load %arg0[%c3, %c0_16, %c0_17] : memref<60x2x1xf32, #tpu.memory_space<vmem>>, vector<1x2x1xf32>
    %52 = vector.shape_cast %51 : vector<1x2x1xf32> to vector<2x1xf32>
    %53 = vector.shape_cast %52 : vector<2x1xf32> to vector<2x1x1xf32>
    %54 = vector.shape_cast %0 : vector<1x8xf32> to vector<1x1x8xf32>
    %55 = vector.broadcast %53 : vector<2x1x1xf32> to vector<2x1x8xf32>
    %56 = vector.broadcast %54 : vector<1x1x8xf32> to vector<2x1x8xf32>
    %57 = arith.mulf %55, %56 : vector<2x1x8xf32>
    %cst_18 = arith.constant dense<0.000000e+00> : vector<2x8xf32>
    %58 = vector.multi_reduction <add>, %57, %cst_18 [1] : vector<2x1x8xf32> to vector<2x8xf32>
    %59 = vector.shape_cast %50 : vector<2x8xf32> to vector<2x8x1xf32>
    %60 = vector.shape_cast %1 : vector<8x8xf32> to vector<1x8x8xf32>
    %61 = vector.broadcast %59 : vector<2x8x1xf32> to vector<2x8x8xf32>
    %62 = vector.broadcast %60 : vector<1x8x8xf32> to vector<2x8x8xf32>
    %63 = arith.mulf %61, %62 : vector<2x8x8xf32>
    %cst_19 = arith.constant dense<0.000000e+00> : vector<2x8xf32>
    %64 = vector.multi_reduction <add>, %63, %cst_19 [1] : vector<2x8x8xf32> to vector<2x8xf32>
    %65 = arith.addf %58, %64 : vector<2x8xf32>
    %66 = math.tanh %65 : vector<2x8xf32>
    %c4 = arith.constant 4 : index
    %c0_20 = arith.constant 0 : index
    %c0_21 = arith.constant 0 : index
    %67 = vector.load %arg0[%c4, %c0_20, %c0_21] : memref<60x2x1xf32, #tpu.memory_space<vmem>>, vector<1x2x1xf32>
    %68 = vector.shape_cast %67 : vector<1x2x1xf32> to vector<2x1xf32>
    %69 = vector.shape_cast %68 : vector<2x1xf32> to vector<2x1x1xf32>
    %70 = vector.shape_cast %0 : vector<1x8xf32> to vector<1x1x8xf32>
    %71 = vector.broadcast %69 : vector<2x1x1xf32> to vector<2x1x8xf32>
    %72 = vector.broadcast %70 : vector<1x1x8xf32> to vector<2x1x8xf32>
    %73 = arith.mulf %71, %72 : vector<2x1x8xf32>
    %cst_22 = arith.constant dense<0.000000e+00> : vector<2x8xf32>
    %74 = vector.multi_reduction <add>, %73, %cst_22 [1] : vector<2x1x8xf32> to vector<2x8xf32>
    %75 = vector.shape_cast %66 : vector<2x8xf32> to vector<2x8x1xf32>
    %76 = vector.shape_cast %1 : vector<8x8xf32> to vector<1x8x8xf32>
    %77 = vector.broadcast %75 : vector<2x8x1xf32> to vector<2x8x8xf32>
    %78 = vector.broadcast %76 : vector<1x8x8xf32> to vector<2x8x8xf32>
    %79 = arith.mulf %77, %78 : vector<2x8x8xf32>
    %cst_23 = arith.constant dense<0.000000e+00> : vector<2x8xf32>
    %80 = vector.multi_reduction <add>, %79, %cst_23 [1] : vector<2x8x8xf32> to vector<2x8xf32>
    %81 = arith.addf %74, %80 : vector<2x8xf32>
    %82 = math.tanh %81 : vector<2x8xf32>
    %c5 = arith.constant 5 : index
    %c0_24 = arith.constant 0 : index
    %c0_25 = arith.constant 0 : index
    %83 = vector.load %arg0[%c5, %c0_24, %c0_25] : memref<60x2x1xf32, #tpu.memory_space<vmem>>, vector<1x2x1xf32>
    %84 = vector.shape_cast %83 : vector<1x2x1xf32> to vector<2x1xf32>
    %85 = vector.shape_cast %84 : vector<2x1xf32> to vector<2x1x1xf32>
    %86 = vector.shape_cast %0 : vector<1x8xf32> to vector<1x1x8xf32>
    %87 = vector.broadcast %85 : vector<2x1x1xf32> to vector<2x1x8xf32>
    %88 = vector.broadcast %86 : vector<1x1x8xf32> to vector<2x1x8xf32>
    %89 = arith.mulf %87, %88 : vector<2x1x8xf32>
    %cst_26 = arith.constant dense<0.000000e+00> : vector<2x8xf32>
    %90 = vector.multi_reduction <add>, %89, %cst_26 [1] : vector<2x1x8xf32> to vector<2x8xf32>
    %91 = vector.shape_cast %82 : vector<2x8xf32> to vector<2x8x1xf32>
    %92 = vector.shape_cast %1 : vector<8x8xf32> to vector<1x8x8xf32>
    %93 = vector.broadcast %91 : vector<2x8x1xf32> to vector<2x8x8xf32>
    %94 = vector.broadcast %92 : vector<1x8x8xf32> to vector<2x8x8xf32>
    %95 = arith.mulf %93, %94 : vector<2x8x8xf32>
    %cst_27 = arith.constant dense<0.000000e+00> : vector<2x8xf32>
    %96 = vector.multi_reduction <add>, %95, %cst_27 [1] : vector<2x8x8xf32> to vector<2x8xf32>
    %97 = arith.addf %90, %96 : vector<2x8xf32>
    %98 = math.tanh %97 : vector<2x8xf32>
    %c6 = arith.constant 6 : index
    %c0_28 = arith.constant 0 : index
    %c0_29 = arith.constant 0 : index
    %99 = vector.load %arg0[%c6, %c0_28, %c0_29] : memref<60x2x1xf32, #tpu.memory_space<vmem>>, vector<1x2x1xf32>
    %100 = vector.shape_cast %99 : vector<1x2x1xf32> to vector<2x1xf32>
    %101 = vector.shape_cast %100 : vector<2x1xf32> to vector<2x1x1xf32>
    %102 = vector.shape_cast %0 : vector<1x8xf32> to vector<1x1x8xf32>
    %103 = vector.broadcast %101 : vector<2x1x1xf32> to vector<2x1x8xf32>
    %104 = vector.broadcast %102 : vector<1x1x8xf32> to vector<2x1x8xf32>
    %105 = arith.mulf %103, %104 : vector<2x1x8xf32>
    %cst_30 = arith.constant dense<0.000000e+00> : vector<2x8xf32>
    %106 = vector.multi_reduction <add>, %105, %cst_30 [1] : vector<2x1x8xf32> to vector<2x8xf32>
    %107 = vector.shape_cast %98 : vector<2x8xf32> to vector<2x8x1xf32>
    %108 = vector.shape_cast %1 : vector<8x8xf32> to vector<1x8x8xf32>
    %109 = vector.broadcast %107 : vector<2x8x1xf32> to vector<2x8x8xf32>
    %110 = vector.broadcast %108 : vector<1x8x8xf32> to vector<2x8x8xf32>
    %111 = arith.mulf %109, %110 : vector<2x8x8xf32>
    %cst_31 = arith.constant dense<0.000000e+00> : vector<2x8xf32>
    %112 = vector.multi_reduction <add>, %111, %cst_31 [1] : vector<2x8x8xf32> to vector<2x8xf32>
    %113 = arith.addf %106, %112 : vector<2x8xf32>
    %114 = math.tanh %113 : vector<2x8xf32>
    %c7 = arith.constant 7 : index
    %c0_32 = arith.constant 0 : index
    %c0_33 = arith.constant 0 : index
    %115 = vector.load %arg0[%c7, %c0_32, %c0_33] : memref<60x2x1xf32, #tpu.memory_space<vmem>>, vector<1x2x1xf32>
    %116 = vector.shape_cast %115 : vector<1x2x1xf32> to vector<2x1xf32>
    %117 = vector.shape_cast %116 : vector<2x1xf32> to vector<2x1x1xf32>
    %118 = vector.shape_cast %0 : vector<1x8xf32> to vector<1x1x8xf32>
    %119 = vector.broadcast %117 : vector<2x1x1xf32> to vector<2x1x8xf32>
    %120 = vector.broadcast %118 : vector<1x1x8xf32> to vector<2x1x8xf32>
    %121 = arith.mulf %119, %120 : vector<2x1x8xf32>
    %cst_34 = arith.constant dense<0.000000e+00> : vector<2x8xf32>
    %122 = vector.multi_reduction <add>, %121, %cst_34 [1] : vector<2x1x8xf32> to vector<2x8xf32>
    %123 = vector.shape_cast %114 : vector<2x8xf32> to vector<2x8x1xf32>
    %124 = vector.shape_cast %1 : vector<8x8xf32> to vector<1x8x8xf32>
    %125 = vector.broadcast %123 : vector<2x8x1xf32> to vector<2x8x8xf32>
    %126 = vector.broadcast %124 : vector<1x8x8xf32> to vector<2x8x8xf32>
    %127 = arith.mulf %125, %126 : vector<2x8x8xf32>
    %cst_35 = arith.constant dense<0.000000e+00> : vector<2x8xf32>
    %128 = vector.multi_reduction <add>, %127, %cst_35 [1] : vector<2x8x8xf32> to vector<2x8xf32>
    %129 = arith.addf %122, %128 : vector<2x8xf32>
    %130 = math.tanh %129 : vector<2x8xf32>
    %c8 = arith.constant 8 : index
    %c0_36 = arith.constant 0 : index
    %c0_37 = arith.constant 0 : index
    %131 = vector.load %arg0[%c8, %c0_36, %c0_37] : memref<60x2x1xf32, #tpu.memory_space<vmem>>, vector<1x2x1xf32>
    %132 = vector.shape_cast %131 : vector<1x2x1xf32> to vector<2x1xf32>
    %133 = vector.shape_cast %132 : vector<2x1xf32> to vector<2x1x1xf32>
    %134 = vector.shape_cast %0 : vector<1x8xf32> to vector<1x1x8xf32>
    %135 = vector.broadcast %133 : vector<2x1x1xf32> to vector<2x1x8xf32>
    %136 = vector.broadcast %134 : vector<1x1x8xf32> to vector<2x1x8xf32>
    %137 = arith.mulf %135, %136 : vector<2x1x8xf32>
    %cst_38 = arith.constant dense<0.000000e+00> : vector<2x8xf32>
    %138 = vector.multi_reduction <add>, %137, %cst_38 [1] : vector<2x1x8xf32> to vector<2x8xf32>
    %139 = vector.shape_cast %130 : vector<2x8xf32> to vector<2x8x1xf32>
    %140 = vector.shape_cast %1 : vector<8x8xf32> to vector<1x8x8xf32>
    %141 = vector.broadcast %139 : vector<2x8x1xf32> to vector<2x8x8xf32>
    %142 = vector.broadcast %140 : vector<1x8x8xf32> to vector<2x8x8xf32>
    %143 = arith.mulf %141, %142 : vector<2x8x8xf32>
    %cst_39 = arith.constant dense<0.000000e+00> : vector<2x8xf32>
    %144 = vector.multi_reduction <add>, %143, %cst_39 [1] : vector<2x8x8xf32> to vector<2x8xf32>
    %145 = arith.addf %138, %144 : vector<2x8xf32>
    %146 = math.tanh %145 : vector<2x8xf32>
    %c9 = arith.constant 9 : index
    %c0_40 = arith.constant 0 : index
    %c0_41 = arith.constant 0 : index
    %147 = vector.load %arg0[%c9, %c0_40, %c0_41] : memref<60x2x1xf32, #tpu.memory_space<vmem>>, vector<1x2x1xf32>
    %148 = vector.shape_cast %147 : vector<1x2x1xf32> to vector<2x1xf32>
    %149 = vector.shape_cast %148 : vector<2x1xf32> to vector<2x1x1xf32>
    %150 = vector.shape_cast %0 : vector<1x8xf32> to vector<1x1x8xf32>
    %151 = vector.broadcast %149 : vector<2x1x1xf32> to vector<2x1x8xf32>
    %152 = vector.broadcast %150 : vector<1x1x8xf32> to vector<2x1x8xf32>
    %153 = arith.mulf %151, %152 : vector<2x1x8xf32>
    %cst_42 = arith.constant dense<0.000000e+00> : vector<2x8xf32>
    %154 = vector.multi_reduction <add>, %153, %cst_42 [1] : vector<2x1x8xf32> to vector<2x8xf32>
    %155 = vector.shape_cast %146 : vector<2x8xf32> to vector<2x8x1xf32>
    %156 = vector.shape_cast %1 : vector<8x8xf32> to vector<1x8x8xf32>
    %157 = vector.broadcast %155 : vector<2x8x1xf32> to vector<2x8x8xf32>
    %158 = vector.broadcast %156 : vector<1x8x8xf32> to vector<2x8x8xf32>
    %159 = arith.mulf %157, %158 : vector<2x8x8xf32>
    %cst_43 = arith.constant dense<0.000000e+00> : vector<2x8xf32>
    %160 = vector.multi_reduction <add>, %159, %cst_43 [1] : vector<2x8x8xf32> to vector<2x8xf32>
    %161 = arith.addf %154, %160 : vector<2x8xf32>
    %162 = math.tanh %161 : vector<2x8xf32>
    %c10 = arith.constant 10 : index
    %c0_44 = arith.constant 0 : index
    %c0_45 = arith.constant 0 : index
    %163 = vector.load %arg0[%c10, %c0_44, %c0_45] : memref<60x2x1xf32, #tpu.memory_space<vmem>>, vector<1x2x1xf32>
    %164 = vector.shape_cast %163 : vector<1x2x1xf32> to vector<2x1xf32>
    %165 = vector.shape_cast %164 : vector<2x1xf32> to vector<2x1x1xf32>
    %166 = vector.shape_cast %0 : vector<1x8xf32> to vector<1x1x8xf32>
    %167 = vector.broadcast %165 : vector<2x1x1xf32> to vector<2x1x8xf32>
    %168 = vector.broadcast %166 : vector<1x1x8xf32> to vector<2x1x8xf32>
    %169 = arith.mulf %167, %168 : vector<2x1x8xf32>
    %cst_46 = arith.constant dense<0.000000e+00> : vector<2x8xf32>
    %170 = vector.multi_reduction <add>, %169, %cst_46 [1] : vector<2x1x8xf32> to vector<2x8xf32>
    %171 = vector.shape_cast %162 : vector<2x8xf32> to vector<2x8x1xf32>
    %172 = vector.shape_cast %1 : vector<8x8xf32> to vector<1x8x8xf32>
    %173 = vector.broadcast %171 : vector<2x8x1xf32> to vector<2x8x8xf32>
    %174 = vector.broadcast %172 : vector<1x8x8xf32> to vector<2x8x8xf32>
    %175 = arith.mulf %173, %174 : vector<2x8x8xf32>
    %cst_47 = arith.constant dense<0.000000e+00> : vector<2x8xf32>
    %176 = vector.multi_reduction <add>, %175, %cst_47 [1] : vector<2x8x8xf32> to vector<2x8xf32>
    %177 = arith.addf %170, %176 : vector<2x8xf32>
    %178 = math.tanh %177 : vector<2x8xf32>
    %c11 = arith.constant 11 : index
    %c0_48 = arith.constant 0 : index
    %c0_49 = arith.constant 0 : index
    %179 = vector.load %arg0[%c11, %c0_48, %c0_49] : memref<60x2x1xf32, #tpu.memory_space<vmem>>, vector<1x2x1xf32>
    %180 = vector.shape_cast %179 : vector<1x2x1xf32> to vector<2x1xf32>
    %181 = vector.shape_cast %180 : vector<2x1xf32> to vector<2x1x1xf32>
    %182 = vector.shape_cast %0 : vector<1x8xf32> to vector<1x1x8xf32>
    %183 = vector.broadcast %181 : vector<2x1x1xf32> to vector<2x1x8xf32>
    %184 = vector.broadcast %182 : vector<1x1x8xf32> to vector<2x1x8xf32>
    %185 = arith.mulf %183, %184 : vector<2x1x8xf32>
    %cst_50 = arith.constant dense<0.000000e+00> : vector<2x8xf32>
    %186 = vector.multi_reduction <add>, %185, %cst_50 [1] : vector<2x1x8xf32> to vector<2x8xf32>
    %187 = vector.shape_cast %178 : vector<2x8xf32> to vector<2x8x1xf32>
    %188 = vector.shape_cast %1 : vector<8x8xf32> to vector<1x8x8xf32>
    %189 = vector.broadcast %187 : vector<2x8x1xf32> to vector<2x8x8xf32>
    %190 = vector.broadcast %188 : vector<1x8x8xf32> to vector<2x8x8xf32>
    %191 = arith.mulf %189, %190 : vector<2x8x8xf32>
    %cst_51 = arith.constant dense<0.000000e+00> : vector<2x8xf32>
    %192 = vector.multi_reduction <add>, %191, %cst_51 [1] : vector<2x8x8xf32> to vector<2x8xf32>
    %193 = arith.addf %186, %192 : vector<2x8xf32>
    %194 = math.tanh %193 : vector<2x8xf32>
    %c12 = arith.constant 12 : index
    %c0_52 = arith.constant 0 : index
    %c0_53 = arith.constant 0 : index
    %195 = vector.load %arg0[%c12, %c0_52, %c0_53] : memref<60x2x1xf32, #tpu.memory_space<vmem>>, vector<1x2x1xf32>
    %196 = vector.shape_cast %195 : vector<1x2x1xf32> to vector<2x1xf32>
    %197 = vector.shape_cast %196 : vector<2x1xf32> to vector<2x1x1xf32>
    %198 = vector.shape_cast %0 : vector<1x8xf32> to vector<1x1x8xf32>
    %199 = vector.broadcast %197 : vector<2x1x1xf32> to vector<2x1x8xf32>
    %200 = vector.broadcast %198 : vector<1x1x8xf32> to vector<2x1x8xf32>
    %201 = arith.mulf %199, %200 : vector<2x1x8xf32>
    %cst_54 = arith.constant dense<0.000000e+00> : vector<2x8xf32>
    %202 = vector.multi_reduction <add>, %201, %cst_54 [1] : vector<2x1x8xf32> to vector<2x8xf32>
    %203 = vector.shape_cast %194 : vector<2x8xf32> to vector<2x8x1xf32>
    %204 = vector.shape_cast %1 : vector<8x8xf32> to vector<1x8x8xf32>
    %205 = vector.broadcast %203 : vector<2x8x1xf32> to vector<2x8x8xf32>
    %206 = vector.broadcast %204 : vector<1x8x8xf32> to vector<2x8x8xf32>
    %207 = arith.mulf %205, %206 : vector<2x8x8xf32>
    %cst_55 = arith.constant dense<0.000000e+00> : vector<2x8xf32>
    %208 = vector.multi_reduction <add>, %207, %cst_55 [1] : vector<2x8x8xf32> to vector<2x8xf32>
    %209 = arith.addf %202, %208 : vector<2x8xf32>
    %210 = math.tanh %209 : vector<2x8xf32>
    %c13 = arith.constant 13 : index
    %c0_56 = arith.constant 0 : index
    %c0_57 = arith.constant 0 : index
    %211 = vector.load %arg0[%c13, %c0_56, %c0_57] : memref<60x2x1xf32, #tpu.memory_space<vmem>>, vector<1x2x1xf32>
    %212 = vector.shape_cast %211 : vector<1x2x1xf32> to vector<2x1xf32>
    %213 = vector.shape_cast %212 : vector<2x1xf32> to vector<2x1x1xf32>
    %214 = vector.shape_cast %0 : vector<1x8xf32> to vector<1x1x8xf32>
    %215 = vector.broadcast %213 : vector<2x1x1xf32> to vector<2x1x8xf32>
    %216 = vector.broadcast %214 : vector<1x1x8xf32> to vector<2x1x8xf32>
    %217 = arith.mulf %215, %216 : vector<2x1x8xf32>
    %cst_58 = arith.constant dense<0.000000e+00> : vector<2x8xf32>
    %218 = vector.multi_reduction <add>, %217, %cst_58 [1] : vector<2x1x8xf32> to vector<2x8xf32>
    %219 = vector.shape_cast %210 : vector<2x8xf32> to vector<2x8x1xf32>
    %220 = vector.shape_cast %1 : vector<8x8xf32> to vector<1x8x8xf32>
    %221 = vector.broadcast %219 : vector<2x8x1xf32> to vector<2x8x8xf32>
    %222 = vector.broadcast %220 : vector<1x8x8xf32> to vector<2x8x8xf32>
    %223 = arith.mulf %221, %222 : vector<2x8x8xf32>
    %cst_59 = arith.constant dense<0.000000e+00> : vector<2x8xf32>
    %224 = vector.multi_reduction <add>, %223, %cst_59 [1] : vector<2x8x8xf32> to vector<2x8xf32>
    %225 = arith.addf %218, %224 : vector<2x8xf32>
    %226 = math.tanh %225 : vector<2x8xf32>
    %c14 = arith.constant 14 : index
    %c0_60 = arith.constant 0 : index
    %c0_61 = arith.constant 0 : index
    %227 = vector.load %arg0[%c14, %c0_60, %c0_61] : memref<60x2x1xf32, #tpu.memory_space<vmem>>, vector<1x2x1xf32>
    %228 = vector.shape_cast %227 : vector<1x2x1xf32> to vector<2x1xf32>
    %229 = vector.shape_cast %228 : vector<2x1xf32> to vector<2x1x1xf32>
    %230 = vector.shape_cast %0 : vector<1x8xf32> to vector<1x1x8xf32>
    %231 = vector.broadcast %229 : vector<2x1x1xf32> to vector<2x1x8xf32>
    %232 = vector.broadcast %230 : vector<1x1x8xf32> to vector<2x1x8xf32>
    %233 = arith.mulf %231, %232 : vector<2x1x8xf32>
    %cst_62 = arith.constant dense<0.000000e+00> : vector<2x8xf32>
    %234 = vector.multi_reduction <add>, %233, %cst_62 [1] : vector<2x1x8xf32> to vector<2x8xf32>
    %235 = vector.shape_cast %226 : vector<2x8xf32> to vector<2x8x1xf32>
    %236 = vector.shape_cast %1 : vector<8x8xf32> to vector<1x8x8xf32>
    %237 = vector.broadcast %235 : vector<2x8x1xf32> to vector<2x8x8xf32>
    %238 = vector.broadcast %236 : vector<1x8x8xf32> to vector<2x8x8xf32>
    %239 = arith.mulf %237, %238 : vector<2x8x8xf32>
    %cst_63 = arith.constant dense<0.000000e+00> : vector<2x8xf32>
    %240 = vector.multi_reduction <add>, %239, %cst_63 [1] : vector<2x8x8xf32> to vector<2x8xf32>
    %241 = arith.addf %234, %240 : vector<2x8xf32>
    %242 = math.tanh %241 : vector<2x8xf32>
    %c15 = arith.constant 15 : index
    %c0_64 = arith.constant 0 : index
    %c0_65 = arith.constant 0 : index
    %243 = vector.load %arg0[%c15, %c0_64, %c0_65] : memref<60x2x1xf32, #tpu.memory_space<vmem>>, vector<1x2x1xf32>
    %244 = vector.shape_cast %243 : vector<1x2x1xf32> to vector<2x1xf32>
    %245 = vector.shape_cast %244 : vector<2x1xf32> to vector<2x1x1xf32>
    %246 = vector.shape_cast %0 : vector<1x8xf32> to vector<1x1x8xf32>
    %247 = vector.broadcast %245 : vector<2x1x1xf32> to vector<2x1x8xf32>
    %248 = vector.broadcast %246 : vector<1x1x8xf32> to vector<2x1x8xf32>
    %249 = arith.mulf %247, %248 : vector<2x1x8xf32>
    %cst_66 = arith.constant dense<0.000000e+00> : vector<2x8xf32>
    %250 = vector.multi_reduction <add>, %249, %cst_66 [1] : vector<2x1x8xf32> to vector<2x8xf32>
    %251 = vector.shape_cast %242 : vector<2x8xf32> to vector<2x8x1xf32>
    %252 = vector.shape_cast %1 : vector<8x8xf32> to vector<1x8x8xf32>
    %253 = vector.broadcast %251 : vector<2x8x1xf32> to vector<2x8x8xf32>
    %254 = vector.broadcast %252 : vector<1x8x8xf32> to vector<2x8x8xf32>
    %255 = arith.mulf %253, %254 : vector<2x8x8xf32>
    %cst_67 = arith.constant dense<0.000000e+00> : vector<2x8xf32>
    %256 = vector.multi_reduction <add>, %255, %cst_67 [1] : vector<2x8x8xf32> to vector<2x8xf32>
    %257 = arith.addf %250, %256 : vector<2x8xf32>
    %258 = math.tanh %257 : vector<2x8xf32>
    %c16 = arith.constant 16 : index
    %c0_68 = arith.constant 0 : index
    %c0_69 = arith.constant 0 : index
    %259 = vector.load %arg0[%c16, %c0_68, %c0_69] : memref<60x2x1xf32, #tpu.memory_space<vmem>>, vector<1x2x1xf32>
    %260 = vector.shape_cast %259 : vector<1x2x1xf32> to vector<2x1xf32>
    %261 = vector.shape_cast %260 : vector<2x1xf32> to vector<2x1x1xf32>
    %262 = vector.shape_cast %0 : vector<1x8xf32> to vector<1x1x8xf32>
    %263 = vector.broadcast %261 : vector<2x1x1xf32> to vector<2x1x8xf32>
    %264 = vector.broadcast %262 : vector<1x1x8xf32> to vector<2x1x8xf32>
    %265 = arith.mulf %263, %264 : vector<2x1x8xf32>
    %cst_70 = arith.constant dense<0.000000e+00> : vector<2x8xf32>
    %266 = vector.multi_reduction <add>, %265, %cst_70 [1] : vector<2x1x8xf32> to vector<2x8xf32>
    %267 = vector.shape_cast %258 : vector<2x8xf32> to vector<2x8x1xf32>
    %268 = vector.shape_cast %1 : vector<8x8xf32> to vector<1x8x8xf32>
    %269 = vector.broadcast %267 : vector<2x8x1xf32> to vector<2x8x8xf32>
    %270 = vector.broadcast %268 : vector<1x8x8xf32> to vector<2x8x8xf32>
    %271 = arith.mulf %269, %270 : vector<2x8x8xf32>
    %cst_71 = arith.constant dense<0.000000e+00> : vector<2x8xf32>
    %272 = vector.multi_reduction <add>, %271, %cst_71 [1] : vector<2x8x8xf32> to vector<2x8xf32>
    %273 = arith.addf %266, %272 : vector<2x8xf32>
    %274 = math.tanh %273 : vector<2x8xf32>
    %c17 = arith.constant 17 : index
    %c0_72 = arith.constant 0 : index
    %c0_73 = arith.constant 0 : index
    %275 = vector.load %arg0[%c17, %c0_72, %c0_73] : memref<60x2x1xf32, #tpu.memory_space<vmem>>, vector<1x2x1xf32>
    %276 = vector.shape_cast %275 : vector<1x2x1xf32> to vector<2x1xf32>
    %277 = vector.shape_cast %276 : vector<2x1xf32> to vector<2x1x1xf32>
    %278 = vector.shape_cast %0 : vector<1x8xf32> to vector<1x1x8xf32>
    %279 = vector.broadcast %277 : vector<2x1x1xf32> to vector<2x1x8xf32>
    %280 = vector.broadcast %278 : vector<1x1x8xf32> to vector<2x1x8xf32>
    %281 = arith.mulf %279, %280 : vector<2x1x8xf32>
    %cst_74 = arith.constant dense<0.000000e+00> : vector<2x8xf32>
    %282 = vector.multi_reduction <add>, %281, %cst_74 [1] : vector<2x1x8xf32> to vector<2x8xf32>
    %283 = vector.shape_cast %274 : vector<2x8xf32> to vector<2x8x1xf32>
    %284 = vector.shape_cast %1 : vector<8x8xf32> to vector<1x8x8xf32>
    %285 = vector.broadcast %283 : vector<2x8x1xf32> to vector<2x8x8xf32>
    %286 = vector.broadcast %284 : vector<1x8x8xf32> to vector<2x8x8xf32>
    %287 = arith.mulf %285, %286 : vector<2x8x8xf32>
    %cst_75 = arith.constant dense<0.000000e+00> : vector<2x8xf32>
    %288 = vector.multi_reduction <add>, %287, %cst_75 [1] : vector<2x8x8xf32> to vector<2x8xf32>
    %289 = arith.addf %282, %288 : vector<2x8xf32>
    %290 = math.tanh %289 : vector<2x8xf32>
    %c18 = arith.constant 18 : index
    %c0_76 = arith.constant 0 : index
    %c0_77 = arith.constant 0 : index
    %291 = vector.load %arg0[%c18, %c0_76, %c0_77] : memref<60x2x1xf32, #tpu.memory_space<vmem>>, vector<1x2x1xf32>
    %292 = vector.shape_cast %291 : vector<1x2x1xf32> to vector<2x1xf32>
    %293 = vector.shape_cast %292 : vector<2x1xf32> to vector<2x1x1xf32>
    %294 = vector.shape_cast %0 : vector<1x8xf32> to vector<1x1x8xf32>
    %295 = vector.broadcast %293 : vector<2x1x1xf32> to vector<2x1x8xf32>
    %296 = vector.broadcast %294 : vector<1x1x8xf32> to vector<2x1x8xf32>
    %297 = arith.mulf %295, %296 : vector<2x1x8xf32>
    %cst_78 = arith.constant dense<0.000000e+00> : vector<2x8xf32>
    %298 = vector.multi_reduction <add>, %297, %cst_78 [1] : vector<2x1x8xf32> to vector<2x8xf32>
    %299 = vector.shape_cast %290 : vector<2x8xf32> to vector<2x8x1xf32>
    %300 = vector.shape_cast %1 : vector<8x8xf32> to vector<1x8x8xf32>
    %301 = vector.broadcast %299 : vector<2x8x1xf32> to vector<2x8x8xf32>
    %302 = vector.broadcast %300 : vector<1x8x8xf32> to vector<2x8x8xf32>
    %303 = arith.mulf %301, %302 : vector<2x8x8xf32>
    %cst_79 = arith.constant dense<0.000000e+00> : vector<2x8xf32>
    %304 = vector.multi_reduction <add>, %303, %cst_79 [1] : vector<2x8x8xf32> to vector<2x8xf32>
    %305 = arith.addf %298, %304 : vector<2x8xf32>
    %306 = math.tanh %305 : vector<2x8xf32>
    %c19 = arith.constant 19 : index
    %c0_80 = arith.constant 0 : index
    %c0_81 = arith.constant 0 : index
    %307 = vector.load %arg0[%c19, %c0_80, %c0_81] : memref<60x2x1xf32, #tpu.memory_space<vmem>>, vector<1x2x1xf32>
    %308 = vector.shape_cast %307 : vector<1x2x1xf32> to vector<2x1xf32>
    %309 = vector.shape_cast %308 : vector<2x1xf32> to vector<2x1x1xf32>
    %310 = vector.shape_cast %0 : vector<1x8xf32> to vector<1x1x8xf32>
    %311 = vector.broadcast %309 : vector<2x1x1xf32> to vector<2x1x8xf32>
    %312 = vector.broadcast %310 : vector<1x1x8xf32> to vector<2x1x8xf32>
    %313 = arith.mulf %311, %312 : vector<2x1x8xf32>
    %cst_82 = arith.constant dense<0.000000e+00> : vector<2x8xf32>
    %314 = vector.multi_reduction <add>, %313, %cst_82 [1] : vector<2x1x8xf32> to vector<2x8xf32>
    %315 = vector.shape_cast %306 : vector<2x8xf32> to vector<2x8x1xf32>
    %316 = vector.shape_cast %1 : vector<8x8xf32> to vector<1x8x8xf32>
    %317 = vector.broadcast %315 : vector<2x8x1xf32> to vector<2x8x8xf32>
    %318 = vector.broadcast %316 : vector<1x8x8xf32> to vector<2x8x8xf32>
    %319 = arith.mulf %317, %318 : vector<2x8x8xf32>
    %cst_83 = arith.constant dense<0.000000e+00> : vector<2x8xf32>
    %320 = vector.multi_reduction <add>, %319, %cst_83 [1] : vector<2x8x8xf32> to vector<2x8xf32>
    %321 = arith.addf %314, %320 : vector<2x8xf32>
    %322 = math.tanh %321 : vector<2x8xf32>
    %c20 = arith.constant 20 : index
    %c0_84 = arith.constant 0 : index
    %c0_85 = arith.constant 0 : index
    %323 = vector.load %arg0[%c20, %c0_84, %c0_85] : memref<60x2x1xf32, #tpu.memory_space<vmem>>, vector<1x2x1xf32>
    %324 = vector.shape_cast %323 : vector<1x2x1xf32> to vector<2x1xf32>
    %325 = vector.shape_cast %324 : vector<2x1xf32> to vector<2x1x1xf32>
    %326 = vector.shape_cast %0 : vector<1x8xf32> to vector<1x1x8xf32>
    %327 = vector.broadcast %325 : vector<2x1x1xf32> to vector<2x1x8xf32>
    %328 = vector.broadcast %326 : vector<1x1x8xf32> to vector<2x1x8xf32>
    %329 = arith.mulf %327, %328 : vector<2x1x8xf32>
    %cst_86 = arith.constant dense<0.000000e+00> : vector<2x8xf32>
    %330 = vector.multi_reduction <add>, %329, %cst_86 [1] : vector<2x1x8xf32> to vector<2x8xf32>
    %331 = vector.shape_cast %322 : vector<2x8xf32> to vector<2x8x1xf32>
    %332 = vector.shape_cast %1 : vector<8x8xf32> to vector<1x8x8xf32>
    %333 = vector.broadcast %331 : vector<2x8x1xf32> to vector<2x8x8xf32>
    %334 = vector.broadcast %332 : vector<1x8x8xf32> to vector<2x8x8xf32>
    %335 = arith.mulf %333, %334 : vector<2x8x8xf32>
    %cst_87 = arith.constant dense<0.000000e+00> : vector<2x8xf32>
    %336 = vector.multi_reduction <add>, %335, %cst_87 [1] : vector<2x8x8xf32> to vector<2x8xf32>
    %337 = arith.addf %330, %336 : vector<2x8xf32>
    %338 = math.tanh %337 : vector<2x8xf32>
    %c21 = arith.constant 21 : index
    %c0_88 = arith.constant 0 : index
    %c0_89 = arith.constant 0 : index
    %339 = vector.load %arg0[%c21, %c0_88, %c0_89] : memref<60x2x1xf32, #tpu.memory_space<vmem>>, vector<1x2x1xf32>
    %340 = vector.shape_cast %339 : vector<1x2x1xf32> to vector<2x1xf32>
    %341 = vector.shape_cast %340 : vector<2x1xf32> to vector<2x1x1xf32>
    %342 = vector.shape_cast %0 : vector<1x8xf32> to vector<1x1x8xf32>
    %343 = vector.broadcast %341 : vector<2x1x1xf32> to vector<2x1x8xf32>
    %344 = vector.broadcast %342 : vector<1x1x8xf32> to vector<2x1x8xf32>
    %345 = arith.mulf %343, %344 : vector<2x1x8xf32>
    %cst_90 = arith.constant dense<0.000000e+00> : vector<2x8xf32>
    %346 = vector.multi_reduction <add>, %345, %cst_90 [1] : vector<2x1x8xf32> to vector<2x8xf32>
    %347 = vector.shape_cast %338 : vector<2x8xf32> to vector<2x8x1xf32>
    %348 = vector.shape_cast %1 : vector<8x8xf32> to vector<1x8x8xf32>
    %349 = vector.broadcast %347 : vector<2x8x1xf32> to vector<2x8x8xf32>
    %350 = vector.broadcast %348 : vector<1x8x8xf32> to vector<2x8x8xf32>
    %351 = arith.mulf %349, %350 : vector<2x8x8xf32>
    %cst_91 = arith.constant dense<0.000000e+00> : vector<2x8xf32>
    %352 = vector.multi_reduction <add>, %351, %cst_91 [1] : vector<2x8x8xf32> to vector<2x8xf32>
    %353 = arith.addf %346, %352 : vector<2x8xf32>
    %354 = math.tanh %353 : vector<2x8xf32>
    %c22 = arith.constant 22 : index
    %c0_92 = arith.constant 0 : index
    %c0_93 = arith.constant 0 : index
    %355 = vector.load %arg0[%c22, %c0_92, %c0_93] : memref<60x2x1xf32, #tpu.memory_space<vmem>>, vector<1x2x1xf32>
    %356 = vector.shape_cast %355 : vector<1x2x1xf32> to vector<2x1xf32>
    %357 = vector.shape_cast %356 : vector<2x1xf32> to vector<2x1x1xf32>
    %358 = vector.shape_cast %0 : vector<1x8xf32> to vector<1x1x8xf32>
    %359 = vector.broadcast %357 : vector<2x1x1xf32> to vector<2x1x8xf32>
    %360 = vector.broadcast %358 : vector<1x1x8xf32> to vector<2x1x8xf32>
    %361 = arith.mulf %359, %360 : vector<2x1x8xf32>
    %cst_94 = arith.constant dense<0.000000e+00> : vector<2x8xf32>
    %362 = vector.multi_reduction <add>, %361, %cst_94 [1] : vector<2x1x8xf32> to vector<2x8xf32>
    %363 = vector.shape_cast %354 : vector<2x8xf32> to vector<2x8x1xf32>
    %364 = vector.shape_cast %1 : vector<8x8xf32> to vector<1x8x8xf32>
    %365 = vector.broadcast %363 : vector<2x8x1xf32> to vector<2x8x8xf32>
    %366 = vector.broadcast %364 : vector<1x8x8xf32> to vector<2x8x8xf32>
    %367 = arith.mulf %365, %366 : vector<2x8x8xf32>
    %cst_95 = arith.constant dense<0.000000e+00> : vector<2x8xf32>
    %368 = vector.multi_reduction <add>, %367, %cst_95 [1] : vector<2x8x8xf32> to vector<2x8xf32>
    %369 = arith.addf %362, %368 : vector<2x8xf32>
    %370 = math.tanh %369 : vector<2x8xf32>
    %c23 = arith.constant 23 : index
    %c0_96 = arith.constant 0 : index
    %c0_97 = arith.constant 0 : index
    %371 = vector.load %arg0[%c23, %c0_96, %c0_97] : memref<60x2x1xf32, #tpu.memory_space<vmem>>, vector<1x2x1xf32>
    %372 = vector.shape_cast %371 : vector<1x2x1xf32> to vector<2x1xf32>
    %373 = vector.shape_cast %372 : vector<2x1xf32> to vector<2x1x1xf32>
    %374 = vector.shape_cast %0 : vector<1x8xf32> to vector<1x1x8xf32>
    %375 = vector.broadcast %373 : vector<2x1x1xf32> to vector<2x1x8xf32>
    %376 = vector.broadcast %374 : vector<1x1x8xf32> to vector<2x1x8xf32>
    %377 = arith.mulf %375, %376 : vector<2x1x8xf32>
    %cst_98 = arith.constant dense<0.000000e+00> : vector<2x8xf32>
    %378 = vector.multi_reduction <add>, %377, %cst_98 [1] : vector<2x1x8xf32> to vector<2x8xf32>
    %379 = vector.shape_cast %370 : vector<2x8xf32> to vector<2x8x1xf32>
    %380 = vector.shape_cast %1 : vector<8x8xf32> to vector<1x8x8xf32>
    %381 = vector.broadcast %379 : vector<2x8x1xf32> to vector<2x8x8xf32>
    %382 = vector.broadcast %380 : vector<1x8x8xf32> to vector<2x8x8xf32>
    %383 = arith.mulf %381, %382 : vector<2x8x8xf32>
    %cst_99 = arith.constant dense<0.000000e+00> : vector<2x8xf32>
    %384 = vector.multi_reduction <add>, %383, %cst_99 [1] : vector<2x8x8xf32> to vector<2x8xf32>
    %385 = arith.addf %378, %384 : vector<2x8xf32>
    %386 = math.tanh %385 : vector<2x8xf32>
    %c24 = arith.constant 24 : index
    %c0_100 = arith.constant 0 : index
    %c0_101 = arith.constant 0 : index
    %387 = vector.load %arg0[%c24, %c0_100, %c0_101] : memref<60x2x1xf32, #tpu.memory_space<vmem>>, vector<1x2x1xf32>
    %388 = vector.shape_cast %387 : vector<1x2x1xf32> to vector<2x1xf32>
    %389 = vector.shape_cast %388 : vector<2x1xf32> to vector<2x1x1xf32>
    %390 = vector.shape_cast %0 : vector<1x8xf32> to vector<1x1x8xf32>
    %391 = vector.broadcast %389 : vector<2x1x1xf32> to vector<2x1x8xf32>
    %392 = vector.broadcast %390 : vector<1x1x8xf32> to vector<2x1x8xf32>
    %393 = arith.mulf %391, %392 : vector<2x1x8xf32>
    %cst_102 = arith.constant dense<0.000000e+00> : vector<2x8xf32>
    %394 = vector.multi_reduction <add>, %393, %cst_102 [1] : vector<2x1x8xf32> to vector<2x8xf32>
    %395 = vector.shape_cast %386 : vector<2x8xf32> to vector<2x8x1xf32>
    %396 = vector.shape_cast %1 : vector<8x8xf32> to vector<1x8x8xf32>
    %397 = vector.broadcast %395 : vector<2x8x1xf32> to vector<2x8x8xf32>
    %398 = vector.broadcast %396 : vector<1x8x8xf32> to vector<2x8x8xf32>
    %399 = arith.mulf %397, %398 : vector<2x8x8xf32>
    %cst_103 = arith.constant dense<0.000000e+00> : vector<2x8xf32>
    %400 = vector.multi_reduction <add>, %399, %cst_103 [1] : vector<2x8x8xf32> to vector<2x8xf32>
    %401 = arith.addf %394, %400 : vector<2x8xf32>
    %402 = math.tanh %401 : vector<2x8xf32>
    %c25 = arith.constant 25 : index
    %c0_104 = arith.constant 0 : index
    %c0_105 = arith.constant 0 : index
    %403 = vector.load %arg0[%c25, %c0_104, %c0_105] : memref<60x2x1xf32, #tpu.memory_space<vmem>>, vector<1x2x1xf32>
    %404 = vector.shape_cast %403 : vector<1x2x1xf32> to vector<2x1xf32>
    %405 = vector.shape_cast %404 : vector<2x1xf32> to vector<2x1x1xf32>
    %406 = vector.shape_cast %0 : vector<1x8xf32> to vector<1x1x8xf32>
    %407 = vector.broadcast %405 : vector<2x1x1xf32> to vector<2x1x8xf32>
    %408 = vector.broadcast %406 : vector<1x1x8xf32> to vector<2x1x8xf32>
    %409 = arith.mulf %407, %408 : vector<2x1x8xf32>
    %cst_106 = arith.constant dense<0.000000e+00> : vector<2x8xf32>
    %410 = vector.multi_reduction <add>, %409, %cst_106 [1] : vector<2x1x8xf32> to vector<2x8xf32>
    %411 = vector.shape_cast %402 : vector<2x8xf32> to vector<2x8x1xf32>
    %412 = vector.shape_cast %1 : vector<8x8xf32> to vector<1x8x8xf32>
    %413 = vector.broadcast %411 : vector<2x8x1xf32> to vector<2x8x8xf32>
    %414 = vector.broadcast %412 : vector<1x8x8xf32> to vector<2x8x8xf32>
    %415 = arith.mulf %413, %414 : vector<2x8x8xf32>
    %cst_107 = arith.constant dense<0.000000e+00> : vector<2x8xf32>
    %416 = vector.multi_reduction <add>, %415, %cst_107 [1] : vector<2x8x8xf32> to vector<2x8xf32>
    %417 = arith.addf %410, %416 : vector<2x8xf32>
    %418 = math.tanh %417 : vector<2x8xf32>
    %c26 = arith.constant 26 : index
    %c0_108 = arith.constant 0 : index
    %c0_109 = arith.constant 0 : index
    %419 = vector.load %arg0[%c26, %c0_108, %c0_109] : memref<60x2x1xf32, #tpu.memory_space<vmem>>, vector<1x2x1xf32>
    %420 = vector.shape_cast %419 : vector<1x2x1xf32> to vector<2x1xf32>
    %421 = vector.shape_cast %420 : vector<2x1xf32> to vector<2x1x1xf32>
    %422 = vector.shape_cast %0 : vector<1x8xf32> to vector<1x1x8xf32>
    %423 = vector.broadcast %421 : vector<2x1x1xf32> to vector<2x1x8xf32>
    %424 = vector.broadcast %422 : vector<1x1x8xf32> to vector<2x1x8xf32>
    %425 = arith.mulf %423, %424 : vector<2x1x8xf32>
    %cst_110 = arith.constant dense<0.000000e+00> : vector<2x8xf32>
    %426 = vector.multi_reduction <add>, %425, %cst_110 [1] : vector<2x1x8xf32> to vector<2x8xf32>
    %427 = vector.shape_cast %418 : vector<2x8xf32> to vector<2x8x1xf32>
    %428 = vector.shape_cast %1 : vector<8x8xf32> to vector<1x8x8xf32>
    %429 = vector.broadcast %427 : vector<2x8x1xf32> to vector<2x8x8xf32>
    %430 = vector.broadcast %428 : vector<1x8x8xf32> to vector<2x8x8xf32>
    %431 = arith.mulf %429, %430 : vector<2x8x8xf32>
    %cst_111 = arith.constant dense<0.000000e+00> : vector<2x8xf32>
    %432 = vector.multi_reduction <add>, %431, %cst_111 [1] : vector<2x8x8xf32> to vector<2x8xf32>
    %433 = arith.addf %426, %432 : vector<2x8xf32>
    %434 = math.tanh %433 : vector<2x8xf32>
    %c27 = arith.constant 27 : index
    %c0_112 = arith.constant 0 : index
    %c0_113 = arith.constant 0 : index
    %435 = vector.load %arg0[%c27, %c0_112, %c0_113] : memref<60x2x1xf32, #tpu.memory_space<vmem>>, vector<1x2x1xf32>
    %436 = vector.shape_cast %435 : vector<1x2x1xf32> to vector<2x1xf32>
    %437 = vector.shape_cast %436 : vector<2x1xf32> to vector<2x1x1xf32>
    %438 = vector.shape_cast %0 : vector<1x8xf32> to vector<1x1x8xf32>
    %439 = vector.broadcast %437 : vector<2x1x1xf32> to vector<2x1x8xf32>
    %440 = vector.broadcast %438 : vector<1x1x8xf32> to vector<2x1x8xf32>
    %441 = arith.mulf %439, %440 : vector<2x1x8xf32>
    %cst_114 = arith.constant dense<0.000000e+00> : vector<2x8xf32>
    %442 = vector.multi_reduction <add>, %441, %cst_114 [1] : vector<2x1x8xf32> to vector<2x8xf32>
    %443 = vector.shape_cast %434 : vector<2x8xf32> to vector<2x8x1xf32>
    %444 = vector.shape_cast %1 : vector<8x8xf32> to vector<1x8x8xf32>
    %445 = vector.broadcast %443 : vector<2x8x1xf32> to vector<2x8x8xf32>
    %446 = vector.broadcast %444 : vector<1x8x8xf32> to vector<2x8x8xf32>
    %447 = arith.mulf %445, %446 : vector<2x8x8xf32>
    %cst_115 = arith.constant dense<0.000000e+00> : vector<2x8xf32>
    %448 = vector.multi_reduction <add>, %447, %cst_115 [1] : vector<2x8x8xf32> to vector<2x8xf32>
    %449 = arith.addf %442, %448 : vector<2x8xf32>
    %450 = math.tanh %449 : vector<2x8xf32>
    %c28 = arith.constant 28 : index
    %c0_116 = arith.constant 0 : index
    %c0_117 = arith.constant 0 : index
    %451 = vector.load %arg0[%c28, %c0_116, %c0_117] : memref<60x2x1xf32, #tpu.memory_space<vmem>>, vector<1x2x1xf32>
    %452 = vector.shape_cast %451 : vector<1x2x1xf32> to vector<2x1xf32>
    %453 = vector.shape_cast %452 : vector<2x1xf32> to vector<2x1x1xf32>
    %454 = vector.shape_cast %0 : vector<1x8xf32> to vector<1x1x8xf32>
    %455 = vector.broadcast %453 : vector<2x1x1xf32> to vector<2x1x8xf32>
    %456 = vector.broadcast %454 : vector<1x1x8xf32> to vector<2x1x8xf32>
    %457 = arith.mulf %455, %456 : vector<2x1x8xf32>
    %cst_118 = arith.constant dense<0.000000e+00> : vector<2x8xf32>
    %458 = vector.multi_reduction <add>, %457, %cst_118 [1] : vector<2x1x8xf32> to vector<2x8xf32>
    %459 = vector.shape_cast %450 : vector<2x8xf32> to vector<2x8x1xf32>
    %460 = vector.shape_cast %1 : vector<8x8xf32> to vector<1x8x8xf32>
    %461 = vector.broadcast %459 : vector<2x8x1xf32> to vector<2x8x8xf32>
    %462 = vector.broadcast %460 : vector<1x8x8xf32> to vector<2x8x8xf32>
    %463 = arith.mulf %461, %462 : vector<2x8x8xf32>
    %cst_119 = arith.constant dense<0.000000e+00> : vector<2x8xf32>
    %464 = vector.multi_reduction <add>, %463, %cst_119 [1] : vector<2x8x8xf32> to vector<2x8xf32>
    %465 = arith.addf %458, %464 : vector<2x8xf32>
    %466 = math.tanh %465 : vector<2x8xf32>
    %c29 = arith.constant 29 : index
    %c0_120 = arith.constant 0 : index
    %c0_121 = arith.constant 0 : index
    %467 = vector.load %arg0[%c29, %c0_120, %c0_121] : memref<60x2x1xf32, #tpu.memory_space<vmem>>, vector<1x2x1xf32>
    %468 = vector.shape_cast %467 : vector<1x2x1xf32> to vector<2x1xf32>
    %469 = vector.shape_cast %468 : vector<2x1xf32> to vector<2x1x1xf32>
    %470 = vector.shape_cast %0 : vector<1x8xf32> to vector<1x1x8xf32>
    %471 = vector.broadcast %469 : vector<2x1x1xf32> to vector<2x1x8xf32>
    %472 = vector.broadcast %470 : vector<1x1x8xf32> to vector<2x1x8xf32>
    %473 = arith.mulf %471, %472 : vector<2x1x8xf32>
    %cst_122 = arith.constant dense<0.000000e+00> : vector<2x8xf32>
    %474 = vector.multi_reduction <add>, %473, %cst_122 [1] : vector<2x1x8xf32> to vector<2x8xf32>
    %475 = vector.shape_cast %466 : vector<2x8xf32> to vector<2x8x1xf32>
    %476 = vector.shape_cast %1 : vector<8x8xf32> to vector<1x8x8xf32>
    %477 = vector.broadcast %475 : vector<2x8x1xf32> to vector<2x8x8xf32>
    %478 = vector.broadcast %476 : vector<1x8x8xf32> to vector<2x8x8xf32>
    %479 = arith.mulf %477, %478 : vector<2x8x8xf32>
    %cst_123 = arith.constant dense<0.000000e+00> : vector<2x8xf32>
    %480 = vector.multi_reduction <add>, %479, %cst_123 [1] : vector<2x8x8xf32> to vector<2x8xf32>
    %481 = arith.addf %474, %480 : vector<2x8xf32>
    %482 = math.tanh %481 : vector<2x8xf32>
    %c30 = arith.constant 30 : index
    %c0_124 = arith.constant 0 : index
    %c0_125 = arith.constant 0 : index
    %483 = vector.load %arg0[%c30, %c0_124, %c0_125] : memref<60x2x1xf32, #tpu.memory_space<vmem>>, vector<1x2x1xf32>
    %484 = vector.shape_cast %483 : vector<1x2x1xf32> to vector<2x1xf32>
    %485 = vector.shape_cast %484 : vector<2x1xf32> to vector<2x1x1xf32>
    %486 = vector.shape_cast %0 : vector<1x8xf32> to vector<1x1x8xf32>
    %487 = vector.broadcast %485 : vector<2x1x1xf32> to vector<2x1x8xf32>
    %488 = vector.broadcast %486 : vector<1x1x8xf32> to vector<2x1x8xf32>
    %489 = arith.mulf %487, %488 : vector<2x1x8xf32>
    %cst_126 = arith.constant dense<0.000000e+00> : vector<2x8xf32>
    %490 = vector.multi_reduction <add>, %489, %cst_126 [1] : vector<2x1x8xf32> to vector<2x8xf32>
    %491 = vector.shape_cast %482 : vector<2x8xf32> to vector<2x8x1xf32>
    %492 = vector.shape_cast %1 : vector<8x8xf32> to vector<1x8x8xf32>
    %493 = vector.broadcast %491 : vector<2x8x1xf32> to vector<2x8x8xf32>
    %494 = vector.broadcast %492 : vector<1x8x8xf32> to vector<2x8x8xf32>
    %495 = arith.mulf %493, %494 : vector<2x8x8xf32>
    %cst_127 = arith.constant dense<0.000000e+00> : vector<2x8xf32>
    %496 = vector.multi_reduction <add>, %495, %cst_127 [1] : vector<2x8x8xf32> to vector<2x8xf32>
    %497 = arith.addf %490, %496 : vector<2x8xf32>
    %498 = math.tanh %497 : vector<2x8xf32>
    %c31 = arith.constant 31 : index
    %c0_128 = arith.constant 0 : index
    %c0_129 = arith.constant 0 : index
    %499 = vector.load %arg0[%c31, %c0_128, %c0_129] : memref<60x2x1xf32, #tpu.memory_space<vmem>>, vector<1x2x1xf32>
    %500 = vector.shape_cast %499 : vector<1x2x1xf32> to vector<2x1xf32>
    %501 = vector.shape_cast %500 : vector<2x1xf32> to vector<2x1x1xf32>
    %502 = vector.shape_cast %0 : vector<1x8xf32> to vector<1x1x8xf32>
    %503 = vector.broadcast %501 : vector<2x1x1xf32> to vector<2x1x8xf32>
    %504 = vector.broadcast %502 : vector<1x1x8xf32> to vector<2x1x8xf32>
    %505 = arith.mulf %503, %504 : vector<2x1x8xf32>
    %cst_130 = arith.constant dense<0.000000e+00> : vector<2x8xf32>
    %506 = vector.multi_reduction <add>, %505, %cst_130 [1] : vector<2x1x8xf32> to vector<2x8xf32>
    %507 = vector.shape_cast %498 : vector<2x8xf32> to vector<2x8x1xf32>
    %508 = vector.shape_cast %1 : vector<8x8xf32> to vector<1x8x8xf32>
    %509 = vector.broadcast %507 : vector<2x8x1xf32> to vector<2x8x8xf32>
    %510 = vector.broadcast %508 : vector<1x8x8xf32> to vector<2x8x8xf32>
    %511 = arith.mulf %509, %510 : vector<2x8x8xf32>
    %cst_131 = arith.constant dense<0.000000e+00> : vector<2x8xf32>
    %512 = vector.multi_reduction <add>, %511, %cst_131 [1] : vector<2x8x8xf32> to vector<2x8xf32>
    %513 = arith.addf %506, %512 : vector<2x8xf32>
    %514 = math.tanh %513 : vector<2x8xf32>
    %c32 = arith.constant 32 : index
    %c0_132 = arith.constant 0 : index
    %c0_133 = arith.constant 0 : index
    %515 = vector.load %arg0[%c32, %c0_132, %c0_133] : memref<60x2x1xf32, #tpu.memory_space<vmem>>, vector<1x2x1xf32>
    %516 = vector.shape_cast %515 : vector<1x2x1xf32> to vector<2x1xf32>
    %517 = vector.shape_cast %516 : vector<2x1xf32> to vector<2x1x1xf32>
    %518 = vector.shape_cast %0 : vector<1x8xf32> to vector<1x1x8xf32>
    %519 = vector.broadcast %517 : vector<2x1x1xf32> to vector<2x1x8xf32>
    %520 = vector.broadcast %518 : vector<1x1x8xf32> to vector<2x1x8xf32>
    %521 = arith.mulf %519, %520 : vector<2x1x8xf32>
    %cst_134 = arith.constant dense<0.000000e+00> : vector<2x8xf32>
    %522 = vector.multi_reduction <add>, %521, %cst_134 [1] : vector<2x1x8xf32> to vector<2x8xf32>
    %523 = vector.shape_cast %514 : vector<2x8xf32> to vector<2x8x1xf32>
    %524 = vector.shape_cast %1 : vector<8x8xf32> to vector<1x8x8xf32>
    %525 = vector.broadcast %523 : vector<2x8x1xf32> to vector<2x8x8xf32>
    %526 = vector.broadcast %524 : vector<1x8x8xf32> to vector<2x8x8xf32>
    %527 = arith.mulf %525, %526 : vector<2x8x8xf32>
    %cst_135 = arith.constant dense<0.000000e+00> : vector<2x8xf32>
    %528 = vector.multi_reduction <add>, %527, %cst_135 [1] : vector<2x8x8xf32> to vector<2x8xf32>
    %529 = arith.addf %522, %528 : vector<2x8xf32>
    %530 = math.tanh %529 : vector<2x8xf32>
    %c33 = arith.constant 33 : index
    %c0_136 = arith.constant 0 : index
    %c0_137 = arith.constant 0 : index
    %531 = vector.load %arg0[%c33, %c0_136, %c0_137] : memref<60x2x1xf32, #tpu.memory_space<vmem>>, vector<1x2x1xf32>
    %532 = vector.shape_cast %531 : vector<1x2x1xf32> to vector<2x1xf32>
    %533 = vector.shape_cast %532 : vector<2x1xf32> to vector<2x1x1xf32>
    %534 = vector.shape_cast %0 : vector<1x8xf32> to vector<1x1x8xf32>
    %535 = vector.broadcast %533 : vector<2x1x1xf32> to vector<2x1x8xf32>
    %536 = vector.broadcast %534 : vector<1x1x8xf32> to vector<2x1x8xf32>
    %537 = arith.mulf %535, %536 : vector<2x1x8xf32>
    %cst_138 = arith.constant dense<0.000000e+00> : vector<2x8xf32>
    %538 = vector.multi_reduction <add>, %537, %cst_138 [1] : vector<2x1x8xf32> to vector<2x8xf32>
    %539 = vector.shape_cast %530 : vector<2x8xf32> to vector<2x8x1xf32>
    %540 = vector.shape_cast %1 : vector<8x8xf32> to vector<1x8x8xf32>
    %541 = vector.broadcast %539 : vector<2x8x1xf32> to vector<2x8x8xf32>
    %542 = vector.broadcast %540 : vector<1x8x8xf32> to vector<2x8x8xf32>
    %543 = arith.mulf %541, %542 : vector<2x8x8xf32>
    %cst_139 = arith.constant dense<0.000000e+00> : vector<2x8xf32>
    %544 = vector.multi_reduction <add>, %543, %cst_139 [1] : vector<2x8x8xf32> to vector<2x8xf32>
    %545 = arith.addf %538, %544 : vector<2x8xf32>
    %546 = math.tanh %545 : vector<2x8xf32>
    %c34 = arith.constant 34 : index
    %c0_140 = arith.constant 0 : index
    %c0_141 = arith.constant 0 : index
    %547 = vector.load %arg0[%c34, %c0_140, %c0_141] : memref<60x2x1xf32, #tpu.memory_space<vmem>>, vector<1x2x1xf32>
    %548 = vector.shape_cast %547 : vector<1x2x1xf32> to vector<2x1xf32>
    %549 = vector.shape_cast %548 : vector<2x1xf32> to vector<2x1x1xf32>
    %550 = vector.shape_cast %0 : vector<1x8xf32> to vector<1x1x8xf32>
    %551 = vector.broadcast %549 : vector<2x1x1xf32> to vector<2x1x8xf32>
    %552 = vector.broadcast %550 : vector<1x1x8xf32> to vector<2x1x8xf32>
    %553 = arith.mulf %551, %552 : vector<2x1x8xf32>
    %cst_142 = arith.constant dense<0.000000e+00> : vector<2x8xf32>
    %554 = vector.multi_reduction <add>, %553, %cst_142 [1] : vector<2x1x8xf32> to vector<2x8xf32>
    %555 = vector.shape_cast %546 : vector<2x8xf32> to vector<2x8x1xf32>
    %556 = vector.shape_cast %1 : vector<8x8xf32> to vector<1x8x8xf32>
    %557 = vector.broadcast %555 : vector<2x8x1xf32> to vector<2x8x8xf32>
    %558 = vector.broadcast %556 : vector<1x8x8xf32> to vector<2x8x8xf32>
    %559 = arith.mulf %557, %558 : vector<2x8x8xf32>
    %cst_143 = arith.constant dense<0.000000e+00> : vector<2x8xf32>
    %560 = vector.multi_reduction <add>, %559, %cst_143 [1] : vector<2x8x8xf32> to vector<2x8xf32>
    %561 = arith.addf %554, %560 : vector<2x8xf32>
    %562 = math.tanh %561 : vector<2x8xf32>
    %c35 = arith.constant 35 : index
    %c0_144 = arith.constant 0 : index
    %c0_145 = arith.constant 0 : index
    %563 = vector.load %arg0[%c35, %c0_144, %c0_145] : memref<60x2x1xf32, #tpu.memory_space<vmem>>, vector<1x2x1xf32>
    %564 = vector.shape_cast %563 : vector<1x2x1xf32> to vector<2x1xf32>
    %565 = vector.shape_cast %564 : vector<2x1xf32> to vector<2x1x1xf32>
    %566 = vector.shape_cast %0 : vector<1x8xf32> to vector<1x1x8xf32>
    %567 = vector.broadcast %565 : vector<2x1x1xf32> to vector<2x1x8xf32>
    %568 = vector.broadcast %566 : vector<1x1x8xf32> to vector<2x1x8xf32>
    %569 = arith.mulf %567, %568 : vector<2x1x8xf32>
    %cst_146 = arith.constant dense<0.000000e+00> : vector<2x8xf32>
    %570 = vector.multi_reduction <add>, %569, %cst_146 [1] : vector<2x1x8xf32> to vector<2x8xf32>
    %571 = vector.shape_cast %562 : vector<2x8xf32> to vector<2x8x1xf32>
    %572 = vector.shape_cast %1 : vector<8x8xf32> to vector<1x8x8xf32>
    %573 = vector.broadcast %571 : vector<2x8x1xf32> to vector<2x8x8xf32>
    %574 = vector.broadcast %572 : vector<1x8x8xf32> to vector<2x8x8xf32>
    %575 = arith.mulf %573, %574 : vector<2x8x8xf32>
    %cst_147 = arith.constant dense<0.000000e+00> : vector<2x8xf32>
    %576 = vector.multi_reduction <add>, %575, %cst_147 [1] : vector<2x8x8xf32> to vector<2x8xf32>
    %577 = arith.addf %570, %576 : vector<2x8xf32>
    %578 = math.tanh %577 : vector<2x8xf32>
    %c36 = arith.constant 36 : index
    %c0_148 = arith.constant 0 : index
    %c0_149 = arith.constant 0 : index
    %579 = vector.load %arg0[%c36, %c0_148, %c0_149] : memref<60x2x1xf32, #tpu.memory_space<vmem>>, vector<1x2x1xf32>
    %580 = vector.shape_cast %579 : vector<1x2x1xf32> to vector<2x1xf32>
    %581 = vector.shape_cast %580 : vector<2x1xf32> to vector<2x1x1xf32>
    %582 = vector.shape_cast %0 : vector<1x8xf32> to vector<1x1x8xf32>
    %583 = vector.broadcast %581 : vector<2x1x1xf32> to vector<2x1x8xf32>
    %584 = vector.broadcast %582 : vector<1x1x8xf32> to vector<2x1x8xf32>
    %585 = arith.mulf %583, %584 : vector<2x1x8xf32>
    %cst_150 = arith.constant dense<0.000000e+00> : vector<2x8xf32>
    %586 = vector.multi_reduction <add>, %585, %cst_150 [1] : vector<2x1x8xf32> to vector<2x8xf32>
    %587 = vector.shape_cast %578 : vector<2x8xf32> to vector<2x8x1xf32>
    %588 = vector.shape_cast %1 : vector<8x8xf32> to vector<1x8x8xf32>
    %589 = vector.broadcast %587 : vector<2x8x1xf32> to vector<2x8x8xf32>
    %590 = vector.broadcast %588 : vector<1x8x8xf32> to vector<2x8x8xf32>
    %591 = arith.mulf %589, %590 : vector<2x8x8xf32>
    %cst_151 = arith.constant dense<0.000000e+00> : vector<2x8xf32>
    %592 = vector.multi_reduction <add>, %591, %cst_151 [1] : vector<2x8x8xf32> to vector<2x8xf32>
    %593 = arith.addf %586, %592 : vector<2x8xf32>
    %594 = math.tanh %593 : vector<2x8xf32>
    %c37 = arith.constant 37 : index
    %c0_152 = arith.constant 0 : index
    %c0_153 = arith.constant 0 : index
    %595 = vector.load %arg0[%c37, %c0_152, %c0_153] : memref<60x2x1xf32, #tpu.memory_space<vmem>>, vector<1x2x1xf32>
    %596 = vector.shape_cast %595 : vector<1x2x1xf32> to vector<2x1xf32>
    %597 = vector.shape_cast %596 : vector<2x1xf32> to vector<2x1x1xf32>
    %598 = vector.shape_cast %0 : vector<1x8xf32> to vector<1x1x8xf32>
    %599 = vector.broadcast %597 : vector<2x1x1xf32> to vector<2x1x8xf32>
    %600 = vector.broadcast %598 : vector<1x1x8xf32> to vector<2x1x8xf32>
    %601 = arith.mulf %599, %600 : vector<2x1x8xf32>
    %cst_154 = arith.constant dense<0.000000e+00> : vector<2x8xf32>
    %602 = vector.multi_reduction <add>, %601, %cst_154 [1] : vector<2x1x8xf32> to vector<2x8xf32>
    %603 = vector.shape_cast %594 : vector<2x8xf32> to vector<2x8x1xf32>
    %604 = vector.shape_cast %1 : vector<8x8xf32> to vector<1x8x8xf32>
    %605 = vector.broadcast %603 : vector<2x8x1xf32> to vector<2x8x8xf32>
    %606 = vector.broadcast %604 : vector<1x8x8xf32> to vector<2x8x8xf32>
    %607 = arith.mulf %605, %606 : vector<2x8x8xf32>
    %cst_155 = arith.constant dense<0.000000e+00> : vector<2x8xf32>
    %608 = vector.multi_reduction <add>, %607, %cst_155 [1] : vector<2x8x8xf32> to vector<2x8xf32>
    %609 = arith.addf %602, %608 : vector<2x8xf32>
    %610 = math.tanh %609 : vector<2x8xf32>
    %c38 = arith.constant 38 : index
    %c0_156 = arith.constant 0 : index
    %c0_157 = arith.constant 0 : index
    %611 = vector.load %arg0[%c38, %c0_156, %c0_157] : memref<60x2x1xf32, #tpu.memory_space<vmem>>, vector<1x2x1xf32>
    %612 = vector.shape_cast %611 : vector<1x2x1xf32> to vector<2x1xf32>
    %613 = vector.shape_cast %612 : vector<2x1xf32> to vector<2x1x1xf32>
    %614 = vector.shape_cast %0 : vector<1x8xf32> to vector<1x1x8xf32>
    %615 = vector.broadcast %613 : vector<2x1x1xf32> to vector<2x1x8xf32>
    %616 = vector.broadcast %614 : vector<1x1x8xf32> to vector<2x1x8xf32>
    %617 = arith.mulf %615, %616 : vector<2x1x8xf32>
    %cst_158 = arith.constant dense<0.000000e+00> : vector<2x8xf32>
    %618 = vector.multi_reduction <add>, %617, %cst_158 [1] : vector<2x1x8xf32> to vector<2x8xf32>
    %619 = vector.shape_cast %610 : vector<2x8xf32> to vector<2x8x1xf32>
    %620 = vector.shape_cast %1 : vector<8x8xf32> to vector<1x8x8xf32>
    %621 = vector.broadcast %619 : vector<2x8x1xf32> to vector<2x8x8xf32>
    %622 = vector.broadcast %620 : vector<1x8x8xf32> to vector<2x8x8xf32>
    %623 = arith.mulf %621, %622 : vector<2x8x8xf32>
    %cst_159 = arith.constant dense<0.000000e+00> : vector<2x8xf32>
    %624 = vector.multi_reduction <add>, %623, %cst_159 [1] : vector<2x8x8xf32> to vector<2x8xf32>
    %625 = arith.addf %618, %624 : vector<2x8xf32>
    %626 = math.tanh %625 : vector<2x8xf32>
    %c39 = arith.constant 39 : index
    %c0_160 = arith.constant 0 : index
    %c0_161 = arith.constant 0 : index
    %627 = vector.load %arg0[%c39, %c0_160, %c0_161] : memref<60x2x1xf32, #tpu.memory_space<vmem>>, vector<1x2x1xf32>
    %628 = vector.shape_cast %627 : vector<1x2x1xf32> to vector<2x1xf32>
    %629 = vector.shape_cast %628 : vector<2x1xf32> to vector<2x1x1xf32>
    %630 = vector.shape_cast %0 : vector<1x8xf32> to vector<1x1x8xf32>
    %631 = vector.broadcast %629 : vector<2x1x1xf32> to vector<2x1x8xf32>
    %632 = vector.broadcast %630 : vector<1x1x8xf32> to vector<2x1x8xf32>
    %633 = arith.mulf %631, %632 : vector<2x1x8xf32>
    %cst_162 = arith.constant dense<0.000000e+00> : vector<2x8xf32>
    %634 = vector.multi_reduction <add>, %633, %cst_162 [1] : vector<2x1x8xf32> to vector<2x8xf32>
    %635 = vector.shape_cast %626 : vector<2x8xf32> to vector<2x8x1xf32>
    %636 = vector.shape_cast %1 : vector<8x8xf32> to vector<1x8x8xf32>
    %637 = vector.broadcast %635 : vector<2x8x1xf32> to vector<2x8x8xf32>
    %638 = vector.broadcast %636 : vector<1x8x8xf32> to vector<2x8x8xf32>
    %639 = arith.mulf %637, %638 : vector<2x8x8xf32>
    %cst_163 = arith.constant dense<0.000000e+00> : vector<2x8xf32>
    %640 = vector.multi_reduction <add>, %639, %cst_163 [1] : vector<2x8x8xf32> to vector<2x8xf32>
    %641 = arith.addf %634, %640 : vector<2x8xf32>
    %642 = math.tanh %641 : vector<2x8xf32>
    %c40 = arith.constant 40 : index
    %c0_164 = arith.constant 0 : index
    %c0_165 = arith.constant 0 : index
    %643 = vector.load %arg0[%c40, %c0_164, %c0_165] : memref<60x2x1xf32, #tpu.memory_space<vmem>>, vector<1x2x1xf32>
    %644 = vector.shape_cast %643 : vector<1x2x1xf32> to vector<2x1xf32>
    %645 = vector.shape_cast %644 : vector<2x1xf32> to vector<2x1x1xf32>
    %646 = vector.shape_cast %0 : vector<1x8xf32> to vector<1x1x8xf32>
    %647 = vector.broadcast %645 : vector<2x1x1xf32> to vector<2x1x8xf32>
    %648 = vector.broadcast %646 : vector<1x1x8xf32> to vector<2x1x8xf32>
    %649 = arith.mulf %647, %648 : vector<2x1x8xf32>
    %cst_166 = arith.constant dense<0.000000e+00> : vector<2x8xf32>
    %650 = vector.multi_reduction <add>, %649, %cst_166 [1] : vector<2x1x8xf32> to vector<2x8xf32>
    %651 = vector.shape_cast %642 : vector<2x8xf32> to vector<2x8x1xf32>
    %652 = vector.shape_cast %1 : vector<8x8xf32> to vector<1x8x8xf32>
    %653 = vector.broadcast %651 : vector<2x8x1xf32> to vector<2x8x8xf32>
    %654 = vector.broadcast %652 : vector<1x8x8xf32> to vector<2x8x8xf32>
    %655 = arith.mulf %653, %654 : vector<2x8x8xf32>
    %cst_167 = arith.constant dense<0.000000e+00> : vector<2x8xf32>
    %656 = vector.multi_reduction <add>, %655, %cst_167 [1] : vector<2x8x8xf32> to vector<2x8xf32>
    %657 = arith.addf %650, %656 : vector<2x8xf32>
    %658 = math.tanh %657 : vector<2x8xf32>
    %c41 = arith.constant 41 : index
    %c0_168 = arith.constant 0 : index
    %c0_169 = arith.constant 0 : index
    %659 = vector.load %arg0[%c41, %c0_168, %c0_169] : memref<60x2x1xf32, #tpu.memory_space<vmem>>, vector<1x2x1xf32>
    %660 = vector.shape_cast %659 : vector<1x2x1xf32> to vector<2x1xf32>
    %661 = vector.shape_cast %660 : vector<2x1xf32> to vector<2x1x1xf32>
    %662 = vector.shape_cast %0 : vector<1x8xf32> to vector<1x1x8xf32>
    %663 = vector.broadcast %661 : vector<2x1x1xf32> to vector<2x1x8xf32>
    %664 = vector.broadcast %662 : vector<1x1x8xf32> to vector<2x1x8xf32>
    %665 = arith.mulf %663, %664 : vector<2x1x8xf32>
    %cst_170 = arith.constant dense<0.000000e+00> : vector<2x8xf32>
    %666 = vector.multi_reduction <add>, %665, %cst_170 [1] : vector<2x1x8xf32> to vector<2x8xf32>
    %667 = vector.shape_cast %658 : vector<2x8xf32> to vector<2x8x1xf32>
    %668 = vector.shape_cast %1 : vector<8x8xf32> to vector<1x8x8xf32>
    %669 = vector.broadcast %667 : vector<2x8x1xf32> to vector<2x8x8xf32>
    %670 = vector.broadcast %668 : vector<1x8x8xf32> to vector<2x8x8xf32>
    %671 = arith.mulf %669, %670 : vector<2x8x8xf32>
    %cst_171 = arith.constant dense<0.000000e+00> : vector<2x8xf32>
    %672 = vector.multi_reduction <add>, %671, %cst_171 [1] : vector<2x8x8xf32> to vector<2x8xf32>
    %673 = arith.addf %666, %672 : vector<2x8xf32>
    %674 = math.tanh %673 : vector<2x8xf32>
    %c42 = arith.constant 42 : index
    %c0_172 = arith.constant 0 : index
    %c0_173 = arith.constant 0 : index
    %675 = vector.load %arg0[%c42, %c0_172, %c0_173] : memref<60x2x1xf32, #tpu.memory_space<vmem>>, vector<1x2x1xf32>
    %676 = vector.shape_cast %675 : vector<1x2x1xf32> to vector<2x1xf32>
    %677 = vector.shape_cast %676 : vector<2x1xf32> to vector<2x1x1xf32>
    %678 = vector.shape_cast %0 : vector<1x8xf32> to vector<1x1x8xf32>
    %679 = vector.broadcast %677 : vector<2x1x1xf32> to vector<2x1x8xf32>
    %680 = vector.broadcast %678 : vector<1x1x8xf32> to vector<2x1x8xf32>
    %681 = arith.mulf %679, %680 : vector<2x1x8xf32>
    %cst_174 = arith.constant dense<0.000000e+00> : vector<2x8xf32>
    %682 = vector.multi_reduction <add>, %681, %cst_174 [1] : vector<2x1x8xf32> to vector<2x8xf32>
    %683 = vector.shape_cast %674 : vector<2x8xf32> to vector<2x8x1xf32>
    %684 = vector.shape_cast %1 : vector<8x8xf32> to vector<1x8x8xf32>
    %685 = vector.broadcast %683 : vector<2x8x1xf32> to vector<2x8x8xf32>
    %686 = vector.broadcast %684 : vector<1x8x8xf32> to vector<2x8x8xf32>
    %687 = arith.mulf %685, %686 : vector<2x8x8xf32>
    %cst_175 = arith.constant dense<0.000000e+00> : vector<2x8xf32>
    %688 = vector.multi_reduction <add>, %687, %cst_175 [1] : vector<2x8x8xf32> to vector<2x8xf32>
    %689 = arith.addf %682, %688 : vector<2x8xf32>
    %690 = math.tanh %689 : vector<2x8xf32>
    %c43 = arith.constant 43 : index
    %c0_176 = arith.constant 0 : index
    %c0_177 = arith.constant 0 : index
    %691 = vector.load %arg0[%c43, %c0_176, %c0_177] : memref<60x2x1xf32, #tpu.memory_space<vmem>>, vector<1x2x1xf32>
    %692 = vector.shape_cast %691 : vector<1x2x1xf32> to vector<2x1xf32>
    %693 = vector.shape_cast %692 : vector<2x1xf32> to vector<2x1x1xf32>
    %694 = vector.shape_cast %0 : vector<1x8xf32> to vector<1x1x8xf32>
    %695 = vector.broadcast %693 : vector<2x1x1xf32> to vector<2x1x8xf32>
    %696 = vector.broadcast %694 : vector<1x1x8xf32> to vector<2x1x8xf32>
    %697 = arith.mulf %695, %696 : vector<2x1x8xf32>
    %cst_178 = arith.constant dense<0.000000e+00> : vector<2x8xf32>
    %698 = vector.multi_reduction <add>, %697, %cst_178 [1] : vector<2x1x8xf32> to vector<2x8xf32>
    %699 = vector.shape_cast %690 : vector<2x8xf32> to vector<2x8x1xf32>
    %700 = vector.shape_cast %1 : vector<8x8xf32> to vector<1x8x8xf32>
    %701 = vector.broadcast %699 : vector<2x8x1xf32> to vector<2x8x8xf32>
    %702 = vector.broadcast %700 : vector<1x8x8xf32> to vector<2x8x8xf32>
    %703 = arith.mulf %701, %702 : vector<2x8x8xf32>
    %cst_179 = arith.constant dense<0.000000e+00> : vector<2x8xf32>
    %704 = vector.multi_reduction <add>, %703, %cst_179 [1] : vector<2x8x8xf32> to vector<2x8xf32>
    %705 = arith.addf %698, %704 : vector<2x8xf32>
    %706 = math.tanh %705 : vector<2x8xf32>
    %c44 = arith.constant 44 : index
    %c0_180 = arith.constant 0 : index
    %c0_181 = arith.constant 0 : index
    %707 = vector.load %arg0[%c44, %c0_180, %c0_181] : memref<60x2x1xf32, #tpu.memory_space<vmem>>, vector<1x2x1xf32>
    %708 = vector.shape_cast %707 : vector<1x2x1xf32> to vector<2x1xf32>
    %709 = vector.shape_cast %708 : vector<2x1xf32> to vector<2x1x1xf32>
    %710 = vector.shape_cast %0 : vector<1x8xf32> to vector<1x1x8xf32>
    %711 = vector.broadcast %709 : vector<2x1x1xf32> to vector<2x1x8xf32>
    %712 = vector.broadcast %710 : vector<1x1x8xf32> to vector<2x1x8xf32>
    %713 = arith.mulf %711, %712 : vector<2x1x8xf32>
    %cst_182 = arith.constant dense<0.000000e+00> : vector<2x8xf32>
    %714 = vector.multi_reduction <add>, %713, %cst_182 [1] : vector<2x1x8xf32> to vector<2x8xf32>
    %715 = vector.shape_cast %706 : vector<2x8xf32> to vector<2x8x1xf32>
    %716 = vector.shape_cast %1 : vector<8x8xf32> to vector<1x8x8xf32>
    %717 = vector.broadcast %715 : vector<2x8x1xf32> to vector<2x8x8xf32>
    %718 = vector.broadcast %716 : vector<1x8x8xf32> to vector<2x8x8xf32>
    %719 = arith.mulf %717, %718 : vector<2x8x8xf32>
    %cst_183 = arith.constant dense<0.000000e+00> : vector<2x8xf32>
    %720 = vector.multi_reduction <add>, %719, %cst_183 [1] : vector<2x8x8xf32> to vector<2x8xf32>
    %721 = arith.addf %714, %720 : vector<2x8xf32>
    %722 = math.tanh %721 : vector<2x8xf32>
    %c45 = arith.constant 45 : index
    %c0_184 = arith.constant 0 : index
    %c0_185 = arith.constant 0 : index
    %723 = vector.load %arg0[%c45, %c0_184, %c0_185] : memref<60x2x1xf32, #tpu.memory_space<vmem>>, vector<1x2x1xf32>
    %724 = vector.shape_cast %723 : vector<1x2x1xf32> to vector<2x1xf32>
    %725 = vector.shape_cast %724 : vector<2x1xf32> to vector<2x1x1xf32>
    %726 = vector.shape_cast %0 : vector<1x8xf32> to vector<1x1x8xf32>
    %727 = vector.broadcast %725 : vector<2x1x1xf32> to vector<2x1x8xf32>
    %728 = vector.broadcast %726 : vector<1x1x8xf32> to vector<2x1x8xf32>
    %729 = arith.mulf %727, %728 : vector<2x1x8xf32>
    %cst_186 = arith.constant dense<0.000000e+00> : vector<2x8xf32>
    %730 = vector.multi_reduction <add>, %729, %cst_186 [1] : vector<2x1x8xf32> to vector<2x8xf32>
    %731 = vector.shape_cast %722 : vector<2x8xf32> to vector<2x8x1xf32>
    %732 = vector.shape_cast %1 : vector<8x8xf32> to vector<1x8x8xf32>
    %733 = vector.broadcast %731 : vector<2x8x1xf32> to vector<2x8x8xf32>
    %734 = vector.broadcast %732 : vector<1x8x8xf32> to vector<2x8x8xf32>
    %735 = arith.mulf %733, %734 : vector<2x8x8xf32>
    %cst_187 = arith.constant dense<0.000000e+00> : vector<2x8xf32>
    %736 = vector.multi_reduction <add>, %735, %cst_187 [1] : vector<2x8x8xf32> to vector<2x8xf32>
    %737 = arith.addf %730, %736 : vector<2x8xf32>
    %738 = math.tanh %737 : vector<2x8xf32>
    %c46 = arith.constant 46 : index
    %c0_188 = arith.constant 0 : index
    %c0_189 = arith.constant 0 : index
    %739 = vector.load %arg0[%c46, %c0_188, %c0_189] : memref<60x2x1xf32, #tpu.memory_space<vmem>>, vector<1x2x1xf32>
    %740 = vector.shape_cast %739 : vector<1x2x1xf32> to vector<2x1xf32>
    %741 = vector.shape_cast %740 : vector<2x1xf32> to vector<2x1x1xf32>
    %742 = vector.shape_cast %0 : vector<1x8xf32> to vector<1x1x8xf32>
    %743 = vector.broadcast %741 : vector<2x1x1xf32> to vector<2x1x8xf32>
    %744 = vector.broadcast %742 : vector<1x1x8xf32> to vector<2x1x8xf32>
    %745 = arith.mulf %743, %744 : vector<2x1x8xf32>
    %cst_190 = arith.constant dense<0.000000e+00> : vector<2x8xf32>
    %746 = vector.multi_reduction <add>, %745, %cst_190 [1] : vector<2x1x8xf32> to vector<2x8xf32>
    %747 = vector.shape_cast %738 : vector<2x8xf32> to vector<2x8x1xf32>
    %748 = vector.shape_cast %1 : vector<8x8xf32> to vector<1x8x8xf32>
    %749 = vector.broadcast %747 : vector<2x8x1xf32> to vector<2x8x8xf32>
    %750 = vector.broadcast %748 : vector<1x8x8xf32> to vector<2x8x8xf32>
    %751 = arith.mulf %749, %750 : vector<2x8x8xf32>
    %cst_191 = arith.constant dense<0.000000e+00> : vector<2x8xf32>
    %752 = vector.multi_reduction <add>, %751, %cst_191 [1] : vector<2x8x8xf32> to vector<2x8xf32>
    %753 = arith.addf %746, %752 : vector<2x8xf32>
    %754 = math.tanh %753 : vector<2x8xf32>
    %c47 = arith.constant 47 : index
    %c0_192 = arith.constant 0 : index
    %c0_193 = arith.constant 0 : index
    %755 = vector.load %arg0[%c47, %c0_192, %c0_193] : memref<60x2x1xf32, #tpu.memory_space<vmem>>, vector<1x2x1xf32>
    %756 = vector.shape_cast %755 : vector<1x2x1xf32> to vector<2x1xf32>
    %757 = vector.shape_cast %756 : vector<2x1xf32> to vector<2x1x1xf32>
    %758 = vector.shape_cast %0 : vector<1x8xf32> to vector<1x1x8xf32>
    %759 = vector.broadcast %757 : vector<2x1x1xf32> to vector<2x1x8xf32>
    %760 = vector.broadcast %758 : vector<1x1x8xf32> to vector<2x1x8xf32>
    %761 = arith.mulf %759, %760 : vector<2x1x8xf32>
    %cst_194 = arith.constant dense<0.000000e+00> : vector<2x8xf32>
    %762 = vector.multi_reduction <add>, %761, %cst_194 [1] : vector<2x1x8xf32> to vector<2x8xf32>
    %763 = vector.shape_cast %754 : vector<2x8xf32> to vector<2x8x1xf32>
    %764 = vector.shape_cast %1 : vector<8x8xf32> to vector<1x8x8xf32>
    %765 = vector.broadcast %763 : vector<2x8x1xf32> to vector<2x8x8xf32>
    %766 = vector.broadcast %764 : vector<1x8x8xf32> to vector<2x8x8xf32>
    %767 = arith.mulf %765, %766 : vector<2x8x8xf32>
    %cst_195 = arith.constant dense<0.000000e+00> : vector<2x8xf32>
    %768 = vector.multi_reduction <add>, %767, %cst_195 [1] : vector<2x8x8xf32> to vector<2x8xf32>
    %769 = arith.addf %762, %768 : vector<2x8xf32>
    %770 = math.tanh %769 : vector<2x8xf32>
    %c48 = arith.constant 48 : index
    %c0_196 = arith.constant 0 : index
    %c0_197 = arith.constant 0 : index
    %771 = vector.load %arg0[%c48, %c0_196, %c0_197] : memref<60x2x1xf32, #tpu.memory_space<vmem>>, vector<1x2x1xf32>
    %772 = vector.shape_cast %771 : vector<1x2x1xf32> to vector<2x1xf32>
    %773 = vector.shape_cast %772 : vector<2x1xf32> to vector<2x1x1xf32>
    %774 = vector.shape_cast %0 : vector<1x8xf32> to vector<1x1x8xf32>
    %775 = vector.broadcast %773 : vector<2x1x1xf32> to vector<2x1x8xf32>
    %776 = vector.broadcast %774 : vector<1x1x8xf32> to vector<2x1x8xf32>
    %777 = arith.mulf %775, %776 : vector<2x1x8xf32>
    %cst_198 = arith.constant dense<0.000000e+00> : vector<2x8xf32>
    %778 = vector.multi_reduction <add>, %777, %cst_198 [1] : vector<2x1x8xf32> to vector<2x8xf32>
    %779 = vector.shape_cast %770 : vector<2x8xf32> to vector<2x8x1xf32>
    %780 = vector.shape_cast %1 : vector<8x8xf32> to vector<1x8x8xf32>
    %781 = vector.broadcast %779 : vector<2x8x1xf32> to vector<2x8x8xf32>
    %782 = vector.broadcast %780 : vector<1x8x8xf32> to vector<2x8x8xf32>
    %783 = arith.mulf %781, %782 : vector<2x8x8xf32>
    %cst_199 = arith.constant dense<0.000000e+00> : vector<2x8xf32>
    %784 = vector.multi_reduction <add>, %783, %cst_199 [1] : vector<2x8x8xf32> to vector<2x8xf32>
    %785 = arith.addf %778, %784 : vector<2x8xf32>
    %786 = math.tanh %785 : vector<2x8xf32>
    %c49 = arith.constant 49 : index
    %c0_200 = arith.constant 0 : index
    %c0_201 = arith.constant 0 : index
    %787 = vector.load %arg0[%c49, %c0_200, %c0_201] : memref<60x2x1xf32, #tpu.memory_space<vmem>>, vector<1x2x1xf32>
    %788 = vector.shape_cast %787 : vector<1x2x1xf32> to vector<2x1xf32>
    %789 = vector.shape_cast %788 : vector<2x1xf32> to vector<2x1x1xf32>
    %790 = vector.shape_cast %0 : vector<1x8xf32> to vector<1x1x8xf32>
    %791 = vector.broadcast %789 : vector<2x1x1xf32> to vector<2x1x8xf32>
    %792 = vector.broadcast %790 : vector<1x1x8xf32> to vector<2x1x8xf32>
    %793 = arith.mulf %791, %792 : vector<2x1x8xf32>
    %cst_202 = arith.constant dense<0.000000e+00> : vector<2x8xf32>
    %794 = vector.multi_reduction <add>, %793, %cst_202 [1] : vector<2x1x8xf32> to vector<2x8xf32>
    %795 = vector.shape_cast %786 : vector<2x8xf32> to vector<2x8x1xf32>
    %796 = vector.shape_cast %1 : vector<8x8xf32> to vector<1x8x8xf32>
    %797 = vector.broadcast %795 : vector<2x8x1xf32> to vector<2x8x8xf32>
    %798 = vector.broadcast %796 : vector<1x8x8xf32> to vector<2x8x8xf32>
    %799 = arith.mulf %797, %798 : vector<2x8x8xf32>
    %cst_203 = arith.constant dense<0.000000e+00> : vector<2x8xf32>
    %800 = vector.multi_reduction <add>, %799, %cst_203 [1] : vector<2x8x8xf32> to vector<2x8xf32>
    %801 = arith.addf %794, %800 : vector<2x8xf32>
    %802 = math.tanh %801 : vector<2x8xf32>
    %c50 = arith.constant 50 : index
    %c0_204 = arith.constant 0 : index
    %c0_205 = arith.constant 0 : index
    %803 = vector.load %arg0[%c50, %c0_204, %c0_205] : memref<60x2x1xf32, #tpu.memory_space<vmem>>, vector<1x2x1xf32>
    %804 = vector.shape_cast %803 : vector<1x2x1xf32> to vector<2x1xf32>
    %805 = vector.shape_cast %804 : vector<2x1xf32> to vector<2x1x1xf32>
    %806 = vector.shape_cast %0 : vector<1x8xf32> to vector<1x1x8xf32>
    %807 = vector.broadcast %805 : vector<2x1x1xf32> to vector<2x1x8xf32>
    %808 = vector.broadcast %806 : vector<1x1x8xf32> to vector<2x1x8xf32>
    %809 = arith.mulf %807, %808 : vector<2x1x8xf32>
    %cst_206 = arith.constant dense<0.000000e+00> : vector<2x8xf32>
    %810 = vector.multi_reduction <add>, %809, %cst_206 [1] : vector<2x1x8xf32> to vector<2x8xf32>
    %811 = vector.shape_cast %802 : vector<2x8xf32> to vector<2x8x1xf32>
    %812 = vector.shape_cast %1 : vector<8x8xf32> to vector<1x8x8xf32>
    %813 = vector.broadcast %811 : vector<2x8x1xf32> to vector<2x8x8xf32>
    %814 = vector.broadcast %812 : vector<1x8x8xf32> to vector<2x8x8xf32>
    %815 = arith.mulf %813, %814 : vector<2x8x8xf32>
    %cst_207 = arith.constant dense<0.000000e+00> : vector<2x8xf32>
    %816 = vector.multi_reduction <add>, %815, %cst_207 [1] : vector<2x8x8xf32> to vector<2x8xf32>
    %817 = arith.addf %810, %816 : vector<2x8xf32>
    %818 = math.tanh %817 : vector<2x8xf32>
    %c51 = arith.constant 51 : index
    %c0_208 = arith.constant 0 : index
    %c0_209 = arith.constant 0 : index
    %819 = vector.load %arg0[%c51, %c0_208, %c0_209] : memref<60x2x1xf32, #tpu.memory_space<vmem>>, vector<1x2x1xf32>
    %820 = vector.shape_cast %819 : vector<1x2x1xf32> to vector<2x1xf32>
    %821 = vector.shape_cast %820 : vector<2x1xf32> to vector<2x1x1xf32>
    %822 = vector.shape_cast %0 : vector<1x8xf32> to vector<1x1x8xf32>
    %823 = vector.broadcast %821 : vector<2x1x1xf32> to vector<2x1x8xf32>
    %824 = vector.broadcast %822 : vector<1x1x8xf32> to vector<2x1x8xf32>
    %825 = arith.mulf %823, %824 : vector<2x1x8xf32>
    %cst_210 = arith.constant dense<0.000000e+00> : vector<2x8xf32>
    %826 = vector.multi_reduction <add>, %825, %cst_210 [1] : vector<2x1x8xf32> to vector<2x8xf32>
    %827 = vector.shape_cast %818 : vector<2x8xf32> to vector<2x8x1xf32>
    %828 = vector.shape_cast %1 : vector<8x8xf32> to vector<1x8x8xf32>
    %829 = vector.broadcast %827 : vector<2x8x1xf32> to vector<2x8x8xf32>
    %830 = vector.broadcast %828 : vector<1x8x8xf32> to vector<2x8x8xf32>
    %831 = arith.mulf %829, %830 : vector<2x8x8xf32>
    %cst_211 = arith.constant dense<0.000000e+00> : vector<2x8xf32>
    %832 = vector.multi_reduction <add>, %831, %cst_211 [1] : vector<2x8x8xf32> to vector<2x8xf32>
    %833 = arith.addf %826, %832 : vector<2x8xf32>
    %834 = math.tanh %833 : vector<2x8xf32>
    %c52 = arith.constant 52 : index
    %c0_212 = arith.constant 0 : index
    %c0_213 = arith.constant 0 : index
    %835 = vector.load %arg0[%c52, %c0_212, %c0_213] : memref<60x2x1xf32, #tpu.memory_space<vmem>>, vector<1x2x1xf32>
    %836 = vector.shape_cast %835 : vector<1x2x1xf32> to vector<2x1xf32>
    %837 = vector.shape_cast %836 : vector<2x1xf32> to vector<2x1x1xf32>
    %838 = vector.shape_cast %0 : vector<1x8xf32> to vector<1x1x8xf32>
    %839 = vector.broadcast %837 : vector<2x1x1xf32> to vector<2x1x8xf32>
    %840 = vector.broadcast %838 : vector<1x1x8xf32> to vector<2x1x8xf32>
    %841 = arith.mulf %839, %840 : vector<2x1x8xf32>
    %cst_214 = arith.constant dense<0.000000e+00> : vector<2x8xf32>
    %842 = vector.multi_reduction <add>, %841, %cst_214 [1] : vector<2x1x8xf32> to vector<2x8xf32>
    %843 = vector.shape_cast %834 : vector<2x8xf32> to vector<2x8x1xf32>
    %844 = vector.shape_cast %1 : vector<8x8xf32> to vector<1x8x8xf32>
    %845 = vector.broadcast %843 : vector<2x8x1xf32> to vector<2x8x8xf32>
    %846 = vector.broadcast %844 : vector<1x8x8xf32> to vector<2x8x8xf32>
    %847 = arith.mulf %845, %846 : vector<2x8x8xf32>
    %cst_215 = arith.constant dense<0.000000e+00> : vector<2x8xf32>
    %848 = vector.multi_reduction <add>, %847, %cst_215 [1] : vector<2x8x8xf32> to vector<2x8xf32>
    %849 = arith.addf %842, %848 : vector<2x8xf32>
    %850 = math.tanh %849 : vector<2x8xf32>
    %c53 = arith.constant 53 : index
    %c0_216 = arith.constant 0 : index
    %c0_217 = arith.constant 0 : index
    %851 = vector.load %arg0[%c53, %c0_216, %c0_217] : memref<60x2x1xf32, #tpu.memory_space<vmem>>, vector<1x2x1xf32>
    %852 = vector.shape_cast %851 : vector<1x2x1xf32> to vector<2x1xf32>
    %853 = vector.shape_cast %852 : vector<2x1xf32> to vector<2x1x1xf32>
    %854 = vector.shape_cast %0 : vector<1x8xf32> to vector<1x1x8xf32>
    %855 = vector.broadcast %853 : vector<2x1x1xf32> to vector<2x1x8xf32>
    %856 = vector.broadcast %854 : vector<1x1x8xf32> to vector<2x1x8xf32>
    %857 = arith.mulf %855, %856 : vector<2x1x8xf32>
    %cst_218 = arith.constant dense<0.000000e+00> : vector<2x8xf32>
    %858 = vector.multi_reduction <add>, %857, %cst_218 [1] : vector<2x1x8xf32> to vector<2x8xf32>
    %859 = vector.shape_cast %850 : vector<2x8xf32> to vector<2x8x1xf32>
    %860 = vector.shape_cast %1 : vector<8x8xf32> to vector<1x8x8xf32>
    %861 = vector.broadcast %859 : vector<2x8x1xf32> to vector<2x8x8xf32>
    %862 = vector.broadcast %860 : vector<1x8x8xf32> to vector<2x8x8xf32>
    %863 = arith.mulf %861, %862 : vector<2x8x8xf32>
    %cst_219 = arith.constant dense<0.000000e+00> : vector<2x8xf32>
    %864 = vector.multi_reduction <add>, %863, %cst_219 [1] : vector<2x8x8xf32> to vector<2x8xf32>
    %865 = arith.addf %858, %864 : vector<2x8xf32>
    %866 = math.tanh %865 : vector<2x8xf32>
    %c54 = arith.constant 54 : index
    %c0_220 = arith.constant 0 : index
    %c0_221 = arith.constant 0 : index
    %867 = vector.load %arg0[%c54, %c0_220, %c0_221] : memref<60x2x1xf32, #tpu.memory_space<vmem>>, vector<1x2x1xf32>
    %868 = vector.shape_cast %867 : vector<1x2x1xf32> to vector<2x1xf32>
    %869 = vector.shape_cast %868 : vector<2x1xf32> to vector<2x1x1xf32>
    %870 = vector.shape_cast %0 : vector<1x8xf32> to vector<1x1x8xf32>
    %871 = vector.broadcast %869 : vector<2x1x1xf32> to vector<2x1x8xf32>
    %872 = vector.broadcast %870 : vector<1x1x8xf32> to vector<2x1x8xf32>
    %873 = arith.mulf %871, %872 : vector<2x1x8xf32>
    %cst_222 = arith.constant dense<0.000000e+00> : vector<2x8xf32>
    %874 = vector.multi_reduction <add>, %873, %cst_222 [1] : vector<2x1x8xf32> to vector<2x8xf32>
    %875 = vector.shape_cast %866 : vector<2x8xf32> to vector<2x8x1xf32>
    %876 = vector.shape_cast %1 : vector<8x8xf32> to vector<1x8x8xf32>
    %877 = vector.broadcast %875 : vector<2x8x1xf32> to vector<2x8x8xf32>
    %878 = vector.broadcast %876 : vector<1x8x8xf32> to vector<2x8x8xf32>
    %879 = arith.mulf %877, %878 : vector<2x8x8xf32>
    %cst_223 = arith.constant dense<0.000000e+00> : vector<2x8xf32>
    %880 = vector.multi_reduction <add>, %879, %cst_223 [1] : vector<2x8x8xf32> to vector<2x8xf32>
    %881 = arith.addf %874, %880 : vector<2x8xf32>
    %882 = math.tanh %881 : vector<2x8xf32>
    %c55 = arith.constant 55 : index
    %c0_224 = arith.constant 0 : index
    %c0_225 = arith.constant 0 : index
    %883 = vector.load %arg0[%c55, %c0_224, %c0_225] : memref<60x2x1xf32, #tpu.memory_space<vmem>>, vector<1x2x1xf32>
    %884 = vector.shape_cast %883 : vector<1x2x1xf32> to vector<2x1xf32>
    %885 = vector.shape_cast %884 : vector<2x1xf32> to vector<2x1x1xf32>
    %886 = vector.shape_cast %0 : vector<1x8xf32> to vector<1x1x8xf32>
    %887 = vector.broadcast %885 : vector<2x1x1xf32> to vector<2x1x8xf32>
    %888 = vector.broadcast %886 : vector<1x1x8xf32> to vector<2x1x8xf32>
    %889 = arith.mulf %887, %888 : vector<2x1x8xf32>
    %cst_226 = arith.constant dense<0.000000e+00> : vector<2x8xf32>
    %890 = vector.multi_reduction <add>, %889, %cst_226 [1] : vector<2x1x8xf32> to vector<2x8xf32>
    %891 = vector.shape_cast %882 : vector<2x8xf32> to vector<2x8x1xf32>
    %892 = vector.shape_cast %1 : vector<8x8xf32> to vector<1x8x8xf32>
    %893 = vector.broadcast %891 : vector<2x8x1xf32> to vector<2x8x8xf32>
    %894 = vector.broadcast %892 : vector<1x8x8xf32> to vector<2x8x8xf32>
    %895 = arith.mulf %893, %894 : vector<2x8x8xf32>
    %cst_227 = arith.constant dense<0.000000e+00> : vector<2x8xf32>
    %896 = vector.multi_reduction <add>, %895, %cst_227 [1] : vector<2x8x8xf32> to vector<2x8xf32>
    %897 = arith.addf %890, %896 : vector<2x8xf32>
    %898 = math.tanh %897 : vector<2x8xf32>
    %c56 = arith.constant 56 : index
    %c0_228 = arith.constant 0 : index
    %c0_229 = arith.constant 0 : index
    %899 = vector.load %arg0[%c56, %c0_228, %c0_229] : memref<60x2x1xf32, #tpu.memory_space<vmem>>, vector<1x2x1xf32>
    %900 = vector.shape_cast %899 : vector<1x2x1xf32> to vector<2x1xf32>
    %901 = vector.shape_cast %900 : vector<2x1xf32> to vector<2x1x1xf32>
    %902 = vector.shape_cast %0 : vector<1x8xf32> to vector<1x1x8xf32>
    %903 = vector.broadcast %901 : vector<2x1x1xf32> to vector<2x1x8xf32>
    %904 = vector.broadcast %902 : vector<1x1x8xf32> to vector<2x1x8xf32>
    %905 = arith.mulf %903, %904 : vector<2x1x8xf32>
    %cst_230 = arith.constant dense<0.000000e+00> : vector<2x8xf32>
    %906 = vector.multi_reduction <add>, %905, %cst_230 [1] : vector<2x1x8xf32> to vector<2x8xf32>
    %907 = vector.shape_cast %898 : vector<2x8xf32> to vector<2x8x1xf32>
    %908 = vector.shape_cast %1 : vector<8x8xf32> to vector<1x8x8xf32>
    %909 = vector.broadcast %907 : vector<2x8x1xf32> to vector<2x8x8xf32>
    %910 = vector.broadcast %908 : vector<1x8x8xf32> to vector<2x8x8xf32>
    %911 = arith.mulf %909, %910 : vector<2x8x8xf32>
    %cst_231 = arith.constant dense<0.000000e+00> : vector<2x8xf32>
    %912 = vector.multi_reduction <add>, %911, %cst_231 [1] : vector<2x8x8xf32> to vector<2x8xf32>
    %913 = arith.addf %906, %912 : vector<2x8xf32>
    %914 = math.tanh %913 : vector<2x8xf32>
    %c57 = arith.constant 57 : index
    %c0_232 = arith.constant 0 : index
    %c0_233 = arith.constant 0 : index
    %915 = vector.load %arg0[%c57, %c0_232, %c0_233] : memref<60x2x1xf32, #tpu.memory_space<vmem>>, vector<1x2x1xf32>
    %916 = vector.shape_cast %915 : vector<1x2x1xf32> to vector<2x1xf32>
    %917 = vector.shape_cast %916 : vector<2x1xf32> to vector<2x1x1xf32>
    %918 = vector.shape_cast %0 : vector<1x8xf32> to vector<1x1x8xf32>
    %919 = vector.broadcast %917 : vector<2x1x1xf32> to vector<2x1x8xf32>
    %920 = vector.broadcast %918 : vector<1x1x8xf32> to vector<2x1x8xf32>
    %921 = arith.mulf %919, %920 : vector<2x1x8xf32>
    %cst_234 = arith.constant dense<0.000000e+00> : vector<2x8xf32>
    %922 = vector.multi_reduction <add>, %921, %cst_234 [1] : vector<2x1x8xf32> to vector<2x8xf32>
    %923 = vector.shape_cast %914 : vector<2x8xf32> to vector<2x8x1xf32>
    %924 = vector.shape_cast %1 : vector<8x8xf32> to vector<1x8x8xf32>
    %925 = vector.broadcast %923 : vector<2x8x1xf32> to vector<2x8x8xf32>
    %926 = vector.broadcast %924 : vector<1x8x8xf32> to vector<2x8x8xf32>
    %927 = arith.mulf %925, %926 : vector<2x8x8xf32>
    %cst_235 = arith.constant dense<0.000000e+00> : vector<2x8xf32>
    %928 = vector.multi_reduction <add>, %927, %cst_235 [1] : vector<2x8x8xf32> to vector<2x8xf32>
    %929 = arith.addf %922, %928 : vector<2x8xf32>
    %930 = math.tanh %929 : vector<2x8xf32>
    %c58 = arith.constant 58 : index
    %c0_236 = arith.constant 0 : index
    %c0_237 = arith.constant 0 : index
    %931 = vector.load %arg0[%c58, %c0_236, %c0_237] : memref<60x2x1xf32, #tpu.memory_space<vmem>>, vector<1x2x1xf32>
    %932 = vector.shape_cast %931 : vector<1x2x1xf32> to vector<2x1xf32>
    %933 = vector.shape_cast %932 : vector<2x1xf32> to vector<2x1x1xf32>
    %934 = vector.shape_cast %0 : vector<1x8xf32> to vector<1x1x8xf32>
    %935 = vector.broadcast %933 : vector<2x1x1xf32> to vector<2x1x8xf32>
    %936 = vector.broadcast %934 : vector<1x1x8xf32> to vector<2x1x8xf32>
    %937 = arith.mulf %935, %936 : vector<2x1x8xf32>
    %cst_238 = arith.constant dense<0.000000e+00> : vector<2x8xf32>
    %938 = vector.multi_reduction <add>, %937, %cst_238 [1] : vector<2x1x8xf32> to vector<2x8xf32>
    %939 = vector.shape_cast %930 : vector<2x8xf32> to vector<2x8x1xf32>
    %940 = vector.shape_cast %1 : vector<8x8xf32> to vector<1x8x8xf32>
    %941 = vector.broadcast %939 : vector<2x8x1xf32> to vector<2x8x8xf32>
    %942 = vector.broadcast %940 : vector<1x8x8xf32> to vector<2x8x8xf32>
    %943 = arith.mulf %941, %942 : vector<2x8x8xf32>
    %cst_239 = arith.constant dense<0.000000e+00> : vector<2x8xf32>
    %944 = vector.multi_reduction <add>, %943, %cst_239 [1] : vector<2x8x8xf32> to vector<2x8xf32>
    %945 = arith.addf %938, %944 : vector<2x8xf32>
    %946 = math.tanh %945 : vector<2x8xf32>
    %c59 = arith.constant 59 : index
    %c0_240 = arith.constant 0 : index
    %c0_241 = arith.constant 0 : index
    %947 = vector.load %arg0[%c59, %c0_240, %c0_241] : memref<60x2x1xf32, #tpu.memory_space<vmem>>, vector<1x2x1xf32>
    %948 = vector.shape_cast %947 : vector<1x2x1xf32> to vector<2x1xf32>
    %949 = vector.shape_cast %948 : vector<2x1xf32> to vector<2x1x1xf32>
    %950 = vector.shape_cast %0 : vector<1x8xf32> to vector<1x1x8xf32>
    %951 = vector.broadcast %949 : vector<2x1x1xf32> to vector<2x1x8xf32>
    %952 = vector.broadcast %950 : vector<1x1x8xf32> to vector<2x1x8xf32>
    %953 = arith.mulf %951, %952 : vector<2x1x8xf32>
    %cst_242 = arith.constant dense<0.000000e+00> : vector<2x8xf32>
    %954 = vector.multi_reduction <add>, %953, %cst_242 [1] : vector<2x1x8xf32> to vector<2x8xf32>
    %955 = vector.shape_cast %946 : vector<2x8xf32> to vector<2x8x1xf32>
    %956 = vector.shape_cast %1 : vector<8x8xf32> to vector<1x8x8xf32>
    %957 = vector.broadcast %955 : vector<2x8x1xf32> to vector<2x8x8xf32>
    %958 = vector.broadcast %956 : vector<1x8x8xf32> to vector<2x8x8xf32>
    %959 = arith.mulf %957, %958 : vector<2x8x8xf32>
    %cst_243 = arith.constant dense<0.000000e+00> : vector<2x8xf32>
    %960 = vector.multi_reduction <add>, %959, %cst_243 [1] : vector<2x8x8xf32> to vector<2x8xf32>
    %961 = arith.addf %954, %960 : vector<2x8xf32>
    %962 = math.tanh %961 : vector<2x8xf32>
    %c0_244 = arith.constant 0 : index
    %c0_245 = arith.constant 0 : index
    %963 = vector.load %arg3[%c0_244, %c0_245] : memref<8x1xf32, #tpu.memory_space<vmem>>, vector<8x1xf32>
    %964 = vector.shape_cast %962 : vector<2x8xf32> to vector<2x8x1xf32>
    %965 = vector.shape_cast %963 : vector<8x1xf32> to vector<1x8x1xf32>
    %966 = vector.broadcast %965 : vector<1x8x1xf32> to vector<2x8x1xf32>
    %967 = arith.mulf %964, %966 : vector<2x8x1xf32>
    %cst_246 = arith.constant dense<0.000000e+00> : vector<2x1xf32>
    %968 = vector.multi_reduction <add>, %967, %cst_246 [1] : vector<2x8x1xf32> to vector<2x1xf32>
    %c0_247 = arith.constant 0 : index
    %c0_248 = arith.constant 0 : index
    %969 = vector.load %arg4[%c0_247, %c0_248] : memref<2x1xf32, #tpu.memory_space<vmem>>, vector<2x1xf32>
    tpu.vector_store %arg4[%c0_247, %c0_248], %968 {strides = array<i32>} : memref<2x1xf32, #tpu.memory_space<vmem>>, vector<2x1xf32>,
    return
  }
}

</mosaic_0001>

<bundles_post_ra>
// kernel: tpu_custom_call.1
= control target key start
LH: loop header
LB: loop body
LE: loop exit
PB: predicated region body
PF: predicated region fallthrough
CT: control target
= control target key end

     0   :  { %v32_v0 = vlaneseq  ;;  %v5151_v1 = vmov 0   ;;  %v5152_v2 = vmov 1966171168   ;;  %vm64_vm0 = vcmask 64512   ;;  %s6136_s0 = inlined_call_operand.vmem [shape: f32[60,2,1], index: 0, kind: input, shape index: {}]   ;;  %s6137_s2 = inlined_call_operand.vmem [shape: f32[8,8], index: 2, kind: input, shape index: {}]   ;;  %s6138_s1 = inlined_call_operand.vmem [shape: f32[1,8], index: 1, kind: input, shape index: {}]   ;;  %s6139_s3 = inlined_call_operand.vmem [shape: f32[8,1], index: 3, kind: input, shape index: {}]   ;;  %s6140_s4 = inlined_call_operand.vmem [shape: f32[2,1], index: 4, kind: output, shape index: {}]  }
   0x1   :  { %4901 = vset.pattern.permute.xlu0 %v5151_v1  ;;  %v30_v3 = vunpack.c.l.s4 %v5152_v2  ;;  %4902 = vset.pattern.permute.xlu1 %v5151_v1  ;;  %v4780_v6 = vld.sshfl [vmem:[%s6136_s0] sm:$0x11 pattern:$0x75316420]  ;;  %vm4754_vm1 = vcmask 7168   ;;  %vm4771_vm2 = vcmask 1041409  }
   0x2   :  { %v33_v4 = vshrl.u32 %v32_v0, 7  ;;  %v28_v8 = vcombine.high %v4780_v6, %v4780_v6  ;;  %v4782_v11 = vld.sshfl [vmem:[%s6136_s0 + $0x2] sm:$0x11 pattern:$0x75316420]  ;;  %vm4774_vm3 = vcmask 1024  }
   0x3   :  { %v31_v5 = vunpack.c.0.s8 %v30_v3  ;;  %v5192_v13 = vld [vmem:[%s6137_s2] sm:$0xff]  ;;  %v86_v34 = vcombine.high %v4782_v11, %v4782_v11 }
   0x4   :  { %v63_v14 = vmul.f32 0.0, %v5192_v13  ;;  %v5196_v20 = vsub.s32 0, %v33_v4  ;;  %v5201_v22 = vld [vmem:[%s6138_s1] sm:$0x1] }
   0x5   :  { %v5181_v7 = vsub.s32 %v31_v5, %v33_v4  ;;  %v4784_v1 = vld.sshfl [vmem:[%s6136_s0 + $0x4] sm:$0x11 pattern:$0x75316420] }
   0x6   :  { %v65_v15 = vsel %vm64_vm0, %v63_v14, 0.0  ;;  %v165_v4 = vcombine.high %v4784_v1, %v4784_v1 }
   0x7   :  { %v35_v9 = vrot.slane %v4780_v6, %v5181_v7  ;;  %v42_v10 = vrot.slane %v28_v8, %v5181_v7  ;;  %v93_v12 = vrot.slane %v4782_v11, %v5181_v7  ;;  %v66_v16 = vrot.slane %v65_v15, 4 }
   0x8   :  { %v100_v37 = vrot.slane %v86_v34, %v5181_v7  ;;  %v172_v3 = vrot.slane %v4784_v1, %v5181_v7  ;;  %v179_v8 = vrot.slane %v165_v4, %v5181_v7 }
   0x9   :  { %44 = vperm.xlu0 %4901, %v35_v9   ;;  %v67_v17 = vadd.f32 %v66_v16, %v65_v15 }
   0xb   :  { %v68_v18 = vrot.slane %v67_v17, 2 }
   0xd   :  { %52 = vperm.xlu0 %4901, %v42_v10   ;;  %v69_v19 = vadd.f32 %v68_v18, %v67_v17 }
   0xf   :  { %v70_v21 = vrot.slane %v69_v19, 1 }
  0x11   :  { %102 = vperm.xlu0 %4901, %v93_v12   ;;  %v71_v24 = vadd.f32 %v70_v21, %v69_v19 }
  0x88   :  { %v45_v23 = vpop.permute.xlu0 %44 }
  0x89   :  { %v50_v25 = vrot.slane %v45_v23, %v5196_v20 }
  0x8b   :  { %v59_v26 = vmul.f32 %v50_v25, %v5201_v22 }
  0x8c   :  { %v53_v27 = vpop.permute.xlu0 %52 }
  0x8d   :  { %v72_v28 = vadd.f32 %v71_v24, %v59_v26  ;;  %v58_v29 = vrot.slane %v53_v27, %v5196_v20 }
  0x8f   :  { %4903 = vtanh.f32 %v72_v28  ;;  %v60_v30 = vmul.f32 %v58_v29, %v5201_v22 }
  0x90   :  { %v103_v45 = vpop.permute.xlu0 %102 }
  0x91   :  { %v73_v31 = vadd.f32 %v71_v24, %v60_v30  ;;  %v108_v49 = vrot.slane %v103_v45, %v5196_v20 }
  0x93   :  { %4905 = vtanh.f32 %v73_v31  ;;  %v117_v54 = vmul.f32 %v108_v49, %v5201_v22 }
  0x99   :  { %v4904_v32 = vpop.eup %4903 }
  0x9a   :  { %v124_v33 = vrot.slane %v4904_v32, %v5196_v20 }
  0x9c   :  { %126 = vbcast.lane.b32.xlu1 %v124_v33, 256 }
  0x9d   :  { %v4906_v35 = vpop.eup %4905 }
  0x9e   :  { %v131_v36 = vrot.slane %v4906_v35, %v5196_v20 }
  0xa0   :  { %133 = vbcast.lane.b32.xlu1 %v131_v36, 256 }
  0xa4   :  { %110 = vperm.xlu1 %4902, %v100_v37  }
 0x10e   :  { %v127_v38 = vpop.permute.xlu1 %126 }
 0x10f   :  { %v135_v39 = vmul.f32 %v127_v38, %v5192_v13 }
 0x111   :  { %v137_v40 = vsel %vm64_vm0, %v135_v39, 0.0  ;;  %v4786_v39 = vld.sshfl [vmem:[%s6136_s0 + $0x6] sm:$0x11 pattern:$0x75316420] }
 0x112   :  { %v138_v41 = vrot.slane %v137_v40, 4  ;;  %v134_v42 = vpop.permute.xlu1 %133 }
 0x113   :  { %v136_v43 = vmul.f32 %v134_v42, %v5192_v13  ;;  %v244_v42 = vcombine.high %v4786_v39, %v4786_v39 }
 0x114   :  { %v139_v44 = vadd.f32 %v138_v41, %v137_v40  ;;  %v251_v41 = vrot.slane %v4786_v39, %v5181_v7 }
 0x115   :  { %v144_v46 = vsel %vm64_vm0, %v136_v43, 0.0  ;;  %v258_v45 = vrot.slane %v244_v42, %v5181_v7 }
 0x116   :  { %v140_v47 = vrot.slane %v139_v44, 2  ;;  %v145_v48 = vrot.slane %v144_v46, 4 }
 0x118   :  { %v141_v50 = vadd.f32 %v140_v47, %v139_v44  ;;  %v146_v51 = vadd.f32 %v145_v48, %v144_v46 }
 0x11a   :  { %v142_v52 = vrot.slane %v141_v50, 1  ;;  %v147_v53 = vrot.slane %v146_v51, 2 }
 0x11c   :  { %v143_v55 = vadd.f32 %v142_v52, %v141_v50  ;;  %v148_v57 = vadd.f32 %v147_v53, %v146_v51 }
 0x11e   :  { %v151_v56 = vadd.f32 %v143_v55, %v117_v54  ;;  %v149_v58 = vrot.slane %v148_v57, 1 }
 0x120   :  { %4907 = vtanh.f32 %v151_v56  ;;  %v150_v61 = vadd.f32 %v149_v58, %v148_v57 }
 0x123   :  { %v111_v59 = vpop.permute.xlu1 %110 }
 0x124   :  { %v116_v60 = vrot.slane %v111_v59, %v5196_v20 }
 0x126   :  { %v118_v62 = vmul.f32 %v116_v60, %v5201_v22 }
 0x128   :  { %v152_v63 = vadd.f32 %v150_v61, %v118_v62 }
 0x12a   :  { %v4908_v0 = vpop.eup %4907  ;;  %4909 = vtanh.f32 %v152_v63 }
 0x12b   :  { %v203_v2 = vrot.slane %v4908_v0, %v5196_v20 }
 0x12d   :  { %205 = vbcast.lane.b32.xlu0 %v203_v2, 256 }
 0x131   :  { %181 = vperm.xlu0 %4901, %v172_v3  }
 0x134   :  { %v4910_v5 = vpop.eup %4909 }
 0x135   :  { %v210_v6 = vrot.slane %v4910_v5, %v5196_v20 }
 0x137   :  { %212 = vbcast.lane.b32.xlu1 %v210_v6, 256 }
 0x13b   :  { %189 = vperm.xlu1 %4902, %v179_v8  }
 0x19f   :  { %v206_v9 = vpop.permute.xlu0 %205 }
 0x1a0   :  { %v214_v10 = vmul.f32 %v206_v9, %v5192_v13 }
 0x1a2   :  { %v216_v11 = vsel %vm64_vm0, %v214_v10, 0.0  ;;  %v4788_v10 = vld.sshfl [vmem:[%s6136_s0 + $0x8] sm:$0x11 pattern:$0x75316420] }
 0x1a3   :  { %v217_v12 = vrot.slane %v216_v11, 4 }
 0x1a5   :  { %v218_v14 = vadd.f32 %v217_v12, %v216_v11  ;;  %v330_v12 = vrot.slane %v4788_v10, %v5181_v7 }
 0x1a7   :  { %v219_v15 = vrot.slane %v218_v14, 2 }
 0x1a9   :  { %v213_v16 = vpop.permute.xlu1 %212  ;;  %v220_v18 = vadd.f32 %v219_v15, %v218_v14  ;;  %v323_v14 = vcombine.high %v4788_v10, %v4788_v10 }
 0x1aa   :  { %v215_v17 = vmul.f32 %v213_v16, %v5192_v13 }
 0x1ab   :  { %v221_v23 = vrot.slane %v220_v18, 1 }
 0x1ac   :  { %v223_v19 = vsel %vm64_vm0, %v215_v17, 0.0  ;;  %v337_v17 = vrot.slane %v323_v14, %v5181_v7 }
 0x1ad   :  { %v224_v21 = vrot.slane %v223_v19, 4  ;;  %v222_v28 = vadd.f32 %v221_v23, %v220_v18 }
 0x1af   :  { %v225_v24 = vadd.f32 %v224_v21, %v223_v19 }
 0x1b0   :  { %v182_v25 = vpop.permute.xlu0 %181 }
 0x1b1   :  { %v226_v26 = vrot.slane %v225_v24, 2  ;;  %v187_v27 = vrot.slane %v182_v25, %v5196_v20 }
 0x1b3   :  { %v196_v29 = vmul.f32 %v187_v27, %v5201_v22  ;;  %v227_v30 = vadd.f32 %v226_v26, %v225_v24 }
 0x1b5   :  { %v230_v31 = vadd.f32 %v222_v28, %v196_v29  ;;  %v228_v32 = vrot.slane %v227_v30, 1 }
 0x1b7   :  { %4911 = vtanh.f32 %v230_v31  ;;  %v229_v35 = vadd.f32 %v228_v32, %v227_v30 }
 0x1ba   :  { %v190_v33 = vpop.permute.xlu1 %189 }
 0x1bb   :  { %v195_v34 = vrot.slane %v190_v33, %v5196_v20 }
 0x1bd   :  { %v197_v36 = vmul.f32 %v195_v34, %v5201_v22 }
 0x1bf   :  { %v231_v37 = vadd.f32 %v229_v35, %v197_v36 }
 0x1c1   :  { %v4912_v38 = vpop.eup %4911  ;;  %4913 = vtanh.f32 %v231_v37 }
 0x1c2   :  { %v282_v40 = vrot.slane %v4912_v38, %v5196_v20 }
 0x1c4   :  { %284 = vbcast.lane.b32.xlu0 %v282_v40, 256 }
 0x1c8   :  { %260 = vperm.xlu0 %4901, %v251_v41  }
 0x1cb   :  { %v4914_v43 = vpop.eup %4913 }
 0x1cc   :  { %v289_v44 = vrot.slane %v4914_v43, %v5196_v20 }
 0x1ce   :  { %291 = vbcast.lane.b32.xlu1 %v289_v44, 256 }
 0x1d2   :  { %268 = vperm.xlu1 %4902, %v258_v45  }
 0x236   :  { %v285_v46 = vpop.permute.xlu0 %284 }
 0x237   :  { %v293_v47 = vmul.f32 %v285_v46, %v5192_v13 }
 0x239   :  { %v295_v48 = vsel %vm64_vm0, %v293_v47, 0.0  ;;  %v4790_v47 = vld.sshfl [vmem:[%s6136_s0 + $0xa] sm:$0x11 pattern:$0x75316420] }
 0x23a   :  { %v296_v49 = vrot.slane %v295_v48, 4 }
 0x23c   :  { %v297_v50 = vadd.f32 %v296_v49, %v295_v48  ;;  %v409_v49 = vrot.slane %v4790_v47, %v5181_v7 }
 0x23e   :  { %v298_v51 = vrot.slane %v297_v50, 2 }
 0x240   :  { %v292_v52 = vpop.permute.xlu1 %291  ;;  %v299_v54 = vadd.f32 %v298_v51, %v297_v50  ;;  %v402_v50 = vcombine.high %v4790_v47, %v4790_v47 }
 0x241   :  { %v294_v53 = vmul.f32 %v292_v52, %v5192_v13 }
 0x242   :  { %v300_v57 = vrot.slane %v299_v54, 1 }
 0x243   :  { %v302_v55 = vsel %vm64_vm0, %v294_v53, 0.0  ;;  %v416_v53 = vrot.slane %v402_v50, %v5181_v7 }
 0x244   :  { %v303_v56 = vrot.slane %v302_v55, 4  ;;  %v301_v62 = vadd.f32 %v300_v57, %v299_v54 }
 0x246   :  { %v304_v58 = vadd.f32 %v303_v56, %v302_v55 }
 0x247   :  { %v261_v59 = vpop.permute.xlu0 %260 }
 0x248   :  { %v305_v60 = vrot.slane %v304_v58, 2  ;;  %v266_v61 = vrot.slane %v261_v59, %v5196_v20 }
 0x24a   :  { %v275_v63 = vmul.f32 %v266_v61, %v5201_v22  ;;  %v306_v0 = vadd.f32 %v305_v60, %v304_v58 }
 0x24c   :  { %v309_v1 = vadd.f32 %v301_v62, %v275_v63  ;;  %v307_v2 = vrot.slane %v306_v0, 1 }
 0x24e   :  { %4915 = vtanh.f32 %v309_v1  ;;  %v308_v5 = vadd.f32 %v307_v2, %v306_v0 }
 0x251   :  { %v269_v3 = vpop.permute.xlu1 %268 }
 0x252   :  { %v274_v4 = vrot.slane %v269_v3, %v5196_v20 }
 0x254   :  { %v276_v6 = vmul.f32 %v274_v4, %v5201_v22 }
 0x256   :  { %v310_v8 = vadd.f32 %v308_v5, %v276_v6 }
 0x258   :  { %v4916_v9 = vpop.eup %4915  ;;  %4917 = vtanh.f32 %v310_v8 }
 0x259   :  { %v361_v11 = vrot.slane %v4916_v9, %v5196_v20 }
 0x25b   :  { %363 = vbcast.lane.b32.xlu0 %v361_v11, 256 }
 0x25f   :  { %339 = vperm.xlu0 %4901, %v330_v12  }
 0x262   :  { %v4918_v15 = vpop.eup %4917 }
 0x263   :  { %v368_v16 = vrot.slane %v4918_v15, %v5196_v20 }
 0x265   :  { %370 = vbcast.lane.b32.xlu1 %v368_v16, 256 }
 0x269   :  { %347 = vperm.xlu1 %4902, %v337_v17  }
 0x2cd   :  { %v364_v18 = vpop.permute.xlu0 %363 }
 0x2ce   :  { %v372_v19 = vmul.f32 %v364_v18, %v5192_v13 }
 0x2d0   :  { %v374_v21 = vsel %vm64_vm0, %v372_v19, 0.0  ;;  %v4792_v19 = vld.sshfl [vmem:[%s6136_s0 + $0xc] sm:$0x11 pattern:$0x75316420] }
 0x2d1   :  { %v375_v23 = vrot.slane %v374_v21, 4 }
 0x2d3   :  { %v376_v24 = vadd.f32 %v375_v23, %v374_v21  ;;  %v488_v23 = vrot.slane %v4792_v19, %v5181_v7 }
 0x2d5   :  { %v377_v25 = vrot.slane %v376_v24, 2 }
 0x2d7   :  { %v371_v26 = vpop.permute.xlu1 %370  ;;  %v378_v28 = vadd.f32 %v377_v25, %v376_v24  ;;  %v481_v24 = vcombine.high %v4792_v19, %v4792_v19 }
 0x2d8   :  { %v373_v27 = vmul.f32 %v371_v26, %v5192_v13 }
 0x2d9   :  { %v379_v31 = vrot.slane %v378_v28, 1 }
 0x2da   :  { %v381_v29 = vsel %vm64_vm0, %v373_v27, 0.0  ;;  %v495_v27 = vrot.slane %v481_v24, %v5181_v7 }
 0x2db   :  { %v382_v30 = vrot.slane %v381_v29, 4  ;;  %v380_v36 = vadd.f32 %v379_v31, %v378_v28 }
 0x2dd   :  { %v383_v32 = vadd.f32 %v382_v30, %v381_v29 }
 0x2de   :  { %v340_v33 = vpop.permute.xlu0 %339 }
 0x2df   :  { %v384_v34 = vrot.slane %v383_v32, 2  ;;  %v345_v35 = vrot.slane %v340_v33, %v5196_v20 }
 0x2e1   :  { %v354_v37 = vmul.f32 %v345_v35, %v5201_v22  ;;  %v385_v38 = vadd.f32 %v384_v34, %v383_v32 }
 0x2e3   :  { %v388_v39 = vadd.f32 %v380_v36, %v354_v37  ;;  %v386_v40 = vrot.slane %v385_v38, 1 }
 0x2e5   :  { %4919 = vtanh.f32 %v388_v39  ;;  %v387_v43 = vadd.f32 %v386_v40, %v385_v38 }
 0x2e8   :  { %v348_v41 = vpop.permute.xlu1 %347 }
 0x2e9   :  { %v353_v42 = vrot.slane %v348_v41, %v5196_v20 }
 0x2eb   :  { %v355_v44 = vmul.f32 %v353_v42, %v5201_v22 }
 0x2ed   :  { %v389_v45 = vadd.f32 %v387_v43, %v355_v44 }
 0x2ef   :  { %v4920_v46 = vpop.eup %4919  ;;  %4921 = vtanh.f32 %v389_v45 }
 0x2f0   :  { %v440_v48 = vrot.slane %v4920_v46, %v5196_v20 }
 0x2f2   :  { %442 = vbcast.lane.b32.xlu0 %v440_v48, 256 }
 0x2f6   :  { %418 = vperm.xlu0 %4901, %v409_v49  }
 0x2f9   :  { %v4922_v51 = vpop.eup %4921 }
 0x2fa   :  { %v447_v52 = vrot.slane %v4922_v51, %v5196_v20 }
 0x2fc   :  { %449 = vbcast.lane.b32.xlu1 %v447_v52, 256 }
 0x300   :  { %426 = vperm.xlu1 %4902, %v416_v53  }
 0x364   :  { %v443_v54 = vpop.permute.xlu0 %442 }
 0x365   :  { %v451_v55 = vmul.f32 %v443_v54, %v5192_v13 }
 0x367   :  { %v453_v56 = vsel %vm64_vm0, %v451_v55, 0.0  ;;  %v4794_v55 = vld.sshfl [vmem:[%s6136_s0 + $0xe] sm:$0x11 pattern:$0x75316420] }
 0x368   :  { %v454_v57 = vrot.slane %v453_v56, 4 }
 0x36a   :  { %v455_v58 = vadd.f32 %v454_v57, %v453_v56  ;;  %v567_v57 = vrot.slane %v4794_v55, %v5181_v7 }
 0x36c   :  { %v456_v59 = vrot.slane %v455_v58, 2 }
 0x36e   :  { %v450_v60 = vpop.permute.xlu1 %449  ;;  %v457_v62 = vadd.f32 %v456_v59, %v455_v58  ;;  %v560_v58 = vcombine.high %v4794_v55, %v4794_v55 }
 0x36f   :  { %v452_v61 = vmul.f32 %v450_v60, %v5192_v13 }
 0x370   :  { %v458_v1 = vrot.slane %v457_v62, 1 }
 0x371   :  { %v460_v63 = vsel %vm64_vm0, %v452_v61, 0.0  ;;  %v574_v61 = vrot.slane %v560_v58, %v5181_v7 }
 0x372   :  { %v461_v0 = vrot.slane %v460_v63, 4  ;;  %v459_v6 = vadd.f32 %v458_v1, %v457_v62 }
 0x374   :  { %v462_v2 = vadd.f32 %v461_v0, %v460_v63 }
 0x375   :  { %v419_v3 = vpop.permute.xlu0 %418 }
 0x376   :  { %v463_v4 = vrot.slane %v462_v2, 2  ;;  %v424_v5 = vrot.slane %v419_v3, %v5196_v20 }
 0x378   :  { %v433_v8 = vmul.f32 %v424_v5, %v5201_v22  ;;  %v464_v9 = vadd.f32 %v463_v4, %v462_v2 }
 0x37a   :  { %v467_v10 = vadd.f32 %v459_v6, %v433_v8  ;;  %v465_v11 = vrot.slane %v464_v9, 1 }
 0x37c   :  { %4923 = vtanh.f32 %v467_v10  ;;  %v466_v15 = vadd.f32 %v465_v11, %v464_v9 }
 0x37f   :  { %v427_v12 = vpop.permute.xlu1 %426 }
 0x380   :  { %v432_v14 = vrot.slane %v427_v12, %v5196_v20 }
 0x382   :  { %v434_v16 = vmul.f32 %v432_v14, %v5201_v22 }
 0x384   :  { %v468_v17 = vadd.f32 %v466_v15, %v434_v16 }
 0x386   :  { %v4924_v18 = vpop.eup %4923  ;;  %4925 = vtanh.f32 %v468_v17 }
 0x387   :  { %v519_v21 = vrot.slane %v4924_v18, %v5196_v20 }
 0x389   :  { %521 = vbcast.lane.b32.xlu0 %v519_v21, 256 }
 0x38d   :  { %497 = vperm.xlu0 %4901, %v488_v23  }
 0x390   :  { %v4926_v25 = vpop.eup %4925 }
 0x391   :  { %v526_v26 = vrot.slane %v4926_v25, %v5196_v20 }
 0x393   :  { %528 = vbcast.lane.b32.xlu1 %v526_v26, 256 }
 0x397   :  { %505 = vperm.xlu1 %4902, %v495_v27  }
 0x3fb   :  { %v522_v28 = vpop.permute.xlu0 %521 }
 0x3fc   :  { %v530_v29 = vmul.f32 %v522_v28, %v5192_v13 }
 0x3fe   :  { %v532_v30 = vsel %vm64_vm0, %v530_v29, 0.0  ;;  %v4796_v29 = vld.sshfl [vmem:[%s6136_s0 + $0x10] sm:$0x11 pattern:$0x75316420] }
 0x3ff   :  { %v533_v31 = vrot.slane %v532_v30, 4 }
 0x401   :  { %v534_v32 = vadd.f32 %v533_v31, %v532_v30  ;;  %v646_v31 = vrot.slane %v4796_v29, %v5181_v7 }
 0x403   :  { %v535_v33 = vrot.slane %v534_v32, 2 }
 0x405   :  { %v529_v34 = vpop.permute.xlu1 %528  ;;  %v536_v36 = vadd.f32 %v535_v33, %v534_v32  ;;  %v639_v32 = vcombine.high %v4796_v29, %v4796_v29 }
 0x406   :  { %v531_v35 = vmul.f32 %v529_v34, %v5192_v13 }
 0x407   :  { %v537_v39 = vrot.slane %v536_v36, 1 }
 0x408   :  { %v539_v37 = vsel %vm64_vm0, %v531_v35, 0.0  ;;  %v653_v35 = vrot.slane %v639_v32, %v5181_v7 }
 0x409   :  { %v540_v38 = vrot.slane %v539_v37, 4  ;;  %v538_v44 = vadd.f32 %v537_v39, %v536_v36 }
 0x40b   :  { %v541_v40 = vadd.f32 %v540_v38, %v539_v37 }
 0x40c   :  { %v498_v41 = vpop.permute.xlu0 %497 }
 0x40d   :  { %v542_v42 = vrot.slane %v541_v40, 2  ;;  %v503_v43 = vrot.slane %v498_v41, %v5196_v20 }
 0x40f   :  { %v512_v45 = vmul.f32 %v503_v43, %v5201_v22  ;;  %v543_v46 = vadd.f32 %v542_v42, %v541_v40 }
 0x411   :  { %v546_v47 = vadd.f32 %v538_v44, %v512_v45  ;;  %v544_v48 = vrot.slane %v543_v46, 1 }
 0x413   :  { %4927 = vtanh.f32 %v546_v47  ;;  %v545_v51 = vadd.f32 %v544_v48, %v543_v46 }
 0x416   :  { %v506_v49 = vpop.permute.xlu1 %505 }
 0x417   :  { %v511_v50 = vrot.slane %v506_v49, %v5196_v20 }
 0x419   :  { %v513_v52 = vmul.f32 %v511_v50, %v5201_v22 }
 0x41b   :  { %v547_v53 = vadd.f32 %v545_v51, %v513_v52 }
 0x41d   :  { %v4928_v54 = vpop.eup %4927  ;;  %4929 = vtanh.f32 %v547_v53 }
 0x41e   :  { %v598_v56 = vrot.slane %v4928_v54, %v5196_v20 }
 0x420   :  { %600 = vbcast.lane.b32.xlu0 %v598_v56, 256 }
 0x424   :  { %576 = vperm.xlu0 %4901, %v567_v57  }
 0x427   :  { %v4930_v59 = vpop.eup %4929 }
 0x428   :  { %v605_v60 = vrot.slane %v4930_v59, %v5196_v20 }
 0x42a   :  { %607 = vbcast.lane.b32.xlu1 %v605_v60, 256 }
 0x42e   :  { %584 = vperm.xlu1 %4902, %v574_v61  }
 0x492   :  { %v601_v62 = vpop.permute.xlu0 %600 }
 0x493   :  { %v609_v63 = vmul.f32 %v601_v62, %v5192_v13 }
 0x495   :  { %v611_v0 = vsel %vm64_vm0, %v609_v63, 0.0  ;;  %v4798_v63 = vld.sshfl [vmem:[%s6136_s0 + $0x12] sm:$0x11 pattern:$0x75316420] }
 0x496   :  { %v612_v1 = vrot.slane %v611_v0, 4 }
 0x498   :  { %v613_v2 = vadd.f32 %v612_v1, %v611_v0  ;;  %v725_v1 = vrot.slane %v4798_v63, %v5181_v7 }
 0x49a   :  { %v614_v3 = vrot.slane %v613_v2, 2 }
 0x49c   :  { %v608_v4 = vpop.permute.xlu1 %607  ;;  %v615_v6 = vadd.f32 %v614_v3, %v613_v2  ;;  %v718_v2 = vcombine.high %v4798_v63, %v4798_v63 }
 0x49d   :  { %v610_v5 = vmul.f32 %v608_v4, %v5192_v13 }
 0x49e   :  { %v616_v10 = vrot.slane %v615_v6, 1 }
 0x49f   :  { %v618_v8 = vsel %vm64_vm0, %v610_v5, 0.0  ;;  %v732_v5 = vrot.slane %v718_v2, %v5181_v7 }
 0x4a0   :  { %v619_v9 = vrot.slane %v618_v8, 4  ;;  %v617_v16 = vadd.f32 %v616_v10, %v615_v6 }
 0x4a2   :  { %v620_v11 = vadd.f32 %v619_v9, %v618_v8 }
 0x4a3   :  { %v577_v12 = vpop.permute.xlu0 %576 }
 0x4a4   :  { %v621_v14 = vrot.slane %v620_v11, 2  ;;  %v582_v15 = vrot.slane %v577_v12, %v5196_v20 }
 0x4a6   :  { %v591_v17 = vmul.f32 %v582_v15, %v5201_v22  ;;  %v622_v18 = vadd.f32 %v621_v14, %v620_v11 }
 0x4a8   :  { %v625_v19 = vadd.f32 %v617_v16, %v591_v17  ;;  %v623_v21 = vrot.slane %v622_v18, 1 }
 0x4aa   :  { %4931 = vtanh.f32 %v625_v19  ;;  %v624_v25 = vadd.f32 %v623_v21, %v622_v18 }
 0x4ad   :  { %v585_v23 = vpop.permute.xlu1 %584 }
 0x4ae   :  { %v590_v24 = vrot.slane %v585_v23, %v5196_v20 }
 0x4b0   :  { %v592_v26 = vmul.f32 %v590_v24, %v5201_v22 }
 0x4b2   :  { %v626_v27 = vadd.f32 %v624_v25, %v592_v26 }
 0x4b4   :  { %v4932_v28 = vpop.eup %4931  ;;  %4933 = vtanh.f32 %v626_v27 }
 0x4b5   :  { %v677_v30 = vrot.slane %v4932_v28, %v5196_v20 }
 0x4b7   :  { %679 = vbcast.lane.b32.xlu0 %v677_v30, 256 }
 0x4bb   :  { %655 = vperm.xlu0 %4901, %v646_v31  }
 0x4be   :  { %v4934_v33 = vpop.eup %4933 }
 0x4bf   :  { %v684_v34 = vrot.slane %v4934_v33, %v5196_v20 }
 0x4c1   :  { %686 = vbcast.lane.b32.xlu1 %v684_v34, 256 }
 0x4c5   :  { %663 = vperm.xlu1 %4902, %v653_v35  }
 0x529   :  { %v680_v36 = vpop.permute.xlu0 %679 }
 0x52a   :  { %v688_v37 = vmul.f32 %v680_v36, %v5192_v13 }
 0x52c   :  { %v690_v38 = vsel %vm64_vm0, %v688_v37, 0.0  ;;  %v4800_v37 = vld.sshfl [vmem:[%s6136_s0 + $0x14] sm:$0x11 pattern:$0x75316420] }
 0x52d   :  { %v691_v39 = vrot.slane %v690_v38, 4 }
 0x52f   :  { %v692_v40 = vadd.f32 %v691_v39, %v690_v38  ;;  %v804_v39 = vrot.slane %v4800_v37, %v5181_v7 }
 0x531   :  { %v693_v41 = vrot.slane %v692_v40, 2 }
 0x533   :  { %v687_v42 = vpop.permute.xlu1 %686  ;;  %v694_v44 = vadd.f32 %v693_v41, %v692_v40  ;;  %v797_v40 = vcombine.high %v4800_v37, %v4800_v37 }
 0x534   :  { %v689_v43 = vmul.f32 %v687_v42, %v5192_v13 }
 0x535   :  { %v695_v47 = vrot.slane %v694_v44, 1 }
 0x536   :  { %v697_v45 = vsel %vm64_vm0, %v689_v43, 0.0  ;;  %v811_v43 = vrot.slane %v797_v40, %v5181_v7 }
 0x537   :  { %v698_v46 = vrot.slane %v697_v45, 4  ;;  %v696_v52 = vadd.f32 %v695_v47, %v694_v44 }
 0x539   :  { %v699_v48 = vadd.f32 %v698_v46, %v697_v45 }
 0x53a   :  { %v656_v49 = vpop.permute.xlu0 %655 }
 0x53b   :  { %v700_v50 = vrot.slane %v699_v48, 2  ;;  %v661_v51 = vrot.slane %v656_v49, %v5196_v20 }
 0x53d   :  { %v670_v53 = vmul.f32 %v661_v51, %v5201_v22  ;;  %v701_v54 = vadd.f32 %v700_v50, %v699_v48 }
 0x53f   :  { %v704_v55 = vadd.f32 %v696_v52, %v670_v53  ;;  %v702_v56 = vrot.slane %v701_v54, 1 }
 0x541   :  { %4935 = vtanh.f32 %v704_v55  ;;  %v703_v59 = vadd.f32 %v702_v56, %v701_v54 }
 0x544   :  { %v664_v57 = vpop.permute.xlu1 %663 }
 0x545   :  { %v669_v58 = vrot.slane %v664_v57, %v5196_v20 }
 0x547   :  { %v671_v60 = vmul.f32 %v669_v58, %v5201_v22 }
 0x549   :  { %v705_v61 = vadd.f32 %v703_v59, %v671_v60 }
 0x54b   :  { %v4936_v62 = vpop.eup %4935  ;;  %4937 = vtanh.f32 %v705_v61 }
 0x54c   :  { %v756_v0 = vrot.slane %v4936_v62, %v5196_v20 }
 0x54e   :  { %758 = vbcast.lane.b32.xlu0 %v756_v0, 256 }
 0x552   :  { %734 = vperm.xlu0 %4901, %v725_v1  }
 0x555   :  { %v4938_v3 = vpop.eup %4937 }
 0x556   :  { %v763_v4 = vrot.slane %v4938_v3, %v5196_v20 }
 0x558   :  { %765 = vbcast.lane.b32.xlu1 %v763_v4, 256 }
 0x55c   :  { %742 = vperm.xlu1 %4902, %v732_v5  }
 0x5c0   :  { %v759_v6 = vpop.permute.xlu0 %758 }
 0x5c1   :  { %v767_v8 = vmul.f32 %v759_v6, %v5192_v13 }
 0x5c3   :  { %v769_v9 = vsel %vm64_vm0, %v767_v8, 0.0  ;;  %v4802_v8 = vld.sshfl [vmem:[%s6136_s0 + $0x16] sm:$0x11 pattern:$0x75316420] }
 0x5c4   :  { %v770_v10 = vrot.slane %v769_v9, 4 }
 0x5c6   :  { %v771_v11 = vadd.f32 %v770_v10, %v769_v9  ;;  %v883_v10 = vrot.slane %v4802_v8, %v5181_v7 }
 0x5c8   :  { %v772_v12 = vrot.slane %v771_v11, 2 }
 0x5ca   :  { %v766_v14 = vpop.permute.xlu1 %765  ;;  %v773_v16 = vadd.f32 %v772_v12, %v771_v11  ;;  %v876_v11 = vcombine.high %v4802_v8, %v4802_v8 }
 0x5cb   :  { %v768_v15 = vmul.f32 %v766_v14, %v5192_v13 }
 0x5cc   :  { %v774_v19 = vrot.slane %v773_v16, 1 }
 0x5cd   :  { %v776_v17 = vsel %vm64_vm0, %v768_v15, 0.0  ;;  %v890_v15 = vrot.slane %v876_v11, %v5181_v7 }
 0x5ce   :  { %v777_v18 = vrot.slane %v776_v17, 4  ;;  %v775_v26 = vadd.f32 %v774_v19, %v773_v16 }
 0x5d0   :  { %v778_v21 = vadd.f32 %v777_v18, %v776_v17 }
 0x5d1   :  { %v735_v23 = vpop.permute.xlu0 %734 }
 0x5d2   :  { %v779_v24 = vrot.slane %v778_v21, 2  ;;  %v740_v25 = vrot.slane %v735_v23, %v5196_v20 }
 0x5d4   :  { %v749_v27 = vmul.f32 %v740_v25, %v5201_v22  ;;  %v780_v28 = vadd.f32 %v779_v24, %v778_v21 }
 0x5d6   :  { %v783_v29 = vadd.f32 %v775_v26, %v749_v27  ;;  %v781_v30 = vrot.slane %v780_v28, 1 }
 0x5d8   :  { %4939 = vtanh.f32 %v783_v29  ;;  %v782_v33 = vadd.f32 %v781_v30, %v780_v28 }
 0x5db   :  { %v743_v31 = vpop.permute.xlu1 %742 }
 0x5dc   :  { %v748_v32 = vrot.slane %v743_v31, %v5196_v20 }
 0x5de   :  { %v750_v34 = vmul.f32 %v748_v32, %v5201_v22 }
 0x5e0   :  { %v784_v35 = vadd.f32 %v782_v33, %v750_v34 }
 0x5e2   :  { %v4940_v36 = vpop.eup %4939  ;;  %4941 = vtanh.f32 %v784_v35 }
 0x5e3   :  { %v835_v38 = vrot.slane %v4940_v36, %v5196_v20 }
 0x5e5   :  { %837 = vbcast.lane.b32.xlu0 %v835_v38, 256 }
 0x5e9   :  { %813 = vperm.xlu0 %4901, %v804_v39  }
 0x5ec   :  { %v4942_v41 = vpop.eup %4941 }
 0x5ed   :  { %v842_v42 = vrot.slane %v4942_v41, %v5196_v20 }
 0x5ef   :  { %844 = vbcast.lane.b32.xlu1 %v842_v42, 256 }
 0x5f3   :  { %821 = vperm.xlu1 %4902, %v811_v43  }
 0x657   :  { %v838_v44 = vpop.permute.xlu0 %837 }
 0x658   :  { %v846_v45 = vmul.f32 %v838_v44, %v5192_v13 }
 0x65a   :  { %v848_v46 = vsel %vm64_vm0, %v846_v45, 0.0  ;;  %v4804_v45 = vld.sshfl [vmem:[%s6136_s0 + $0x18] sm:$0x11 pattern:$0x75316420] }
 0x65b   :  { %v849_v47 = vrot.slane %v848_v46, 4 }
 0x65d   :  { %v850_v48 = vadd.f32 %v849_v47, %v848_v46  ;;  %v962_v47 = vrot.slane %v4804_v45, %v5181_v7 }
 0x65f   :  { %v851_v49 = vrot.slane %v850_v48, 2 }
 0x661   :  { %v845_v50 = vpop.permute.xlu1 %844  ;;  %v852_v52 = vadd.f32 %v851_v49, %v850_v48  ;;  %v955_v48 = vcombine.high %v4804_v45, %v4804_v45 }
 0x662   :  { %v847_v51 = vmul.f32 %v845_v50, %v5192_v13 }
 0x663   :  { %v853_v55 = vrot.slane %v852_v52, 1 }
 0x664   :  { %v855_v53 = vsel %vm64_vm0, %v847_v51, 0.0  ;;  %v969_v51 = vrot.slane %v955_v48, %v5181_v7 }
 0x665   :  { %v856_v54 = vrot.slane %v855_v53, 4  ;;  %v854_v60 = vadd.f32 %v853_v55, %v852_v52 }
 0x667   :  { %v857_v56 = vadd.f32 %v856_v54, %v855_v53 }
 0x668   :  { %v814_v57 = vpop.permute.xlu0 %813 }
 0x669   :  { %v858_v58 = vrot.slane %v857_v56, 2  ;;  %v819_v59 = vrot.slane %v814_v57, %v5196_v20 }
 0x66b   :  { %v828_v61 = vmul.f32 %v819_v59, %v5201_v22  ;;  %v859_v62 = vadd.f32 %v858_v58, %v857_v56 }
 0x66d   :  { %v862_v63 = vadd.f32 %v854_v60, %v828_v61  ;;  %v860_v0 = vrot.slane %v859_v62, 1 }
 0x66f   :  { %4943 = vtanh.f32 %v862_v63  ;;  %v861_v3 = vadd.f32 %v860_v0, %v859_v62 }
 0x672   :  { %v822_v1 = vpop.permute.xlu1 %821 }
 0x673   :  { %v827_v2 = vrot.slane %v822_v1, %v5196_v20 }
 0x675   :  { %v829_v4 = vmul.f32 %v827_v2, %v5201_v22 }
 0x677   :  { %v863_v5 = vadd.f32 %v861_v3, %v829_v4 }
 0x679   :  { %v4944_v6 = vpop.eup %4943  ;;  %4945 = vtanh.f32 %v863_v5 }
 0x67a   :  { %v914_v9 = vrot.slane %v4944_v6, %v5196_v20 }
 0x67c   :  { %916 = vbcast.lane.b32.xlu0 %v914_v9, 256 }
 0x680   :  { %892 = vperm.xlu0 %4901, %v883_v10  }
 0x683   :  { %v4946_v12 = vpop.eup %4945 }
 0x684   :  { %v921_v14 = vrot.slane %v4946_v12, %v5196_v20 }
 0x686   :  { %923 = vbcast.lane.b32.xlu1 %v921_v14, 256 }
 0x68a   :  { %900 = vperm.xlu1 %4902, %v890_v15  }
 0x6ee   :  { %v917_v16 = vpop.permute.xlu0 %916 }
 0x6ef   :  { %v925_v17 = vmul.f32 %v917_v16, %v5192_v13  ;;  %v4806_v16 = vld.sshfl [vmem:[%s6136_s0 + $0x1a] sm:$0x11 pattern:$0x75316420] }
 0x6f1   :  { %v927_v18 = vsel %vm64_vm0, %v925_v17, 0.0 }
 0x6f2   :  { %v928_v19 = vrot.slane %v927_v18, 4 }
 0x6f4   :  { %v929_v21 = vadd.f32 %v928_v19, %v927_v18  ;;  %v1041_v18 = vrot.slane %v4806_v16, %v5181_v7  ;;  %v1034_v19 = vcombine.high %v4806_v16, %v4806_v16 }
 0x6f6   :  { %v930_v23 = vrot.slane %v929_v21, 2 }
 0x6f8   :  { %v924_v24 = vpop.permute.xlu1 %923  ;;  %v931_v26 = vadd.f32 %v930_v23, %v929_v21 }
 0x6f9   :  { %v926_v25 = vmul.f32 %v924_v24, %v5192_v13 }
 0x6fa   :  { %v932_v29 = vrot.slane %v931_v26, 1 }
 0x6fb   :  { %v934_v27 = vsel %vm64_vm0, %v926_v25, 0.0  ;;  %v5393_v25 = vld [vmem:[%s6137_s2] sm:$0xff] }
 0x6fc   :  { %v935_v28 = vrot.slane %v934_v27, 4  ;;  %v933_v34 = vadd.f32 %v932_v29, %v931_v26 }
 0x6fe   :  { %v936_v30 = vadd.f32 %v935_v28, %v934_v27 }
 0x6ff   :  { %v893_v31 = vpop.permute.xlu0 %892 }
 0x700   :  { %v937_v32 = vrot.slane %v936_v30, 2  ;;  %v898_v33 = vrot.slane %v893_v31, %v5196_v20 }
 0x702   :  { %v907_v35 = vmul.f32 %v898_v33, %v5201_v22  ;;  %v938_v36 = vadd.f32 %v937_v32, %v936_v30 }
 0x704   :  { %v941_v37 = vadd.f32 %v933_v34, %v907_v35  ;;  %v939_v38 = vrot.slane %v938_v36, 1 }
 0x706   :  { %4947 = vtanh.f32 %v941_v37  ;;  %v940_v41 = vadd.f32 %v939_v38, %v938_v36 }
 0x709   :  { %v901_v39 = vpop.permute.xlu1 %900 }
 0x70a   :  { %v906_v40 = vrot.slane %v901_v39, %v5196_v20 }
 0x70c   :  { %v908_v42 = vmul.f32 %v906_v40, %v5201_v22 }
 0x70e   :  { %v942_v43 = vadd.f32 %v940_v41, %v908_v42  ;;  %v5403_v42 = vld [vmem:[%s6138_s1] sm:$0x1] }
 0x710   :  { %v4948_v44 = vpop.eup %4947  ;;  %4949 = vtanh.f32 %v942_v43 }
 0x711   :  { %v993_v46 = vrot.slane %v4948_v44, %v5196_v20 }
 0x713   :  { %995 = vbcast.lane.b32.xlu0 %v993_v46, 256 }
 0x717   :  { %971 = vperm.xlu0 %4901, %v962_v47  }
 0x71a   :  { %v4950_v49 = vpop.eup %4949 }
 0x71b   :  { %v1000_v50 = vrot.slane %v4950_v49, %v5196_v20 }
 0x71d   :  { %1002 = vbcast.lane.b32.xlu1 %v1000_v50, 256 }
 0x721   :  { %979 = vperm.xlu1 %4902, %v969_v51  }
 0x785   :  { %v996_v52 = vpop.permute.xlu0 %995 }
 0x786   :  { %v1004_v53 = vmul.f32 %v996_v52, %v5192_v13 }
 0x788   :  { %v1006_v54 = vsel %vm64_vm0, %v1004_v53, 0.0  ;;  %v4808_v53 = vld.sshfl [vmem:[%s6136_s0 + $0x1c] sm:$0x11 pattern:$0x75316420] }
 0x789   :  { %v1007_v55 = vrot.slane %v1006_v54, 4 }
 0x78b   :  { %v1008_v56 = vadd.f32 %v1007_v55, %v1006_v54  ;;  %v1120_v55 = vrot.slane %v4808_v53, %v5181_v7 }
 0x78d   :  { %v1009_v57 = vrot.slane %v1008_v56, 2 }
 0x78f   :  { %v1003_v58 = vpop.permute.xlu1 %1002  ;;  %v1010_v60 = vadd.f32 %v1009_v57, %v1008_v56  ;;  %v1113_v56 = vcombine.high %v4808_v53, %v4808_v53 }
 0x790   :  { %v1005_v59 = vmul.f32 %v1003_v58, %v5192_v13 }
 0x791   :  { %v1011_v63 = vrot.slane %v1010_v60, 1 }
 0x792   :  { %v1013_v61 = vsel %vm64_vm0, %v1005_v59, 0.0  ;;  %v1127_v59 = vrot.slane %v1113_v56, %v5181_v7 }
 0x793   :  { %v1014_v62 = vrot.slane %v1013_v61, 4  ;;  %v1012_v4 = vadd.f32 %v1011_v63, %v1010_v60 }
 0x795   :  { %v1015_v0 = vadd.f32 %v1014_v62, %v1013_v61 }
 0x796   :  { %v972_v1 = vpop.permute.xlu0 %971 }
 0x797   :  { %v1016_v2 = vrot.slane %v1015_v0, 2  ;;  %v977_v3 = vrot.slane %v972_v1, %v5196_v20 }
 0x799   :  { %v986_v5 = vmul.f32 %v977_v3, %v5201_v22  ;;  %v1017_v6 = vadd.f32 %v1016_v2, %v1015_v0 }
 0x79b   :  { %v1020_v8 = vadd.f32 %v1012_v4, %v986_v5  ;;  %v1018_v9 = vrot.slane %v1017_v6, 1 }
 0x79d   :  { %4951 = vtanh.f32 %v1020_v8  ;;  %v1019_v11 = vadd.f32 %v1018_v9, %v1017_v6 }
 0x7a0   :  { %v980_v10 = vpop.permute.xlu1 %979 }
 0x7a1   :  { %v985_v13 = vrot.slane %v980_v10, %v5196_v20 }
 0x7a3   :  { %v987_v12 = vmul.f32 %v985_v13, %v5201_v22  ;;  %v1048_v22 = vrot.slane %v1034_v19, %v5181_v7 }
 0x7a5   :  { %v1021_v14 = vadd.f32 %v1019_v11, %v987_v12 }
 0x7a7   :  { %v4952_v15 = vpop.eup %4951  ;;  %4953 = vtanh.f32 %v1021_v14 }
 0x7a8   :  { %v1072_v17 = vrot.slane %v4952_v15, %v5196_v20 }
 0x7aa   :  { %1074 = vbcast.lane.b32.xlu0 %v1072_v17, 256 }
 0x7ae   :  { %1050 = vperm.xlu0 %4901, %v1041_v18  }
 0x7b1   :  { %v4954_v21 = vpop.eup %4953 }
 0x7b2   :  { %v1079_v23 = vrot.slane %v4954_v21, %v5196_v20 }
 0x7b4   :  { %1081 = vbcast.lane.b32.xlu1 %v1079_v23, 256 }
 0x7b8   :  { %1058 = vperm.xlu1 %4902, %v1048_v22  }
 0x81c   :  { %v1075_v24 = vpop.permute.xlu0 %1074 }
 0x81d   :  { %v1083_v26 = vmul.f32 %v5393_v25, %v1075_v24 }
 0x81f   :  { %v1085_v27 = vsel %vm64_vm0, %v1083_v26, 0.0  ;;  %v4810_v26 = vld.sshfl [vmem:[%s6136_s0 + $0x1e] sm:$0x11 pattern:$0x75316420] }
 0x820   :  { %v1086_v28 = vrot.slane %v1085_v27, 4 }
 0x822   :  { %v1087_v29 = vadd.f32 %v1086_v28, %v1085_v27  ;;  %v1199_v28 = vrot.slane %v4810_v26, %v5181_v7 }
 0x824   :  { %v1088_v30 = vrot.slane %v1087_v29, 2 }
 0x826   :  { %v1082_v31 = vpop.permute.xlu1 %1081  ;;  %v1089_v33 = vadd.f32 %v1088_v30, %v1087_v29  ;;  %v1192_v29 = vcombine.high %v4810_v26, %v4810_v26 }
 0x827   :  { %v1084_v32 = vmul.f32 %v5393_v25, %v1082_v31 }
 0x828   :  { %v1090_v36 = vrot.slane %v1089_v33, 1 }
 0x829   :  { %v1092_v34 = vsel %vm64_vm0, %v1084_v32, 0.0  ;;  %v1206_v32 = vrot.slane %v1192_v29, %v5181_v7 }
 0x82a   :  { %v1093_v35 = vrot.slane %v1092_v34, 4  ;;  %v1091_v41 = vadd.f32 %v1090_v36, %v1089_v33 }
 0x82c   :  { %v1094_v37 = vadd.f32 %v1093_v35, %v1092_v34 }
 0x82d   :  { %v1051_v38 = vpop.permute.xlu0 %1050 }
 0x82e   :  { %v1095_v39 = vrot.slane %v1094_v37, 2  ;;  %v1056_v40 = vrot.slane %v1051_v38, %v5196_v20 }
 0x830   :  { %v1065_v43 = vmul.f32 %v5403_v42, %v1056_v40  ;;  %v1096_v44 = vadd.f32 %v1095_v39, %v1094_v37 }
 0x832   :  { %v1099_v45 = vadd.f32 %v1091_v41, %v1065_v43  ;;  %v1097_v46 = vrot.slane %v1096_v44, 1 }
 0x834   :  { %4955 = vtanh.f32 %v1099_v45  ;;  %v1098_v49 = vadd.f32 %v1097_v46, %v1096_v44 }
 0x837   :  { %v1059_v47 = vpop.permute.xlu1 %1058 }
 0x838   :  { %v1064_v48 = vrot.slane %v1059_v47, %v5196_v20 }
 0x83a   :  { %v1066_v50 = vmul.f32 %v5403_v42, %v1064_v48 }
 0x83c   :  { %v1100_v51 = vadd.f32 %v1098_v49, %v1066_v50 }
 0x83e   :  { %v4956_v52 = vpop.eup %4955  ;;  %4957 = vtanh.f32 %v1100_v51 }
 0x83f   :  { %v1151_v54 = vrot.slane %v4956_v52, %v5196_v20 }
 0x841   :  { %1153 = vbcast.lane.b32.xlu0 %v1151_v54, 256 }
 0x845   :  { %1129 = vperm.xlu0 %4901, %v1120_v55  }
 0x848   :  { %v4958_v57 = vpop.eup %4957 }
 0x849   :  { %v1158_v58 = vrot.slane %v4958_v57, %v5196_v20 }
 0x84b   :  { %1160 = vbcast.lane.b32.xlu1 %v1158_v58, 256 }
 0x84f   :  { %1137 = vperm.xlu1 %4902, %v1127_v59  }
 0x8b3   :  { %v1154_v60 = vpop.permute.xlu0 %1153 }
 0x8b4   :  { %v1162_v61 = vmul.f32 %v5393_v25, %v1154_v60 }
 0x8b6   :  { %v1164_v62 = vsel %vm64_vm0, %v1162_v61, 0.0  ;;  %v4812_v61 = vld.sshfl [vmem:[%s6136_s0 + $0x20] sm:$0x11 pattern:$0x75316420] }
 0x8b7   :  { %v1165_v63 = vrot.slane %v1164_v62, 4 }
 0x8b9   :  { %v1166_v0 = vadd.f32 %v1165_v63, %v1164_v62  ;;  %v1278_v63 = vrot.slane %v4812_v61, %v5181_v7 }
 0x8bb   :  { %v1167_v1 = vrot.slane %v1166_v0, 2 }
 0x8bd   :  { %v1161_v2 = vpop.permute.xlu1 %1160  ;;  %v1168_v4 = vadd.f32 %v1167_v1, %v1166_v0  ;;  %v1271_v0 = vcombine.high %v4812_v61, %v4812_v61 }
 0x8be   :  { %v1163_v3 = vmul.f32 %v5393_v25, %v1161_v2 }
 0x8bf   :  { %v1169_v8 = vrot.slane %v1168_v4, 1 }
 0x8c0   :  { %v1171_v5 = vsel %vm64_vm0, %v1163_v3, 0.0  ;;  %v1285_v3 = vrot.slane %v1271_v0, %v5181_v7 }
 0x8c1   :  { %v1172_v6 = vrot.slane %v1171_v5, 4  ;;  %v1170_v12 = vadd.f32 %v1169_v8, %v1168_v4 }
 0x8c3   :  { %v1173_v9 = vadd.f32 %v1172_v6, %v1171_v5 }
 0x8c4   :  { %v1130_v10 = vpop.permute.xlu0 %1129 }
 0x8c5   :  { %v1174_v13 = vrot.slane %v1173_v9, 2  ;;  %v1135_v11 = vrot.slane %v1130_v10, %v5196_v20 }
 0x8c7   :  { %v1144_v14 = vmul.f32 %v5403_v42, %v1135_v11  ;;  %v1175_v15 = vadd.f32 %v1174_v13, %v1173_v9 }
 0x8c9   :  { %v1178_v16 = vadd.f32 %v1170_v12, %v1144_v14  ;;  %v1176_v17 = vrot.slane %v1175_v15, 1 }
 0x8cb   :  { %4959 = vtanh.f32 %v1178_v16  ;;  %v1177_v21 = vadd.f32 %v1176_v17, %v1175_v15 }
 0x8ce   :  { %v1138_v18 = vpop.permute.xlu1 %1137 }
 0x8cf   :  { %v1143_v19 = vrot.slane %v1138_v18, %v5196_v20 }
 0x8d1   :  { %v1145_v23 = vmul.f32 %v5403_v42, %v1143_v19 }
 0x8d3   :  { %v1179_v22 = vadd.f32 %v1177_v21, %v1145_v23 }
 0x8d5   :  { %v4960_v24 = vpop.eup %4959  ;;  %4961 = vtanh.f32 %v1179_v22 }
 0x8d6   :  { %v1230_v27 = vrot.slane %v4960_v24, %v5196_v20 }
 0x8d8   :  { %1232 = vbcast.lane.b32.xlu0 %v1230_v27, 256 }
 0x8dc   :  { %1208 = vperm.xlu0 %4901, %v1199_v28  }
 0x8df   :  { %v4962_v30 = vpop.eup %4961 }
 0x8e0   :  { %v1237_v31 = vrot.slane %v4962_v30, %v5196_v20 }
 0x8e2   :  { %1239 = vbcast.lane.b32.xlu1 %v1237_v31, 256 }
 0x8e6   :  { %1216 = vperm.xlu1 %4902, %v1206_v32  }
 0x94a   :  { %v1233_v33 = vpop.permute.xlu0 %1232 }
 0x94b   :  { %v1241_v34 = vmul.f32 %v5393_v25, %v1233_v33 }
 0x94d   :  { %v1243_v35 = vsel %vm64_vm0, %v1241_v34, 0.0  ;;  %v4814_v34 = vld.sshfl [vmem:[%s6136_s0 + $0x22] sm:$0x11 pattern:$0x75316420] }
 0x94e   :  { %v1244_v36 = vrot.slane %v1243_v35, 4 }
 0x950   :  { %v1245_v37 = vadd.f32 %v1244_v36, %v1243_v35  ;;  %v1357_v36 = vrot.slane %v4814_v34, %v5181_v7 }
 0x952   :  { %v1246_v38 = vrot.slane %v1245_v37, 2 }
 0x954   :  { %v1240_v39 = vpop.permute.xlu1 %1239  ;;  %v1247_v41 = vadd.f32 %v1246_v38, %v1245_v37  ;;  %v1350_v37 = vcombine.high %v4814_v34, %v4814_v34 }
 0x955   :  { %v1242_v40 = vmul.f32 %v5393_v25, %v1240_v39 }
 0x956   :  { %v1248_v45 = vrot.slane %v1247_v41, 1 }
 0x957   :  { %v1250_v43 = vsel %vm64_vm0, %v1242_v40, 0.0  ;;  %v1364_v40 = vrot.slane %v1350_v37, %v5181_v7 }
 0x958   :  { %v1251_v44 = vrot.slane %v1250_v43, 4  ;;  %v1249_v50 = vadd.f32 %v1248_v45, %v1247_v41 }
 0x95a   :  { %v1252_v46 = vadd.f32 %v1251_v44, %v1250_v43 }
 0x95b   :  { %v1209_v47 = vpop.permute.xlu0 %1208 }
 0x95c   :  { %v1253_v48 = vrot.slane %v1252_v46, 2  ;;  %v1214_v49 = vrot.slane %v1209_v47, %v5196_v20 }
 0x95e   :  { %v1223_v51 = vmul.f32 %v5403_v42, %v1214_v49  ;;  %v1254_v52 = vadd.f32 %v1253_v48, %v1252_v46 }
 0x960   :  { %v1257_v53 = vadd.f32 %v1249_v50, %v1223_v51  ;;  %v1255_v54 = vrot.slane %v1254_v52, 1 }
 0x962   :  { %4963 = vtanh.f32 %v1257_v53  ;;  %v1256_v57 = vadd.f32 %v1255_v54, %v1254_v52 }
 0x965   :  { %v1217_v55 = vpop.permute.xlu1 %1216 }
 0x966   :  { %v1222_v56 = vrot.slane %v1217_v55, %v5196_v20 }
 0x968   :  { %v1224_v58 = vmul.f32 %v5403_v42, %v1222_v56 }
 0x96a   :  { %v1258_v59 = vadd.f32 %v1256_v57, %v1224_v58 }
 0x96c   :  { %v4964_v60 = vpop.eup %4963  ;;  %4965 = vtanh.f32 %v1258_v59 }
 0x96d   :  { %v1309_v62 = vrot.slane %v4964_v60, %v5196_v20 }
 0x96f   :  { %1311 = vbcast.lane.b32.xlu0 %v1309_v62, 256 }
 0x973   :  { %1287 = vperm.xlu0 %4901, %v1278_v63  }
 0x976   :  { %v4966_v1 = vpop.eup %4965 }
 0x977   :  { %v1316_v2 = vrot.slane %v4966_v1, %v5196_v20 }
 0x979   :  { %1318 = vbcast.lane.b32.xlu1 %v1316_v2, 256 }
 0x97d   :  { %1295 = vperm.xlu1 %4902, %v1285_v3  }
 0x9e1   :  { %v1312_v4 = vpop.permute.xlu0 %1311 }
 0x9e2   :  { %v1320_v5 = vmul.f32 %v5393_v25, %v1312_v4 }
 0x9e4   :  { %v1322_v6 = vsel %vm64_vm0, %v1320_v5, 0.0  ;;  %v4816_v5 = vld.sshfl [vmem:[%s6136_s0 + $0x24] sm:$0x11 pattern:$0x75316420] }
 0x9e5   :  { %v1323_v8 = vrot.slane %v1322_v6, 4 }
 0x9e7   :  { %v1324_v9 = vadd.f32 %v1323_v8, %v1322_v6  ;;  %v1436_v8 = vrot.slane %v4816_v5, %v5181_v7 }
 0x9e9   :  { %v1325_v10 = vrot.slane %v1324_v9, 2 }
 0x9eb   :  { %v1319_v13 = vpop.permute.xlu1 %1318  ;;  %v1326_v12 = vadd.f32 %v1325_v10, %v1324_v9  ;;  %v1429_v9 = vcombine.high %v4816_v5, %v4816_v5 }
 0x9ec   :  { %v1321_v11 = vmul.f32 %v5393_v25, %v1319_v13 }
 0x9ed   :  { %v1327_v16 = vrot.slane %v1326_v12, 1 }
 0x9ee   :  { %v1329_v14 = vsel %vm64_vm0, %v1321_v11, 0.0  ;;  %v1443_v11 = vrot.slane %v1429_v9, %v5181_v7 }
 0x9ef   :  { %v1330_v15 = vrot.slane %v1329_v14, 4  ;;  %v1328_v23 = vadd.f32 %v1327_v16, %v1326_v12 }
 0x9f1   :  { %v1331_v17 = vadd.f32 %v1330_v15, %v1329_v14 }
 0x9f2   :  { %v1288_v18 = vpop.permute.xlu0 %1287 }
 0x9f3   :  { %v1332_v19 = vrot.slane %v1331_v17, 2  ;;  %v1293_v21 = vrot.slane %v1288_v18, %v5196_v20 }
 0x9f5   :  { %v1302_v22 = vmul.f32 %v5403_v42, %v1293_v21  ;;  %v1333_v24 = vadd.f32 %v1332_v19, %v1331_v17 }
 0x9f7   :  { %v1336_v26 = vadd.f32 %v1328_v23, %v1302_v22  ;;  %v1334_v27 = vrot.slane %v1333_v24, 1 }
 0x9f9   :  { %4967 = vtanh.f32 %v1336_v26  ;;  %v1335_v30 = vadd.f32 %v1334_v27, %v1333_v24 }
 0x9fc   :  { %v1296_v28 = vpop.permute.xlu1 %1295 }
 0x9fd   :  { %v1301_v29 = vrot.slane %v1296_v28, %v5196_v20 }
 0x9ff   :  { %v1303_v31 = vmul.f32 %v5403_v42, %v1301_v29 }
 0xa01   :  { %v1337_v32 = vadd.f32 %v1335_v30, %v1303_v31 }
 0xa03   :  { %v4968_v33 = vpop.eup %4967  ;;  %4969 = vtanh.f32 %v1337_v32 }
 0xa04   :  { %v1388_v35 = vrot.slane %v4968_v33, %v5196_v20 }
 0xa06   :  { %1390 = vbcast.lane.b32.xlu0 %v1388_v35, 256 }
 0xa0a   :  { %1366 = vperm.xlu0 %4901, %v1357_v36  }
 0xa0d   :  { %v4970_v38 = vpop.eup %4969 }
 0xa0e   :  { %v1395_v39 = vrot.slane %v4970_v38, %v5196_v20 }
 0xa10   :  { %1397 = vbcast.lane.b32.xlu1 %v1395_v39, 256 }
 0xa14   :  { %1374 = vperm.xlu1 %4902, %v1364_v40  }
 0xa78   :  { %v1391_v41 = vpop.permute.xlu0 %1390 }
 0xa79   :  { %v1399_v43 = vmul.f32 %v5393_v25, %v1391_v41 }
 0xa7b   :  { %v1401_v44 = vsel %vm64_vm0, %v1399_v43, 0.0  ;;  %v4818_v43 = vld.sshfl [vmem:[%s6136_s0 + $0x26] sm:$0x11 pattern:$0x75316420] }
 0xa7c   :  { %v1402_v45 = vrot.slane %v1401_v44, 4 }
 0xa7e   :  { %v1403_v46 = vadd.f32 %v1402_v45, %v1401_v44  ;;  %v1515_v45 = vrot.slane %v4818_v43, %v5181_v7 }
 0xa80   :  { %v1404_v47 = vrot.slane %v1403_v46, 2 }
 0xa82   :  { %v1398_v48 = vpop.permute.xlu1 %1397  ;;  %v1405_v50 = vadd.f32 %v1404_v47, %v1403_v46  ;;  %v1508_v46 = vcombine.high %v4818_v43, %v4818_v43 }
 0xa83   :  { %v1400_v49 = vmul.f32 %v5393_v25, %v1398_v48 }
 0xa84   :  { %v1406_v53 = vrot.slane %v1405_v50, 1 }
 0xa85   :  { %v1408_v51 = vsel %vm64_vm0, %v1400_v49, 0.0  ;;  %v1522_v49 = vrot.slane %v1508_v46, %v5181_v7 }
 0xa86   :  { %v1409_v52 = vrot.slane %v1408_v51, 4  ;;  %v1407_v58 = vadd.f32 %v1406_v53, %v1405_v50 }
 0xa88   :  { %v1410_v54 = vadd.f32 %v1409_v52, %v1408_v51 }
 0xa89   :  { %v1367_v55 = vpop.permute.xlu0 %1366 }
 0xa8a   :  { %v1411_v56 = vrot.slane %v1410_v54, 2  ;;  %v1372_v57 = vrot.slane %v1367_v55, %v5196_v20 }
 0xa8c   :  { %v1381_v59 = vmul.f32 %v5403_v42, %v1372_v57  ;;  %v1412_v60 = vadd.f32 %v1411_v56, %v1410_v54 }
 0xa8e   :  { %v1415_v61 = vadd.f32 %v1407_v58, %v1381_v59  ;;  %v1413_v62 = vrot.slane %v1412_v60, 1 }
 0xa90   :  { %4971 = vtanh.f32 %v1415_v61  ;;  %v1414_v1 = vadd.f32 %v1413_v62, %v1412_v60 }
 0xa93   :  { %v1375_v63 = vpop.permute.xlu1 %1374 }
 0xa94   :  { %v1380_v0 = vrot.slane %v1375_v63, %v5196_v20 }
 0xa96   :  { %v1382_v2 = vmul.f32 %v5403_v42, %v1380_v0 }
 0xa98   :  { %v1416_v3 = vadd.f32 %v1414_v1, %v1382_v2 }
 0xa9a   :  { %v4972_v4 = vpop.eup %4971  ;;  %4973 = vtanh.f32 %v1416_v3 }
 0xa9b   :  { %v1467_v6 = vrot.slane %v4972_v4, %v5196_v20 }
 0xa9d   :  { %1469 = vbcast.lane.b32.xlu0 %v1467_v6, 256 }
 0xaa1   :  { %1445 = vperm.xlu0 %4901, %v1436_v8  }
 0xaa4   :  { %v4974_v10 = vpop.eup %4973 }
 0xaa5   :  { %v1474_v13 = vrot.slane %v4974_v10, %v5196_v20 }
 0xaa7   :  { %1476 = vbcast.lane.b32.xlu1 %v1474_v13, 256 }
 0xaab   :  { %1453 = vperm.xlu1 %4902, %v1443_v11  }
 0xb0f   :  { %v1470_v12 = vpop.permute.xlu0 %1469 }
 0xb10   :  { %v1478_v14 = vmul.f32 %v5393_v25, %v1470_v12 }
 0xb12   :  { %v1480_v15 = vsel %vm64_vm0, %v1478_v14, 0.0  ;;  %v4820_v14 = vld.sshfl [vmem:[%s6136_s0 + $0x28] sm:$0x11 pattern:$0x75316420] }
 0xb13   :  { %v1481_v16 = vrot.slane %v1480_v15, 4 }
 0xb15   :  { %v1482_v17 = vadd.f32 %v1481_v16, %v1480_v15  ;;  %v1594_v16 = vrot.slane %v4820_v14, %v5181_v7 }
 0xb17   :  { %v1483_v18 = vrot.slane %v1482_v17, 2 }
 0xb19   :  { %v1477_v19 = vpop.permute.xlu1 %1476  ;;  %v1484_v23 = vadd.f32 %v1483_v18, %v1482_v17  ;;  %v1587_v17 = vcombine.high %v4820_v14, %v4820_v14 }
 0xb1a   :  { %v1479_v21 = vmul.f32 %v5393_v25, %v1477_v19 }
 0xb1b   :  { %v1485_v26 = vrot.slane %v1484_v23, 1 }
 0xb1c   :  { %v1487_v22 = vsel %vm64_vm0, %v1479_v21, 0.0  ;;  %v1601_v21 = vrot.slane %v1587_v17, %v5181_v7 }
 0xb1d   :  { %v1488_v24 = vrot.slane %v1487_v22, 4  ;;  %v1486_v31 = vadd.f32 %v1485_v26, %v1484_v23 }
 0xb1f   :  { %v1489_v27 = vadd.f32 %v1488_v24, %v1487_v22 }
 0xb20   :  { %v1446_v28 = vpop.permute.xlu0 %1445 }
 0xb21   :  { %v1490_v29 = vrot.slane %v1489_v27, 2  ;;  %v1451_v30 = vrot.slane %v1446_v28, %v5196_v20 }
 0xb23   :  { %v1460_v32 = vmul.f32 %v5403_v42, %v1451_v30  ;;  %v1491_v33 = vadd.f32 %v1490_v29, %v1489_v27 }
 0xb25   :  { %v1494_v34 = vadd.f32 %v1486_v31, %v1460_v32  ;;  %v1492_v35 = vrot.slane %v1491_v33, 1 }
 0xb27   :  { %4975 = vtanh.f32 %v1494_v34  ;;  %v1493_v38 = vadd.f32 %v1492_v35, %v1491_v33 }
 0xb2a   :  { %v1454_v36 = vpop.permute.xlu1 %1453 }
 0xb2b   :  { %v1459_v37 = vrot.slane %v1454_v36, %v5196_v20 }
 0xb2d   :  { %v1461_v39 = vmul.f32 %v5403_v42, %v1459_v37 }
 0xb2f   :  { %v1495_v40 = vadd.f32 %v1493_v38, %v1461_v39 }
 0xb31   :  { %v4976_v41 = vpop.eup %4975  ;;  %4977 = vtanh.f32 %v1495_v40 }
 0xb32   :  { %v1546_v44 = vrot.slane %v4976_v41, %v5196_v20 }
 0xb34   :  { %1548 = vbcast.lane.b32.xlu0 %v1546_v44, 256 }
 0xb38   :  { %1524 = vperm.xlu0 %4901, %v1515_v45  }
 0xb3b   :  { %v4978_v47 = vpop.eup %4977 }
 0xb3c   :  { %v1553_v48 = vrot.slane %v4978_v47, %v5196_v20 }
 0xb3e   :  { %1555 = vbcast.lane.b32.xlu1 %v1553_v48, 256 }
 0xb42   :  { %1532 = vperm.xlu1 %4902, %v1522_v49  }
 0xba6   :  { %v1549_v50 = vpop.permute.xlu0 %1548 }
 0xba7   :  { %v1557_v51 = vmul.f32 %v5393_v25, %v1549_v50 }
 0xba9   :  { %v1559_v52 = vsel %vm64_vm0, %v1557_v51, 0.0  ;;  %v4822_v51 = vld.sshfl [vmem:[%s6136_s0 + $0x2a] sm:$0x11 pattern:$0x75316420] }
 0xbaa   :  { %v1560_v53 = vrot.slane %v1559_v52, 4 }
 0xbac   :  { %v1561_v54 = vadd.f32 %v1560_v53, %v1559_v52  ;;  %v1673_v53 = vrot.slane %v4822_v51, %v5181_v7 }
 0xbae   :  { %v1562_v55 = vrot.slane %v1561_v54, 2 }
 0xbb0   :  { %v1556_v56 = vpop.permute.xlu1 %1555  ;;  %v1563_v58 = vadd.f32 %v1562_v55, %v1561_v54  ;;  %v1666_v54 = vcombine.high %v4822_v51, %v4822_v51 }
 0xbb1   :  { %v1558_v57 = vmul.f32 %v5393_v25, %v1556_v56 }
 0xbb2   :  { %v1564_v61 = vrot.slane %v1563_v58, 1 }
 0xbb3   :  { %v1566_v59 = vsel %vm64_vm0, %v1558_v57, 0.0  ;;  %v1680_v57 = vrot.slane %v1666_v54, %v5181_v7 }
 0xbb4   :  { %v1567_v60 = vrot.slane %v1566_v59, 4  ;;  %v1565_v2 = vadd.f32 %v1564_v61, %v1563_v58 }
 0xbb6   :  { %v1568_v62 = vadd.f32 %v1567_v60, %v1566_v59 }
 0xbb7   :  { %v1525_v63 = vpop.permute.xlu0 %1524 }
 0xbb8   :  { %v1569_v0 = vrot.slane %v1568_v62, 2  ;;  %v1530_v1 = vrot.slane %v1525_v63, %v5196_v20 }
 0xbba   :  { %v1539_v3 = vmul.f32 %v5403_v42, %v1530_v1  ;;  %v1570_v4 = vadd.f32 %v1569_v0, %v1568_v62 }
 0xbbc   :  { %v1573_v5 = vadd.f32 %v1565_v2, %v1539_v3  ;;  %v1571_v6 = vrot.slane %v1570_v4, 1 }
 0xbbe   :  { %4979 = vtanh.f32 %v1573_v5  ;;  %v1572_v10 = vadd.f32 %v1571_v6, %v1570_v4 }
 0xbc1   :  { %v1533_v8 = vpop.permute.xlu1 %1532 }
 0xbc2   :  { %v1538_v9 = vrot.slane %v1533_v8, %v5196_v20 }
 0xbc4   :  { %v1540_v13 = vmul.f32 %v5403_v42, %v1538_v9 }
 0xbc6   :  { %v1574_v11 = vadd.f32 %v1572_v10, %v1540_v13 }
 0xbc8   :  { %v4980_v12 = vpop.eup %4979  ;;  %4981 = vtanh.f32 %v1574_v11 }
 0xbc9   :  { %v1625_v15 = vrot.slane %v4980_v12, %v5196_v20 }
 0xbcb   :  { %1627 = vbcast.lane.b32.xlu0 %v1625_v15, 256 }
 0xbcf   :  { %1603 = vperm.xlu0 %4901, %v1594_v16  }
 0xbd2   :  { %v4982_v18 = vpop.eup %4981 }
 0xbd3   :  { %v1632_v19 = vrot.slane %v4982_v18, %v5196_v20 }
 0xbd5   :  { %1634 = vbcast.lane.b32.xlu1 %v1632_v19, 256 }
 0xbd9   :  { %1611 = vperm.xlu1 %4902, %v1601_v21  }
 0xc3d   :  { %v1628_v23 = vpop.permute.xlu0 %1627 }
 0xc3e   :  { %v1636_v22 = vmul.f32 %v5393_v25, %v1628_v23 }
 0xc40   :  { %v1638_v24 = vsel %vm64_vm0, %v1636_v22, 0.0  ;;  %v4824_v22 = vld.sshfl [vmem:[%s6136_s0 + $0x2c] sm:$0x11 pattern:$0x75316420] }
 0xc41   :  { %v1639_v26 = vrot.slane %v1638_v24, 4 }
 0xc43   :  { %v1640_v27 = vadd.f32 %v1639_v26, %v1638_v24  ;;  %v1752_v26 = vrot.slane %v4824_v22, %v5181_v7 }
 0xc45   :  { %v1641_v28 = vrot.slane %v1640_v27, 2 }
 0xc47   :  { %v1635_v29 = vpop.permute.xlu1 %1634  ;;  %v1642_v31 = vadd.f32 %v1641_v28, %v1640_v27  ;;  %v1745_v27 = vcombine.high %v4824_v22, %v4824_v22 }
 0xc48   :  { %v1637_v30 = vmul.f32 %v5393_v25, %v1635_v29 }
 0xc49   :  { %v1643_v34 = vrot.slane %v1642_v31, 1 }
 0xc4a   :  { %v1645_v32 = vsel %vm64_vm0, %v1637_v30, 0.0  ;;  %v1759_v30 = vrot.slane %v1745_v27, %v5181_v7 }
 0xc4b   :  { %v1646_v33 = vrot.slane %v1645_v32, 4  ;;  %v1644_v39 = vadd.f32 %v1643_v34, %v1642_v31 }
 0xc4d   :  { %v1647_v35 = vadd.f32 %v1646_v33, %v1645_v32 }
 0xc4e   :  { %v1604_v36 = vpop.permute.xlu0 %1603 }
 0xc4f   :  { %v1648_v37 = vrot.slane %v1647_v35, 2  ;;  %v1609_v38 = vrot.slane %v1604_v36, %v5196_v20 }
 0xc51   :  { %v1618_v40 = vmul.f32 %v5403_v42, %v1609_v38  ;;  %v1649_v41 = vadd.f32 %v1648_v37, %v1647_v35 }
 0xc53   :  { %v1652_v43 = vadd.f32 %v1644_v39, %v1618_v40  ;;  %v1650_v44 = vrot.slane %v1649_v41, 1 }
 0xc55   :  { %4983 = vtanh.f32 %v1652_v43  ;;  %v1651_v47 = vadd.f32 %v1650_v44, %v1649_v41 }
 0xc58   :  { %v1612_v45 = vpop.permute.xlu1 %1611 }
 0xc59   :  { %v1617_v46 = vrot.slane %v1612_v45, %v5196_v20 }
 0xc5b   :  { %v1619_v48 = vmul.f32 %v5403_v42, %v1617_v46 }
 0xc5d   :  { %v1653_v49 = vadd.f32 %v1651_v47, %v1619_v48 }
 0xc5f   :  { %v4984_v50 = vpop.eup %4983  ;;  %4985 = vtanh.f32 %v1653_v49 }
 0xc60   :  { %v1704_v52 = vrot.slane %v4984_v50, %v5196_v20 }
 0xc62   :  { %1706 = vbcast.lane.b32.xlu0 %v1704_v52, 256 }
 0xc66   :  { %1682 = vperm.xlu0 %4901, %v1673_v53  }
 0xc69   :  { %v4986_v55 = vpop.eup %4985 }
 0xc6a   :  { %v1711_v56 = vrot.slane %v4986_v55, %v5196_v20 }
 0xc6c   :  { %1713 = vbcast.lane.b32.xlu1 %v1711_v56, 256 }
 0xc70   :  { %1690 = vperm.xlu1 %4902, %v1680_v57  }
 0xcd4   :  { %v1707_v58 = vpop.permute.xlu0 %1706 }
 0xcd5   :  { %v1715_v59 = vmul.f32 %v5393_v25, %v1707_v58 }
 0xcd7   :  { %v1717_v60 = vsel %vm64_vm0, %v1715_v59, 0.0  ;;  %v4826_v59 = vld.sshfl [vmem:[%s6136_s0 + $0x2e] sm:$0x11 pattern:$0x75316420] }
 0xcd8   :  { %v1718_v61 = vrot.slane %v1717_v60, 4 }
 0xcda   :  { %v1719_v62 = vadd.f32 %v1718_v61, %v1717_v60  ;;  %v1831_v61 = vrot.slane %v4826_v59, %v5181_v7 }
 0xcdc   :  { %v1720_v63 = vrot.slane %v1719_v62, 2 }
 0xcde   :  { %v1714_v0 = vpop.permute.xlu1 %1713  ;;  %v1721_v2 = vadd.f32 %v1720_v63, %v1719_v62  ;;  %v1824_v62 = vcombine.high %v4826_v59, %v4826_v59 }
 0xcdf   :  { %v1716_v1 = vmul.f32 %v5393_v25, %v1714_v0 }
 0xce0   :  { %v1722_v5 = vrot.slane %v1721_v2, 1 }
 0xce1   :  { %v1724_v3 = vsel %vm64_vm0, %v1716_v1, 0.0  ;;  %v1838_v1 = vrot.slane %v1824_v62, %v5181_v7 }
 0xce2   :  { %v1725_v4 = vrot.slane %v1724_v3, 4  ;;  %v1723_v13 = vadd.f32 %v1722_v5, %v1721_v2 }
 0xce4   :  { %v1726_v6 = vadd.f32 %v1725_v4, %v1724_v3 }
 0xce5   :  { %v1683_v8 = vpop.permute.xlu0 %1682 }
 0xce6   :  { %v1727_v9 = vrot.slane %v1726_v6, 2  ;;  %v1688_v10 = vrot.slane %v1683_v8, %v5196_v20 }
 0xce8   :  { %v1697_v11 = vmul.f32 %v5403_v42, %v1688_v10  ;;  %v1728_v12 = vadd.f32 %v1727_v9, %v1726_v6 }
 0xcea   :  { %v1731_v14 = vadd.f32 %v1723_v13, %v1697_v11  ;;  %v1729_v15 = vrot.slane %v1728_v12, 1 }
 0xcec   :  { %4987 = vtanh.f32 %v1731_v14  ;;  %v1730_v18 = vadd.f32 %v1729_v15, %v1728_v12 }
 0xcef   :  { %v1691_v16 = vpop.permute.xlu1 %1690 }
 0xcf0   :  { %v1696_v17 = vrot.slane %v1691_v16, %v5196_v20 }
 0xcf2   :  { %v1698_v19 = vmul.f32 %v5403_v42, %v1696_v17 }
 0xcf4   :  { %v1732_v21 = vadd.f32 %v1730_v18, %v1698_v19 }
 0xcf6   :  { %v4988_v23 = vpop.eup %4987  ;;  %4989 = vtanh.f32 %v1732_v21 }
 0xcf7   :  { %v1783_v24 = vrot.slane %v4988_v23, %v5196_v20 }
 0xcf9   :  { %1785 = vbcast.lane.b32.xlu0 %v1783_v24, 256 }
 0xcfd   :  { %1761 = vperm.xlu0 %4901, %v1752_v26  }
 0xd00   :  { %v4990_v28 = vpop.eup %4989 }
 0xd01   :  { %v1790_v29 = vrot.slane %v4990_v28, %v5196_v20 }
 0xd03   :  { %1792 = vbcast.lane.b32.xlu1 %v1790_v29, 256 }
 0xd07   :  { %1769 = vperm.xlu1 %4902, %v1759_v30  }
 0xd6b   :  { %v1786_v31 = vpop.permute.xlu0 %1785 }
 0xd6c   :  { %v1794_v32 = vmul.f32 %v5393_v25, %v1786_v31 }
 0xd6e   :  { %v1796_v33 = vsel %vm64_vm0, %v1794_v32, 0.0  ;;  %v4828_v32 = vld.sshfl [vmem:[%s6136_s0 + $0x30] sm:$0x11 pattern:$0x75316420] }
 0xd6f   :  { %v1797_v34 = vrot.slane %v1796_v33, 4 }
 0xd71   :  { %v1798_v35 = vadd.f32 %v1797_v34, %v1796_v33  ;;  %v1910_v34 = vrot.slane %v4828_v32, %v5181_v7 }
 0xd73   :  { %v1799_v36 = vrot.slane %v1798_v35, 2 }
 0xd75   :  { %v1793_v37 = vpop.permute.xlu1 %1792  ;;  %v1800_v39 = vadd.f32 %v1799_v36, %v1798_v35  ;;  %v1903_v35 = vcombine.high %v4828_v32, %v4828_v32 }
 0xd76   :  { %v1795_v38 = vmul.f32 %v5393_v25, %v1793_v37 }
 0xd77   :  { %v1801_v43 = vrot.slane %v1800_v39, 1 }
 0xd78   :  { %v1803_v40 = vsel %vm64_vm0, %v1795_v38, 0.0  ;;  %v1917_v38 = vrot.slane %v1903_v35, %v5181_v7 }
 0xd79   :  { %v1804_v41 = vrot.slane %v1803_v40, 4  ;;  %v1802_v48 = vadd.f32 %v1801_v43, %v1800_v39 }
 0xd7b   :  { %v1805_v44 = vadd.f32 %v1804_v41, %v1803_v40 }
 0xd7c   :  { %v1762_v45 = vpop.permute.xlu0 %1761 }
 0xd7d   :  { %v1806_v46 = vrot.slane %v1805_v44, 2  ;;  %v1767_v47 = vrot.slane %v1762_v45, %v5196_v20 }
 0xd7f   :  { %v1776_v49 = vmul.f32 %v5403_v42, %v1767_v47  ;;  %v1807_v50 = vadd.f32 %v1806_v46, %v1805_v44 }
 0xd81   :  { %v1810_v51 = vadd.f32 %v1802_v48, %v1776_v49  ;;  %v1808_v52 = vrot.slane %v1807_v50, 1 }
 0xd83   :  { %4991 = vtanh.f32 %v1810_v51  ;;  %v1809_v55 = vadd.f32 %v1808_v52, %v1807_v50 }
 0xd86   :  { %v1770_v53 = vpop.permute.xlu1 %1769 }
 0xd87   :  { %v1775_v54 = vrot.slane %v1770_v53, %v5196_v20 }
 0xd89   :  { %v1777_v56 = vmul.f32 %v5403_v42, %v1775_v54 }
 0xd8b   :  { %v1811_v57 = vadd.f32 %v1809_v55, %v1777_v56 }
 0xd8d   :  { %v4992_v58 = vpop.eup %4991  ;;  %4993 = vtanh.f32 %v1811_v57 }
 0xd8e   :  { %v1862_v60 = vrot.slane %v4992_v58, %v5196_v20 }
 0xd90   :  { %1864 = vbcast.lane.b32.xlu0 %v1862_v60, 256 }
 0xd94   :  { %1840 = vperm.xlu0 %4901, %v1831_v61  }
 0xd97   :  { %v4994_v63 = vpop.eup %4993 }
 0xd98   :  { %v1869_v0 = vrot.slane %v4994_v63, %v5196_v20 }
 0xd9a   :  { %1871 = vbcast.lane.b32.xlu1 %v1869_v0, 256 }
 0xd9e   :  { %1848 = vperm.xlu1 %4902, %v1838_v1  }
 0xe02   :  { %v1865_v2 = vpop.permute.xlu0 %1864 }
 0xe03   :  { %v1873_v3 = vmul.f32 %v5393_v25, %v1865_v2 }
 0xe05   :  { %v1875_v4 = vsel %vm64_vm0, %v1873_v3, 0.0  ;;  %v4830_v3 = vld.sshfl [vmem:[%s6136_s0 + $0x32] sm:$0x11 pattern:$0x75316420] }
 0xe06   :  { %v1876_v5 = vrot.slane %v1875_v4, 4 }
 0xe08   :  { %v1877_v6 = vadd.f32 %v1876_v5, %v1875_v4  ;;  %v1989_v5 = vrot.slane %v4830_v3, %v5181_v7 }
 0xe0a   :  { %v1878_v8 = vrot.slane %v1877_v6, 2 }
 0xe0c   :  { %v1872_v9 = vpop.permute.xlu1 %1871  ;;  %v1879_v13 = vadd.f32 %v1878_v8, %v1877_v6  ;;  %v1982_v6 = vcombine.high %v4830_v3, %v4830_v3 }
 0xe0d   :  { %v1874_v10 = vmul.f32 %v5393_v25, %v1872_v9 }
 0xe0e   :  { %v1880_v14 = vrot.slane %v1879_v13, 1 }
 0xe0f   :  { %v1882_v11 = vsel %vm64_vm0, %v1874_v10, 0.0  ;;  %v1996_v10 = vrot.slane %v1982_v6, %v5181_v7 }
 0xe10   :  { %v1883_v12 = vrot.slane %v1882_v11, 4  ;;  %v1881_v19 = vadd.f32 %v1880_v14, %v1879_v13 }
 0xe12   :  { %v1884_v15 = vadd.f32 %v1883_v12, %v1882_v11 }
 0xe13   :  { %v1841_v16 = vpop.permute.xlu0 %1840 }
 0xe14   :  { %v1885_v17 = vrot.slane %v1884_v15, 2  ;;  %v1846_v18 = vrot.slane %v1841_v16, %v5196_v20 }
 0xe16   :  { %v1855_v21 = vmul.f32 %v5403_v42, %v1846_v18  ;;  %v1886_v23 = vadd.f32 %v1885_v17, %v1884_v15 }
 0xe18   :  { %v1889_v22 = vadd.f32 %v1881_v19, %v1855_v21  ;;  %v1887_v24 = vrot.slane %v1886_v23, 1 }
 0xe1a   :  { %4995 = vtanh.f32 %v1889_v22  ;;  %v1888_v28 = vadd.f32 %v1887_v24, %v1886_v23 }
 0xe1d   :  { %v1849_v26 = vpop.permute.xlu1 %1848 }
 0xe1e   :  { %v1854_v27 = vrot.slane %v1849_v26, %v5196_v20 }
 0xe20   :  { %v1856_v29 = vmul.f32 %v5403_v42, %v1854_v27 }
 0xe22   :  { %v1890_v30 = vadd.f32 %v1888_v28, %v1856_v29 }
 0xe24   :  { %v4996_v31 = vpop.eup %4995  ;;  %4997 = vtanh.f32 %v1890_v30 }
 0xe25   :  { %v1941_v33 = vrot.slane %v4996_v31, %v5196_v20 }
 0xe27   :  { %1943 = vbcast.lane.b32.xlu0 %v1941_v33, 256 }
 0xe2b   :  { %1919 = vperm.xlu0 %4901, %v1910_v34  }
 0xe2e   :  { %v4998_v36 = vpop.eup %4997 }
 0xe2f   :  { %v1948_v37 = vrot.slane %v4998_v36, %v5196_v20 }
 0xe31   :  { %1950 = vbcast.lane.b32.xlu1 %v1948_v37, 256 }
 0xe35   :  { %1927 = vperm.xlu1 %4902, %v1917_v38  }
 0xe99   :  { %v1944_v39 = vpop.permute.xlu0 %1943 }
 0xe9a   :  { %v1952_v40 = vmul.f32 %v5393_v25, %v1944_v39  ;;  %v4832_v39 = vld.sshfl [vmem:[%s6136_s0 + $0x34] sm:$0x11 pattern:$0x75316420] }
 0xe9c   :  { %v1954_v41 = vsel %vm64_vm0, %v1952_v40, 0.0 }
 0xe9d   :  { %v1955_v43 = vrot.slane %v1954_v41, 4 }
 0xe9f   :  { %v1956_v44 = vadd.f32 %v1955_v43, %v1954_v41  ;;  %v2068_v41 = vrot.slane %v4832_v39, %v5181_v7  ;;  %v2061_v43 = vcombine.high %v4832_v39, %v4832_v39 }
 0xea1   :  { %v1957_v45 = vrot.slane %v1956_v44, 2 }
 0xea3   :  { %v1951_v46 = vpop.permute.xlu1 %1950  ;;  %v1958_v48 = vadd.f32 %v1957_v45, %v1956_v44 }
 0xea4   :  { %v1953_v47 = vmul.f32 %v5393_v25, %v1951_v46 }
 0xea5   :  { %v1959_v51 = vrot.slane %v1958_v48, 1 }
 0xea6   :  { %v1961_v49 = vsel %vm64_vm0, %v1953_v47, 0.0  ;;  %v5598_v47 = vld [vmem:[%s6137_s2] sm:$0xff] }
 0xea7   :  { %v1962_v50 = vrot.slane %v1961_v49, 4  ;;  %v1960_v56 = vadd.f32 %v1959_v51, %v1958_v48 }
 0xea9   :  { %v1963_v52 = vadd.f32 %v1962_v50, %v1961_v49 }
 0xeaa   :  { %v1920_v53 = vpop.permute.xlu0 %1919 }
 0xeab   :  { %v1964_v54 = vrot.slane %v1963_v52, 2  ;;  %v1925_v55 = vrot.slane %v1920_v53, %v5196_v20 }
 0xead   :  { %v1934_v57 = vmul.f32 %v5403_v42, %v1925_v55  ;;  %v1965_v58 = vadd.f32 %v1964_v54, %v1963_v52 }
 0xeaf   :  { %v1968_v59 = vadd.f32 %v1960_v56, %v1934_v57  ;;  %v1966_v60 = vrot.slane %v1965_v58, 1 }
 0xeb1   :  { %4999 = vtanh.f32 %v1968_v59  ;;  %v1967_v63 = vadd.f32 %v1966_v60, %v1965_v58 }
 0xeb4   :  { %v1928_v61 = vpop.permute.xlu1 %1927 }
 0xeb5   :  { %v1933_v62 = vrot.slane %v1928_v61, %v5196_v20 }
 0xeb7   :  { %v1935_v0 = vmul.f32 %v5403_v42, %v1933_v62 }
 0xeb9   :  { %v1969_v1 = vadd.f32 %v1967_v63, %v1935_v0  ;;  %v5608_v0 = vld [vmem:[%s6138_s1] sm:$0x1] }
 0xebb   :  { %v5000_v2 = vpop.eup %4999  ;;  %5001 = vtanh.f32 %v1969_v1 }
 0xebc   :  { %v2020_v4 = vrot.slane %v5000_v2, %v5196_v20 }
 0xebe   :  { %2022 = vbcast.lane.b32.xlu0 %v2020_v4, 256 }
 0xec2   :  { %1998 = vperm.xlu0 %4901, %v1989_v5  }
 0xec5   :  { %v5002_v8 = vpop.eup %5001 }
 0xec6   :  { %v2027_v9 = vrot.slane %v5002_v8, %v5196_v20 }
 0xec8   :  { %2029 = vbcast.lane.b32.xlu1 %v2027_v9, 256 }
 0xecc   :  { %2006 = vperm.xlu1 %4902, %v1996_v10  }
 0xf30   :  { %v2023_v13 = vpop.permute.xlu0 %2022 }
 0xf31   :  { %v2031_v11 = vmul.f32 %v5393_v25, %v2023_v13 }
 0xf33   :  { %v2033_v12 = vsel %vm64_vm0, %v2031_v11, 0.0  ;;  %v4834_v11 = vld.sshfl [vmem:[%s6136_s0 + $0x36] sm:$0x11 pattern:$0x75316420] }
 0xf34   :  { %v2034_v14 = vrot.slane %v2033_v12, 4 }
 0xf36   :  { %v2035_v15 = vadd.f32 %v2034_v14, %v2033_v12  ;;  %v2147_v14 = vrot.slane %v4834_v11, %v5181_v7 }
 0xf38   :  { %v2036_v16 = vrot.slane %v2035_v15, 2 }
 0xf3a   :  { %v2030_v17 = vpop.permute.xlu1 %2029  ;;  %v2037_v19 = vadd.f32 %v2036_v16, %v2035_v15  ;;  %v2140_v15 = vcombine.high %v4834_v11, %v4834_v11 }
 0xf3b   :  { %v2032_v18 = vmul.f32 %v5393_v25, %v2030_v17 }
 0xf3c   :  { %v2038_v22 = vrot.slane %v2037_v19, 1 }
 0xf3d   :  { %v2040_v21 = vsel %vm64_vm0, %v2032_v18, 0.0  ;;  %v2154_v18 = vrot.slane %v2140_v15, %v5181_v7 }
 0xf3e   :  { %v2041_v23 = vrot.slane %v2040_v21, 4  ;;  %v2039_v29 = vadd.f32 %v2038_v22, %v2037_v19 }
 0xf40   :  { %v2042_v24 = vadd.f32 %v2041_v23, %v2040_v21 }
 0xf41   :  { %v1999_v26 = vpop.permute.xlu0 %1998 }
 0xf42   :  { %v2043_v27 = vrot.slane %v2042_v24, 2  ;;  %v2004_v28 = vrot.slane %v1999_v26, %v5196_v20 }
 0xf44   :  { %v2013_v30 = vmul.f32 %v5403_v42, %v2004_v28  ;;  %v2044_v31 = vadd.f32 %v2043_v27, %v2042_v24 }
 0xf46   :  { %v2047_v32 = vadd.f32 %v2039_v29, %v2013_v30  ;;  %v2045_v33 = vrot.slane %v2044_v31, 1 }
 0xf48   :  { %5003 = vtanh.f32 %v2047_v32  ;;  %v2046_v35 = vadd.f32 %v2045_v33, %v2044_v31 }
 0xf4b   :  { %v2007_v34 = vpop.permute.xlu1 %2006 }
 0xf4c   :  { %v2012_v25 = vrot.slane %v2007_v34, %v5196_v20 }
 0xf4e   :  { %v2014_v36 = vmul.f32 %v5403_v42, %v2012_v25  ;;  %v2075_v42 = vrot.slane %v2061_v43, %v5181_v7 }
 0xf50   :  { %v2048_v37 = vadd.f32 %v2046_v35, %v2014_v36 }
 0xf52   :  { %v5004_v38 = vpop.eup %5003  ;;  %5005 = vtanh.f32 %v2048_v37 }
 0xf53   :  { %v2099_v40 = vrot.slane %v5004_v38, %v5196_v20 }
 0xf55   :  { %2101 = vbcast.lane.b32.xlu0 %v2099_v40, 256 }
 0xf59   :  { %2077 = vperm.xlu0 %4901, %v2068_v41  }
 0xf5c   :  { %v5006_v44 = vpop.eup %5005 }
 0xf5d   :  { %v2106_v45 = vrot.slane %v5006_v44, %v5196_v20 }
 0xf5f   :  { %2108 = vbcast.lane.b32.xlu1 %v2106_v45, 256 }
 0xf63   :  { %2085 = vperm.xlu1 %4902, %v2075_v42  }
 0xfc7   :  { %v2102_v46 = vpop.permute.xlu0 %2101 }
 0xfc8   :  { %v2110_v48 = vmul.f32 %v5598_v47, %v2102_v46 }
 0xfca   :  { %v2112_v49 = vsel %vm64_vm0, %v2110_v48, 0.0  ;;  %v4836_v48 = vld.sshfl [vmem:[%s6136_s0 + $0x38] sm:$0x11 pattern:$0x75316420] }
 0xfcb   :  { %v2113_v50 = vrot.slane %v2112_v49, 4 }
 0xfcd   :  { %v2114_v51 = vadd.f32 %v2113_v50, %v2112_v49  ;;  %v2226_v50 = vrot.slane %v4836_v48, %v5181_v7 }
 0xfcf   :  { %v2115_v52 = vrot.slane %v2114_v51, 2 }
 0xfd1   :  { %v2109_v53 = vpop.permute.xlu1 %2108  ;;  %v2116_v55 = vadd.f32 %v2115_v52, %v2114_v51  ;;  %v2219_v51 = vcombine.high %v4836_v48, %v4836_v48 }
 0xfd2   :  { %v2111_v54 = vmul.f32 %v5598_v47, %v2109_v53 }
 0xfd3   :  { %v2117_v58 = vrot.slane %v2116_v55, 1 }
 0xfd4   :  { %v2119_v56 = vsel %vm64_vm0, %v2111_v54, 0.0  ;;  %v2233_v54 = vrot.slane %v2219_v51, %v5181_v7 }
 0xfd5   :  { %v2120_v57 = vrot.slane %v2119_v56, 4  ;;  %v2118_v63 = vadd.f32 %v2117_v58, %v2116_v55 }
 0xfd7   :  { %v2121_v59 = vadd.f32 %v2120_v57, %v2119_v56 }
 0xfd8   :  { %v2078_v60 = vpop.permute.xlu0 %2077 }
 0xfd9   :  { %v2122_v61 = vrot.slane %v2121_v59, 2  ;;  %v2083_v62 = vrot.slane %v2078_v60, %v5196_v20 }
 0xfdb   :  { %v2092_v1 = vmul.f32 %v5608_v0, %v2083_v62  ;;  %v2123_v2 = vadd.f32 %v2122_v61, %v2121_v59 }
 0xfdd   :  { %v2126_v3 = vadd.f32 %v2118_v63, %v2092_v1  ;;  %v2124_v4 = vrot.slane %v2123_v2, 1 }
 0xfdf   :  { %5007 = vtanh.f32 %v2126_v3  ;;  %v2125_v8 = vadd.f32 %v2124_v4, %v2123_v2 }
 0xfe2   :  { %v2086_v5 = vpop.permute.xlu1 %2085 }
 0xfe3   :  { %v2091_v6 = vrot.slane %v2086_v5, %v5196_v20 }
 0xfe5   :  { %v2093_v9 = vmul.f32 %v5608_v0, %v2091_v6 }
 0xfe7   :  { %v2127_v10 = vadd.f32 %v2125_v8, %v2093_v9 }
 0xfe9   :  { %v5008_v13 = vpop.eup %5007  ;;  %5009 = vtanh.f32 %v2127_v10 }
 0xfea   :  { %v2178_v12 = vrot.slane %v5008_v13, %v5196_v20 }
 0xfec   :  { %2180 = vbcast.lane.b32.xlu0 %v2178_v12, 256 }
 0xff0   :  { %2156 = vperm.xlu0 %4901, %v2147_v14  }
 0xff3   :  { %v5010_v16 = vpop.eup %5009 }
 0xff4   :  { %v2185_v17 = vrot.slane %v5010_v16, %v5196_v20 }
 0xff6   :  { %2187 = vbcast.lane.b32.xlu1 %v2185_v17, 256 }
 0xffa   :  { %2164 = vperm.xlu1 %4902, %v2154_v18  }
0x105e   :  { %v2181_v19 = vpop.permute.xlu0 %2180 }
0x105f   :  { %v2189_v21 = vmul.f32 %v5598_v47, %v2181_v19 }
0x1061   :  { %v2191_v23 = vsel %vm64_vm0, %v2189_v21, 0.0  ;;  %v4838_v21 = vld.sshfl [vmem:[%s6136_s0 + $0x3a] sm:$0x11 pattern:$0x75316420] }
0x1062   :  { %v2192_v22 = vrot.slane %v2191_v23, 4 }
0x1064   :  { %v2193_v24 = vadd.f32 %v2192_v22, %v2191_v23  ;;  %v2305_v22 = vrot.slane %v4838_v21, %v5181_v7 }
0x1066   :  { %v2194_v26 = vrot.slane %v2193_v24, 2 }
0x1068   :  { %v2188_v27 = vpop.permute.xlu1 %2187  ;;  %v2195_v29 = vadd.f32 %v2194_v26, %v2193_v24  ;;  %v2298_v24 = vcombine.high %v4838_v21, %v4838_v21 }
0x1069   :  { %v2190_v28 = vmul.f32 %v5598_v47, %v2188_v27 }
0x106a   :  { %v2196_v32 = vrot.slane %v2195_v29, 1 }
0x106b   :  { %v2198_v30 = vsel %vm64_vm0, %v2190_v28, 0.0  ;;  %v2312_v28 = vrot.slane %v2298_v24, %v5181_v7 }
0x106c   :  { %v2199_v31 = vrot.slane %v2198_v30, 4  ;;  %v2197_v36 = vadd.f32 %v2196_v32, %v2195_v29 }
0x106e   :  { %v2200_v33 = vadd.f32 %v2199_v31, %v2198_v30 }
0x106f   :  { %v2157_v34 = vpop.permute.xlu0 %2156 }
0x1070   :  { %v2201_v25 = vrot.slane %v2200_v33, 2  ;;  %v2162_v35 = vrot.slane %v2157_v34, %v5196_v20 }
0x1072   :  { %v2171_v37 = vmul.f32 %v5608_v0, %v2162_v35  ;;  %v2202_v38 = vadd.f32 %v2201_v25, %v2200_v33 }
0x1074   :  { %v2205_v39 = vadd.f32 %v2197_v36, %v2171_v37  ;;  %v2203_v40 = vrot.slane %v2202_v38, 1 }
0x1076   :  { %5011 = vtanh.f32 %v2205_v39  ;;  %v2204_v44 = vadd.f32 %v2203_v40, %v2202_v38 }
0x1079   :  { %v2165_v41 = vpop.permute.xlu1 %2164 }
0x107a   :  { %v2170_v43 = vrot.slane %v2165_v41, %v5196_v20 }
0x107c   :  { %v2172_v45 = vmul.f32 %v5608_v0, %v2170_v43 }
0x107e   :  { %v2206_v42 = vadd.f32 %v2204_v44, %v2172_v45 }
0x1080   :  { %v5012_v46 = vpop.eup %5011  ;;  %5013 = vtanh.f32 %v2206_v42 }
0x1081   :  { %v2257_v49 = vrot.slane %v5012_v46, %v5196_v20 }
0x1083   :  { %2259 = vbcast.lane.b32.xlu0 %v2257_v49, 256 }
0x1087   :  { %2235 = vperm.xlu0 %4901, %v2226_v50  }
0x108a   :  { %v5014_v52 = vpop.eup %5013 }
0x108b   :  { %v2264_v53 = vrot.slane %v5014_v52, %v5196_v20 }
0x108d   :  { %2266 = vbcast.lane.b32.xlu1 %v2264_v53, 256 }
0x1091   :  { %2243 = vperm.xlu1 %4902, %v2233_v54  }
0x10f5   :  { %v2260_v55 = vpop.permute.xlu0 %2259 }
0x10f6   :  { %v2268_v56 = vmul.f32 %v5598_v47, %v2260_v55 }
0x10f8   :  { %v2270_v57 = vsel %vm64_vm0, %v2268_v56, 0.0  ;;  %v4840_v56 = vld.sshfl [vmem:[%s6136_s0 + $0x3c] sm:$0x11 pattern:$0x75316420] }
0x10f9   :  { %v2271_v58 = vrot.slane %v2270_v57, 4 }
0x10fb   :  { %v2272_v59 = vadd.f32 %v2271_v58, %v2270_v57  ;;  %v2384_v58 = vrot.slane %v4840_v56, %v5181_v7 }
0x10fd   :  { %v2273_v60 = vrot.slane %v2272_v59, 2 }
0x10ff   :  { %v2267_v61 = vpop.permute.xlu1 %2266  ;;  %v2274_v63 = vadd.f32 %v2273_v60, %v2272_v59  ;;  %v2377_v59 = vcombine.high %v4840_v56, %v4840_v56 }
0x1100   :  { %v2269_v62 = vmul.f32 %v5598_v47, %v2267_v61 }
0x1101   :  { %v2275_v3 = vrot.slane %v2274_v63, 1 }
0x1102   :  { %v2277_v1 = vsel %vm64_vm0, %v2269_v62, 0.0  ;;  %v2391_v62 = vrot.slane %v2377_v59, %v5181_v7 }
0x1103   :  { %v2278_v2 = vrot.slane %v2277_v1, 4  ;;  %v2276_v9 = vadd.f32 %v2275_v3, %v2274_v63 }
0x1105   :  { %v2279_v4 = vadd.f32 %v2278_v2, %v2277_v1 }
0x1106   :  { %v2236_v5 = vpop.permute.xlu0 %2235 }
0x1107   :  { %v2280_v6 = vrot.slane %v2279_v4, 2  ;;  %v2241_v8 = vrot.slane %v2236_v5, %v5196_v20 }
0x1109   :  { %v2250_v10 = vmul.f32 %v5608_v0, %v2241_v8  ;;  %v2281_v13 = vadd.f32 %v2280_v6, %v2279_v4 }
0x110b   :  { %v2284_v11 = vadd.f32 %v2276_v9, %v2250_v10  ;;  %v2282_v12 = vrot.slane %v2281_v13, 1 }
0x110d   :  { %5015 = vtanh.f32 %v2284_v11  ;;  %v2283_v16 = vadd.f32 %v2282_v12, %v2281_v13 }
0x1110   :  { %v2244_v14 = vpop.permute.xlu1 %2243 }
0x1111   :  { %v2249_v15 = vrot.slane %v2244_v14, %v5196_v20 }
0x1113   :  { %v2251_v17 = vmul.f32 %v5608_v0, %v2249_v15 }
0x1115   :  { %v2285_v18 = vadd.f32 %v2283_v16, %v2251_v17 }
0x1117   :  { %v5016_v19 = vpop.eup %5015  ;;  %5017 = vtanh.f32 %v2285_v18 }
0x1118   :  { %v2336_v23 = vrot.slane %v5016_v19, %v5196_v20 }
0x111a   :  { %2338 = vbcast.lane.b32.xlu0 %v2336_v23, 256 }
0x111e   :  { %2314 = vperm.xlu0 %4901, %v2305_v22  }
0x1121   :  { %v5018_v26 = vpop.eup %5017 }
0x1122   :  { %v2343_v27 = vrot.slane %v5018_v26, %v5196_v20 }
0x1124   :  { %2345 = vbcast.lane.b32.xlu1 %v2343_v27, 256 }
0x1128   :  { %2322 = vperm.xlu1 %4902, %v2312_v28  }
0x118c   :  { %v2339_v29 = vpop.permute.xlu0 %2338 }
0x118d   :  { %v2347_v30 = vmul.f32 %v5598_v47, %v2339_v29 }
0x118f   :  { %v2349_v31 = vsel %vm64_vm0, %v2347_v30, 0.0  ;;  %v4842_v30 = vld.sshfl [vmem:[%s6136_s0 + $0x3e] sm:$0x11 pattern:$0x75316420] }
0x1190   :  { %v2350_v32 = vrot.slane %v2349_v31, 4 }
0x1192   :  { %v2351_v33 = vadd.f32 %v2350_v32, %v2349_v31  ;;  %v2463_v32 = vrot.slane %v4842_v30, %v5181_v7 }
0x1194   :  { %v2352_v34 = vrot.slane %v2351_v33, 2 }
0x1196   :  { %v2346_v25 = vpop.permute.xlu1 %2345  ;;  %v2353_v36 = vadd.f32 %v2352_v34, %v2351_v33  ;;  %v2456_v33 = vcombine.high %v4842_v30, %v4842_v30 }
0x1197   :  { %v2348_v35 = vmul.f32 %v5598_v47, %v2346_v25 }
0x1198   :  { %v2354_v39 = vrot.slane %v2353_v36, 1 }
0x1199   :  { %v2356_v37 = vsel %vm64_vm0, %v2348_v35, 0.0  ;;  %v2470_v35 = vrot.slane %v2456_v33, %v5181_v7 }
0x119a   :  { %v2357_v38 = vrot.slane %v2356_v37, 4  ;;  %v2355_v45 = vadd.f32 %v2354_v39, %v2353_v36 }
0x119c   :  { %v2358_v40 = vadd.f32 %v2357_v38, %v2356_v37 }
0x119d   :  { %v2315_v41 = vpop.permute.xlu0 %2314 }
0x119e   :  { %v2359_v43 = vrot.slane %v2358_v40, 2  ;;  %v2320_v44 = vrot.slane %v2315_v41, %v5196_v20 }
0x11a0   :  { %v2329_v42 = vmul.f32 %v5608_v0, %v2320_v44  ;;  %v2360_v46 = vadd.f32 %v2359_v43, %v2358_v40 }
0x11a2   :  { %v2363_v48 = vadd.f32 %v2355_v45, %v2329_v42  ;;  %v2361_v49 = vrot.slane %v2360_v46, 1 }
0x11a4   :  { %5019 = vtanh.f32 %v2363_v48  ;;  %v2362_v52 = vadd.f32 %v2361_v49, %v2360_v46 }
0x11a7   :  { %v2323_v50 = vpop.permute.xlu1 %2322 }
0x11a8   :  { %v2328_v51 = vrot.slane %v2323_v50, %v5196_v20 }
0x11aa   :  { %v2330_v53 = vmul.f32 %v5608_v0, %v2328_v51 }
0x11ac   :  { %v2364_v54 = vadd.f32 %v2362_v52, %v2330_v53 }
0x11ae   :  { %v5020_v55 = vpop.eup %5019  ;;  %5021 = vtanh.f32 %v2364_v54 }
0x11af   :  { %v2415_v57 = vrot.slane %v5020_v55, %v5196_v20 }
0x11b1   :  { %2417 = vbcast.lane.b32.xlu0 %v2415_v57, 256 }
0x11b5   :  { %2393 = vperm.xlu0 %4901, %v2384_v58  }
0x11b8   :  { %v5022_v60 = vpop.eup %5021 }
0x11b9   :  { %v2422_v61 = vrot.slane %v5022_v60, %v5196_v20 }
0x11bb   :  { %2424 = vbcast.lane.b32.xlu1 %v2422_v61, 256 }
0x11bf   :  { %2401 = vperm.xlu1 %4902, %v2391_v62  }
0x1223   :  { %v2418_v63 = vpop.permute.xlu0 %2417 }
0x1224   :  { %v2426_v1 = vmul.f32 %v5598_v47, %v2418_v63 }
0x1226   :  { %v2428_v2 = vsel %vm64_vm0, %v2426_v1, 0.0  ;;  %v4844_v1 = vld.sshfl [vmem:[%s6136_s0 + $0x40] sm:$0x11 pattern:$0x75316420] }
0x1227   :  { %v2429_v3 = vrot.slane %v2428_v2, 4 }
0x1229   :  { %v2430_v4 = vadd.f32 %v2429_v3, %v2428_v2  ;;  %v2542_v3 = vrot.slane %v4844_v1, %v5181_v7 }
0x122b   :  { %v2431_v5 = vrot.slane %v2430_v4, 2 }
0x122d   :  { %v2425_v6 = vpop.permute.xlu1 %2424  ;;  %v2432_v9 = vadd.f32 %v2431_v5, %v2430_v4  ;;  %v2535_v4 = vcombine.high %v4844_v1, %v4844_v1 }
0x122e   :  { %v2427_v8 = vmul.f32 %v5598_v47, %v2425_v6 }
0x122f   :  { %v2433_v11 = vrot.slane %v2432_v9, 1 }
0x1230   :  { %v2435_v10 = vsel %vm64_vm0, %v2427_v8, 0.0  ;;  %v2549_v8 = vrot.slane %v2535_v4, %v5181_v7 }
0x1231   :  { %v2436_v13 = vrot.slane %v2435_v10, 4  ;;  %v2434_v17 = vadd.f32 %v2433_v11, %v2432_v9 }
0x1233   :  { %v2437_v12 = vadd.f32 %v2436_v13, %v2435_v10 }
0x1234   :  { %v2394_v14 = vpop.permute.xlu0 %2393 }
0x1235   :  { %v2438_v15 = vrot.slane %v2437_v12, 2  ;;  %v2399_v16 = vrot.slane %v2394_v14, %v5196_v20 }
0x1237   :  { %v2408_v18 = vmul.f32 %v5608_v0, %v2399_v16  ;;  %v2439_v19 = vadd.f32 %v2438_v15, %v2437_v12 }
0x1239   :  { %v2442_v21 = vadd.f32 %v2434_v17, %v2408_v18  ;;  %v2440_v23 = vrot.slane %v2439_v19, 1 }
0x123b   :  { %5023 = vtanh.f32 %v2442_v21  ;;  %v2441_v26 = vadd.f32 %v2440_v23, %v2439_v19 }
0x123e   :  { %v2402_v22 = vpop.permute.xlu1 %2401 }
0x123f   :  { %v2407_v24 = vrot.slane %v2402_v22, %v5196_v20 }
0x1241   :  { %v2409_v27 = vmul.f32 %v5608_v0, %v2407_v24 }
0x1243   :  { %v2443_v28 = vadd.f32 %v2441_v26, %v2409_v27 }
0x1245   :  { %v5024_v29 = vpop.eup %5023  ;;  %5025 = vtanh.f32 %v2443_v28 }
0x1246   :  { %v2494_v31 = vrot.slane %v5024_v29, %v5196_v20 }
0x1248   :  { %2496 = vbcast.lane.b32.xlu0 %v2494_v31, 256 }
0x124c   :  { %2472 = vperm.xlu0 %4901, %v2463_v32  }
0x124f   :  { %v5026_v34 = vpop.eup %5025 }
0x1250   :  { %v2501_v25 = vrot.slane %v5026_v34, %v5196_v20 }
0x1252   :  { %2503 = vbcast.lane.b32.xlu1 %v2501_v25, 256 }
0x1256   :  { %2480 = vperm.xlu1 %4902, %v2470_v35  }
0x12ba   :  { %v2497_v36 = vpop.permute.xlu0 %2496 }
0x12bb   :  { %v2505_v37 = vmul.f32 %v5598_v47, %v2497_v36 }
0x12bd   :  { %v2507_v38 = vsel %vm64_vm0, %v2505_v37, 0.0  ;;  %v4846_v37 = vld.sshfl [vmem:[%s6136_s0 + $0x42] sm:$0x11 pattern:$0x75316420] }
0x12be   :  { %v2508_v39 = vrot.slane %v2507_v38, 4 }
0x12c0   :  { %v2509_v40 = vadd.f32 %v2508_v39, %v2507_v38  ;;  %v2621_v39 = vrot.slane %v4846_v37, %v5181_v7 }
0x12c2   :  { %v2510_v41 = vrot.slane %v2509_v40, 2 }
0x12c4   :  { %v2504_v43 = vpop.permute.xlu1 %2503  ;;  %v2511_v45 = vadd.f32 %v2510_v41, %v2509_v40  ;;  %v2614_v40 = vcombine.high %v4846_v37, %v4846_v37 }
0x12c5   :  { %v2506_v44 = vmul.f32 %v5598_v47, %v2504_v43 }
0x12c6   :  { %v2512_v48 = vrot.slane %v2511_v45, 1 }
0x12c7   :  { %v2514_v42 = vsel %vm64_vm0, %v2506_v44, 0.0  ;;  %v2628_v44 = vrot.slane %v2614_v40, %v5181_v7 }
0x12c8   :  { %v2515_v46 = vrot.slane %v2514_v42, 4  ;;  %v2513_v53 = vadd.f32 %v2512_v48, %v2511_v45 }
0x12ca   :  { %v2516_v49 = vadd.f32 %v2515_v46, %v2514_v42 }
0x12cb   :  { %v2473_v50 = vpop.permute.xlu0 %2472 }
0x12cc   :  { %v2517_v51 = vrot.slane %v2516_v49, 2  ;;  %v2478_v52 = vrot.slane %v2473_v50, %v5196_v20 }
0x12ce   :  { %v2487_v54 = vmul.f32 %v5608_v0, %v2478_v52  ;;  %v2518_v55 = vadd.f32 %v2517_v51, %v2516_v49 }
0x12d0   :  { %v2521_v56 = vadd.f32 %v2513_v53, %v2487_v54  ;;  %v2519_v57 = vrot.slane %v2518_v55, 1 }
0x12d2   :  { %5027 = vtanh.f32 %v2521_v56  ;;  %v2520_v60 = vadd.f32 %v2519_v57, %v2518_v55 }
0x12d5   :  { %v2481_v58 = vpop.permute.xlu1 %2480 }
0x12d6   :  { %v2486_v59 = vrot.slane %v2481_v58, %v5196_v20 }
0x12d8   :  { %v2488_v61 = vmul.f32 %v5608_v0, %v2486_v59 }
0x12da   :  { %v2522_v62 = vadd.f32 %v2520_v60, %v2488_v61 }
0x12dc   :  { %v5028_v63 = vpop.eup %5027  ;;  %5029 = vtanh.f32 %v2522_v62 }
0x12dd   :  { %v2573_v2 = vrot.slane %v5028_v63, %v5196_v20 }
0x12df   :  { %2575 = vbcast.lane.b32.xlu0 %v2573_v2, 256 }
0x12e3   :  { %2551 = vperm.xlu0 %4901, %v2542_v3  }
0x12e6   :  { %v5030_v5 = vpop.eup %5029 }
0x12e7   :  { %v2580_v6 = vrot.slane %v5030_v5, %v5196_v20 }
0x12e9   :  { %2582 = vbcast.lane.b32.xlu1 %v2580_v6, 256 }
0x12ed   :  { %2559 = vperm.xlu1 %4902, %v2549_v8  }
0x1351   :  { %v2576_v9 = vpop.permute.xlu0 %2575 }
0x1352   :  { %v2584_v10 = vmul.f32 %v5598_v47, %v2576_v9 }
0x1354   :  { %v2586_v13 = vsel %vm64_vm0, %v2584_v10, 0.0  ;;  %v4848_v10 = vld.sshfl [vmem:[%s6136_s0 + $0x44] sm:$0x11 pattern:$0x75316420] }
0x1355   :  { %v2587_v11 = vrot.slane %v2586_v13, 4 }
0x1357   :  { %v2588_v12 = vadd.f32 %v2587_v11, %v2586_v13  ;;  %v2700_v11 = vrot.slane %v4848_v10, %v5181_v7 }
0x1359   :  { %v2589_v14 = vrot.slane %v2588_v12, 2 }
0x135b   :  { %v2583_v15 = vpop.permute.xlu1 %2582  ;;  %v2590_v17 = vadd.f32 %v2589_v14, %v2588_v12  ;;  %v2693_v12 = vcombine.high %v4848_v10, %v4848_v10 }
0x135c   :  { %v2585_v16 = vmul.f32 %v5598_v47, %v2583_v15 }
0x135d   :  { %v2591_v21 = vrot.slane %v2590_v17, 1 }
0x135e   :  { %v2593_v18 = vsel %vm64_vm0, %v2585_v16, 0.0  ;;  %v2707_v16 = vrot.slane %v2693_v12, %v5181_v7 }
0x135f   :  { %v2594_v19 = vrot.slane %v2593_v18, 4  ;;  %v2592_v27 = vadd.f32 %v2591_v21, %v2590_v17 }
0x1361   :  { %v2595_v23 = vadd.f32 %v2594_v19, %v2593_v18 }
0x1362   :  { %v2552_v22 = vpop.permute.xlu0 %2551 }
0x1363   :  { %v2596_v24 = vrot.slane %v2595_v23, 2  ;;  %v2557_v26 = vrot.slane %v2552_v22, %v5196_v20 }
0x1365   :  { %v2566_v28 = vmul.f32 %v5608_v0, %v2557_v26  ;;  %v2597_v29 = vadd.f32 %v2596_v24, %v2595_v23 }
0x1367   :  { %v2600_v30 = vadd.f32 %v2592_v27, %v2566_v28  ;;  %v2598_v31 = vrot.slane %v2597_v29, 1 }
0x1369   :  { %5031 = vtanh.f32 %v2600_v30  ;;  %v2599_v34 = vadd.f32 %v2598_v31, %v2597_v29 }
0x136c   :  { %v2560_v32 = vpop.permute.xlu1 %2559 }
0x136d   :  { %v2565_v33 = vrot.slane %v2560_v32, %v5196_v20 }
0x136f   :  { %v2567_v25 = vmul.f32 %v5608_v0, %v2565_v33 }
0x1371   :  { %v2601_v35 = vadd.f32 %v2599_v34, %v2567_v25 }
0x1373   :  { %v5032_v36 = vpop.eup %5031  ;;  %5033 = vtanh.f32 %v2601_v35 }
0x1374   :  { %v2652_v38 = vrot.slane %v5032_v36, %v5196_v20 }
0x1376   :  { %2654 = vbcast.lane.b32.xlu0 %v2652_v38, 256 }
0x137a   :  { %2630 = vperm.xlu0 %4901, %v2621_v39  }
0x137d   :  { %v5034_v41 = vpop.eup %5033 }
0x137e   :  { %v2659_v43 = vrot.slane %v5034_v41, %v5196_v20 }
0x1380   :  { %2661 = vbcast.lane.b32.xlu1 %v2659_v43, 256 }
0x1384   :  { %2638 = vperm.xlu1 %4902, %v2628_v44  }
0x13e8   :  { %v2655_v45 = vpop.permute.xlu0 %2654 }
0x13e9   :  { %v2663_v42 = vmul.f32 %v5598_v47, %v2655_v45 }
0x13eb   :  { %v2665_v46 = vsel %vm64_vm0, %v2663_v42, 0.0  ;;  %v4850_v42 = vld.sshfl [vmem:[%s6136_s0 + $0x46] sm:$0x11 pattern:$0x75316420] }
0x13ec   :  { %v2666_v48 = vrot.slane %v2665_v46, 4 }
0x13ee   :  { %v2667_v49 = vadd.f32 %v2666_v48, %v2665_v46  ;;  %v2779_v48 = vrot.slane %v4850_v42, %v5181_v7 }
0x13f0   :  { %v2668_v50 = vrot.slane %v2667_v49, 2 }
0x13f2   :  { %v2662_v51 = vpop.permute.xlu1 %2661  ;;  %v2669_v53 = vadd.f32 %v2668_v50, %v2667_v49  ;;  %v2772_v49 = vcombine.high %v4850_v42, %v4850_v42 }
0x13f3   :  { %v2664_v52 = vmul.f32 %v5598_v47, %v2662_v51 }
0x13f4   :  { %v2670_v56 = vrot.slane %v2669_v53, 1 }
0x13f5   :  { %v2672_v54 = vsel %vm64_vm0, %v2664_v52, 0.0  ;;  %v2786_v52 = vrot.slane %v2772_v49, %v5181_v7 }
0x13f6   :  { %v2673_v55 = vrot.slane %v2672_v54, 4  ;;  %v2671_v61 = vadd.f32 %v2670_v56, %v2669_v53 }
0x13f8   :  { %v2674_v57 = vadd.f32 %v2673_v55, %v2672_v54 }
0x13f9   :  { %v2631_v58 = vpop.permute.xlu0 %2630 }
0x13fa   :  { %v2675_v59 = vrot.slane %v2674_v57, 2  ;;  %v2636_v60 = vrot.slane %v2631_v58, %v5196_v20 }
0x13fc   :  { %v2645_v62 = vmul.f32 %v5608_v0, %v2636_v60  ;;  %v2676_v63 = vadd.f32 %v2675_v59, %v2674_v57 }
0x13fe   :  { %v2679_v1 = vadd.f32 %v2671_v61, %v2645_v62  ;;  %v2677_v2 = vrot.slane %v2676_v63, 1 }
0x1400   :  { %5035 = vtanh.f32 %v2679_v1  ;;  %v2678_v5 = vadd.f32 %v2677_v2, %v2676_v63 }
0x1403   :  { %v2639_v3 = vpop.permute.xlu1 %2638 }
0x1404   :  { %v2644_v4 = vrot.slane %v2639_v3, %v5196_v20 }
0x1406   :  { %v2646_v6 = vmul.f32 %v5608_v0, %v2644_v4 }
0x1408   :  { %v2680_v8 = vadd.f32 %v2678_v5, %v2646_v6 }
0x140a   :  { %v5036_v9 = vpop.eup %5035  ;;  %5037 = vtanh.f32 %v2680_v8 }
0x140b   :  { %v2731_v13 = vrot.slane %v5036_v9, %v5196_v20 }
0x140d   :  { %2733 = vbcast.lane.b32.xlu0 %v2731_v13, 256 }
0x1411   :  { %2709 = vperm.xlu0 %4901, %v2700_v11  }
0x1414   :  { %v5038_v14 = vpop.eup %5037 }
0x1415   :  { %v2738_v15 = vrot.slane %v5038_v14, %v5196_v20 }
0x1417   :  { %2740 = vbcast.lane.b32.xlu1 %v2738_v15, 256 }
0x141b   :  { %2717 = vperm.xlu1 %4902, %v2707_v16  }
0x147f   :  { %v2734_v17 = vpop.permute.xlu0 %2733 }
0x1480   :  { %v2742_v18 = vmul.f32 %v5598_v47, %v2734_v17 }
0x1482   :  { %v2744_v19 = vsel %vm64_vm0, %v2742_v18, 0.0  ;;  %v4852_v18 = vld.sshfl [vmem:[%s6136_s0 + $0x48] sm:$0x11 pattern:$0x75316420] }
0x1483   :  { %v2745_v21 = vrot.slane %v2744_v19, 4 }
0x1485   :  { %v2746_v23 = vadd.f32 %v2745_v21, %v2744_v19  ;;  %v2858_v21 = vrot.slane %v4852_v18, %v5181_v7 }
0x1487   :  { %v2747_v22 = vrot.slane %v2746_v23, 2 }
0x1489   :  { %v2741_v24 = vpop.permute.xlu1 %2740  ;;  %v2748_v27 = vadd.f32 %v2747_v22, %v2746_v23  ;;  %v2851_v23 = vcombine.high %v4852_v18, %v4852_v18 }
0x148a   :  { %v2743_v26 = vmul.f32 %v5598_v47, %v2741_v24 }
0x148b   :  { %v2749_v30 = vrot.slane %v2748_v27, 1 }
0x148c   :  { %v2751_v28 = vsel %vm64_vm0, %v2743_v26, 0.0  ;;  %v2865_v26 = vrot.slane %v2851_v23, %v5181_v7 }
0x148d   :  { %v2752_v29 = vrot.slane %v2751_v28, 4  ;;  %v2750_v25 = vadd.f32 %v2749_v30, %v2748_v27 }
0x148f   :  { %v2753_v31 = vadd.f32 %v2752_v29, %v2751_v28 }
0x1490   :  { %v2710_v32 = vpop.permute.xlu0 %2709 }
0x1491   :  { %v2754_v33 = vrot.slane %v2753_v31, 2  ;;  %v2715_v34 = vrot.slane %v2710_v32, %v5196_v20 }
0x1493   :  { %v2724_v35 = vmul.f32 %v5608_v0, %v2715_v34  ;;  %v2755_v36 = vadd.f32 %v2754_v33, %v2753_v31 }
0x1495   :  { %v2758_v37 = vadd.f32 %v2750_v25, %v2724_v35  ;;  %v2756_v38 = vrot.slane %v2755_v36, 1 }
0x1497   :  { %5039 = vtanh.f32 %v2758_v37  ;;  %v2757_v41 = vadd.f32 %v2756_v38, %v2755_v36 }
0x149a   :  { %v2718_v39 = vpop.permute.xlu1 %2717 }
0x149b   :  { %v2723_v40 = vrot.slane %v2718_v39, %v5196_v20 }
0x149d   :  { %v2725_v43 = vmul.f32 %v5608_v0, %v2723_v40 }
0x149f   :  { %v2759_v44 = vadd.f32 %v2757_v41, %v2725_v43 }
0x14a1   :  { %v5040_v45 = vpop.eup %5039  ;;  %5041 = vtanh.f32 %v2759_v44 }
0x14a2   :  { %v2810_v46 = vrot.slane %v5040_v45, %v5196_v20 }
0x14a4   :  { %2812 = vbcast.lane.b32.xlu0 %v2810_v46, 256 }
0x14a8   :  { %2788 = vperm.xlu0 %4901, %v2779_v48  }
0x14ab   :  { %v5042_v50 = vpop.eup %5041 }
0x14ac   :  { %v2817_v51 = vrot.slane %v5042_v50, %v5196_v20 }
0x14ae   :  { %2819 = vbcast.lane.b32.xlu1 %v2817_v51, 256 }
0x14b2   :  { %2796 = vperm.xlu1 %4902, %v2786_v52  }
0x1516   :  { %v2813_v53 = vpop.permute.xlu0 %2812 }
0x1517   :  { %v2821_v54 = vmul.f32 %v5598_v47, %v2813_v53 }
0x1519   :  { %v2823_v55 = vsel %vm64_vm0, %v2821_v54, 0.0  ;;  %v4854_v54 = vld.sshfl [vmem:[%s6136_s0 + $0x4a] sm:$0x11 pattern:$0x75316420] }
0x151a   :  { %v2824_v56 = vrot.slane %v2823_v55, 4 }
0x151c   :  { %v2825_v57 = vadd.f32 %v2824_v56, %v2823_v55  ;;  %v2937_v56 = vrot.slane %v4854_v54, %v5181_v7 }
0x151e   :  { %v2826_v58 = vrot.slane %v2825_v57, 2 }
0x1520   :  { %v2820_v59 = vpop.permute.xlu1 %2819  ;;  %v2827_v61 = vadd.f32 %v2826_v58, %v2825_v57  ;;  %v2930_v57 = vcombine.high %v4854_v54, %v4854_v54 }
0x1521   :  { %v2822_v60 = vmul.f32 %v5598_v47, %v2820_v59 }
0x1522   :  { %v2828_v1 = vrot.slane %v2827_v61, 1 }
0x1523   :  { %v2830_v62 = vsel %vm64_vm0, %v2822_v60, 0.0  ;;  %v2944_v60 = vrot.slane %v2930_v57, %v5181_v7 }
0x1524   :  { %v2831_v63 = vrot.slane %v2830_v62, 4  ;;  %v2829_v6 = vadd.f32 %v2828_v1, %v2827_v61 }
0x1526   :  { %v2832_v2 = vadd.f32 %v2831_v63, %v2830_v62 }
0x1527   :  { %v2789_v3 = vpop.permute.xlu0 %2788 }
0x1528   :  { %v2833_v4 = vrot.slane %v2832_v2, 2  ;;  %v2794_v5 = vrot.slane %v2789_v3, %v5196_v20 }
0x152a   :  { %v2803_v8 = vmul.f32 %v5608_v0, %v2794_v5  ;;  %v2834_v9 = vadd.f32 %v2833_v4, %v2832_v2 }
0x152c   :  { %v2837_v10 = vadd.f32 %v2829_v6, %v2803_v8  ;;  %v2835_v13 = vrot.slane %v2834_v9, 1 }
0x152e   :  { %5043 = vtanh.f32 %v2837_v10  ;;  %v2836_v14 = vadd.f32 %v2835_v13, %v2834_v9 }
0x1531   :  { %v2797_v11 = vpop.permute.xlu1 %2796 }
0x1532   :  { %v2802_v12 = vrot.slane %v2797_v11, %v5196_v20 }
0x1534   :  { %v2804_v15 = vmul.f32 %v5608_v0, %v2802_v12 }
0x1536   :  { %v2838_v16 = vadd.f32 %v2836_v14, %v2804_v15 }
0x1538   :  { %v5044_v17 = vpop.eup %5043  ;;  %5045 = vtanh.f32 %v2838_v16 }
0x1539   :  { %v2889_v19 = vrot.slane %v5044_v17, %v5196_v20 }
0x153b   :  { %2891 = vbcast.lane.b32.xlu0 %v2889_v19, 256 }
0x153f   :  { %2867 = vperm.xlu0 %4901, %v2858_v21  }
0x1542   :  { %v5046_v22 = vpop.eup %5045 }
0x1543   :  { %v2896_v24 = vrot.slane %v5046_v22, %v5196_v20 }
0x1545   :  { %2898 = vbcast.lane.b32.xlu1 %v2896_v24, 256 }
0x1549   :  { %2875 = vperm.xlu1 %4902, %v2865_v26  }
0x15ad   :  { %v2892_v27 = vpop.permute.xlu0 %2891 }
0x15ae   :  { %v2900_v28 = vmul.f32 %v5598_v47, %v2892_v27 }
0x15b0   :  { %v2902_v29 = vsel %vm64_vm0, %v2900_v28, 0.0  ;;  %v4856_v28 = vld.sshfl [vmem:[%s6136_s0 + $0x4c] sm:$0x11 pattern:$0x75316420] }
0x15b1   :  { %v2903_v30 = vrot.slane %v2902_v29, 4 }
0x15b3   :  { %v2904_v31 = vadd.f32 %v2903_v30, %v2902_v29  ;;  %v3016_v30 = vrot.slane %v4856_v28, %v5181_v7 }
0x15b5   :  { %v2905_v32 = vrot.slane %v2904_v31, 2 }
0x15b7   :  { %v2899_v33 = vpop.permute.xlu1 %2898  ;;  %v2906_v25 = vadd.f32 %v2905_v32, %v2904_v31  ;;  %v3009_v31 = vcombine.high %v4856_v28, %v4856_v28 }
0x15b8   :  { %v2901_v34 = vmul.f32 %v5598_v47, %v2899_v33 }
0x15b9   :  { %v2907_v37 = vrot.slane %v2906_v25, 1 }
0x15ba   :  { %v2909_v35 = vsel %vm64_vm0, %v2901_v34, 0.0  ;;  %v3023_v34 = vrot.slane %v3009_v31, %v5181_v7 }
0x15bb   :  { %v2910_v36 = vrot.slane %v2909_v35, 4  ;;  %v2908_v43 = vadd.f32 %v2907_v37, %v2906_v25 }
0x15bd   :  { %v2911_v38 = vadd.f32 %v2910_v36, %v2909_v35 }
0x15be   :  { %v2868_v39 = vpop.permute.xlu0 %2867 }
0x15bf   :  { %v2912_v40 = vrot.slane %v2911_v38, 2  ;;  %v2873_v41 = vrot.slane %v2868_v39, %v5196_v20 }
0x15c1   :  { %v2882_v44 = vmul.f32 %v5608_v0, %v2873_v41  ;;  %v2913_v45 = vadd.f32 %v2912_v40, %v2911_v38 }
0x15c3   :  { %v2916_v42 = vadd.f32 %v2908_v43, %v2882_v44  ;;  %v2914_v46 = vrot.slane %v2913_v45, 1 }
0x15c5   :  { %5047 = vtanh.f32 %v2916_v42  ;;  %v2915_v50 = vadd.f32 %v2914_v46, %v2913_v45 }
0x15c8   :  { %v2876_v48 = vpop.permute.xlu1 %2875 }
0x15c9   :  { %v2881_v49 = vrot.slane %v2876_v48, %v5196_v20 }
0x15cb   :  { %v2883_v51 = vmul.f32 %v5608_v0, %v2881_v49 }
0x15cd   :  { %v2917_v52 = vadd.f32 %v2915_v50, %v2883_v51 }
0x15cf   :  { %v5048_v53 = vpop.eup %5047  ;;  %5049 = vtanh.f32 %v2917_v52 }
0x15d0   :  { %v2968_v55 = vrot.slane %v5048_v53, %v5196_v20 }
0x15d2   :  { %2970 = vbcast.lane.b32.xlu0 %v2968_v55, 256 }
0x15d6   :  { %2946 = vperm.xlu0 %4901, %v2937_v56  }
0x15d9   :  { %v5050_v58 = vpop.eup %5049 }
0x15da   :  { %v2975_v59 = vrot.slane %v5050_v58, %v5196_v20 }
0x15dc   :  { %2977 = vbcast.lane.b32.xlu1 %v2975_v59, 256 }
0x15e0   :  { %2954 = vperm.xlu1 %4902, %v2944_v60  }
0x1644   :  { %v2971_v61 = vpop.permute.xlu0 %2970 }
0x1645   :  { %v2979_v62 = vmul.f32 %v5598_v47, %v2971_v61  ;;  %v4858_v61 = vld.sshfl [vmem:[%s6136_s0 + $0x4e] sm:$0x11 pattern:$0x75316420] }
0x1647   :  { %v2981_v63 = vsel %vm64_vm0, %v2979_v62, 0.0 }
0x1648   :  { %v2982_v1 = vrot.slane %v2981_v63, 4 }
0x164a   :  { %v2983_v2 = vadd.f32 %v2982_v1, %v2981_v63  ;;  %v3095_v63 = vrot.slane %v4858_v61, %v5181_v7  ;;  %v3088_v1 = vcombine.high %v4858_v61, %v4858_v61 }
0x164c   :  { %v2984_v3 = vrot.slane %v2983_v2, 2 }
0x164e   :  { %v2978_v4 = vpop.permute.xlu1 %2977  ;;  %v2985_v6 = vadd.f32 %v2984_v3, %v2983_v2 }
0x164f   :  { %v2980_v5 = vmul.f32 %v5598_v47, %v2978_v4 }
0x1650   :  { %v2986_v10 = vrot.slane %v2985_v6, 1 }
0x1651   :  { %v2988_v8 = vsel %vm64_vm0, %v2980_v5, 0.0  ;;  %v5803_v5 = vld [vmem:[%s6137_s2] sm:$0xff] }
0x1652   :  { %v2989_v9 = vrot.slane %v2988_v8, 4  ;;  %v2987_v15 = vadd.f32 %v2986_v10, %v2985_v6 }
0x1654   :  { %v2990_v13 = vadd.f32 %v2989_v9, %v2988_v8 }
0x1655   :  { %v2947_v11 = vpop.permute.xlu0 %2946 }
0x1656   :  { %v2991_v12 = vrot.slane %v2990_v13, 2  ;;  %v2952_v14 = vrot.slane %v2947_v11, %v5196_v20 }
0x1658   :  { %v2961_v16 = vmul.f32 %v5608_v0, %v2952_v14  ;;  %v2992_v17 = vadd.f32 %v2991_v12, %v2990_v13 }
0x165a   :  { %v2995_v18 = vadd.f32 %v2987_v15, %v2961_v16  ;;  %v2993_v19 = vrot.slane %v2992_v17, 1 }
0x165c   :  { %5051 = vtanh.f32 %v2995_v18  ;;  %v2994_v22 = vadd.f32 %v2993_v19, %v2992_v17 }
0x165f   :  { %v2955_v21 = vpop.permute.xlu1 %2954 }
0x1660   :  { %v2960_v23 = vrot.slane %v2955_v21, %v5196_v20 }
0x1662   :  { %v2962_v24 = vmul.f32 %v5608_v0, %v2960_v23 }
0x1664   :  { %v2996_v26 = vadd.f32 %v2994_v22, %v2962_v24  ;;  %v5813_v24 = vld [vmem:[%s6138_s1] sm:$0x1] }
0x1666   :  { %v5052_v27 = vpop.eup %5051  ;;  %5053 = vtanh.f32 %v2996_v26 }
0x1667   :  { %v3047_v29 = vrot.slane %v5052_v27, %v5196_v20 }
0x1669   :  { %3049 = vbcast.lane.b32.xlu0 %v3047_v29, 256 }
0x166d   :  { %3025 = vperm.xlu0 %4901, %v3016_v30  }
0x1670   :  { %v5054_v32 = vpop.eup %5053 }
0x1671   :  { %v3054_v33 = vrot.slane %v5054_v32, %v5196_v20 }
0x1673   :  { %3056 = vbcast.lane.b32.xlu1 %v3054_v33, 256 }
0x1677   :  { %3033 = vperm.xlu1 %4902, %v3023_v34  }
0x16db   :  { %v3050_v25 = vpop.permute.xlu0 %3049 }
0x16dc   :  { %v3058_v35 = vmul.f32 %v5598_v47, %v3050_v25 }
0x16de   :  { %v3060_v36 = vsel %vm64_vm0, %v3058_v35, 0.0  ;;  %v4860_v35 = vld.sshfl [vmem:[%s6136_s0 + $0x50] sm:$0x11 pattern:$0x75316420] }
0x16df   :  { %v3061_v37 = vrot.slane %v3060_v36, 4 }
0x16e1   :  { %v3062_v38 = vadd.f32 %v3061_v37, %v3060_v36  ;;  %v3174_v37 = vrot.slane %v4860_v35, %v5181_v7 }
0x16e3   :  { %v3063_v39 = vrot.slane %v3062_v38, 2 }
0x16e5   :  { %v3057_v40 = vpop.permute.xlu1 %3056  ;;  %v3064_v43 = vadd.f32 %v3063_v39, %v3062_v38  ;;  %v3167_v38 = vcombine.high %v4860_v35, %v4860_v35 }
0x16e6   :  { %v3059_v41 = vmul.f32 %v5598_v47, %v3057_v40 }
0x16e7   :  { %v3065_v42 = vrot.slane %v3064_v43, 1 }
0x16e8   :  { %v3067_v44 = vsel %vm64_vm0, %v3059_v41, 0.0  ;;  %v3181_v41 = vrot.slane %v3167_v38, %v5181_v7 }
0x16e9   :  { %v3068_v45 = vrot.slane %v3067_v44, 4  ;;  %v3066_v51 = vadd.f32 %v3065_v42, %v3064_v43 }
0x16eb   :  { %v3069_v46 = vadd.f32 %v3068_v45, %v3067_v44 }
0x16ec   :  { %v3026_v48 = vpop.permute.xlu0 %3025 }
0x16ed   :  { %v3070_v49 = vrot.slane %v3069_v46, 2  ;;  %v3031_v50 = vrot.slane %v3026_v48, %v5196_v20 }
0x16ef   :  { %v3040_v52 = vmul.f32 %v5608_v0, %v3031_v50  ;;  %v3071_v53 = vadd.f32 %v3070_v49, %v3069_v46 }
0x16f1   :  { %v3074_v54 = vadd.f32 %v3066_v51, %v3040_v52  ;;  %v3072_v55 = vrot.slane %v3071_v53, 1 }
0x16f3   :  { %5055 = vtanh.f32 %v3074_v54  ;;  %v3073_v57 = vadd.f32 %v3072_v55, %v3071_v53 }
0x16f6   :  { %v3034_v56 = vpop.permute.xlu1 %3033 }
0x16f7   :  { %v3039_v47 = vrot.slane %v3034_v56, %v5196_v20 }
0x16f9   :  { %v3041_v58 = vmul.f32 %v5608_v0, %v3039_v47  ;;  %v3102_v0 = vrot.slane %v3088_v1, %v5181_v7 }
0x16fb   :  { %v3075_v59 = vadd.f32 %v3073_v57, %v3041_v58 }
0x16fd   :  { %v5056_v60 = vpop.eup %5055  ;;  %5057 = vtanh.f32 %v3075_v59 }
0x16fe   :  { %v3126_v62 = vrot.slane %v5056_v60, %v5196_v20 }
0x1700   :  { %3128 = vbcast.lane.b32.xlu0 %v3126_v62, 256 }
0x1704   :  { %3104 = vperm.xlu0 %4901, %v3095_v63  }
0x1707   :  { %v5058_v2 = vpop.eup %5057 }
0x1708   :  { %v3133_v3 = vrot.slane %v5058_v2, %v5196_v20 }
0x170a   :  { %3135 = vbcast.lane.b32.xlu1 %v3133_v3, 256 }
0x170e   :  { %3112 = vperm.xlu1 %4902, %v3102_v0  }
0x1772   :  { %v3129_v4 = vpop.permute.xlu0 %3128 }
0x1773   :  { %v3137_v6 = vmul.f32 %v5803_v5, %v3129_v4 }
0x1775   :  { %v3139_v8 = vsel %vm64_vm0, %v3137_v6, 0.0  ;;  %v4862_v6 = vld.sshfl [vmem:[%s6136_s0 + $0x52] sm:$0x11 pattern:$0x75316420] }
0x1776   :  { %v3140_v9 = vrot.slane %v3139_v8, 4 }
0x1778   :  { %v3141_v10 = vadd.f32 %v3140_v9, %v3139_v8  ;;  %v3253_v9 = vrot.slane %v4862_v6, %v5181_v7 }
0x177a   :  { %v3142_v13 = vrot.slane %v3141_v10, 2 }
0x177c   :  { %v3136_v11 = vpop.permute.xlu1 %3135  ;;  %v3143_v14 = vadd.f32 %v3142_v13, %v3141_v10  ;;  %v3246_v10 = vcombine.high %v4862_v6, %v4862_v6 }
0x177d   :  { %v3138_v12 = vmul.f32 %v5803_v5, %v3136_v11 }
0x177e   :  { %v3144_v17 = vrot.slane %v3143_v14, 1 }
0x177f   :  { %v3146_v15 = vsel %vm64_vm0, %v3138_v12, 0.0  ;;  %v3260_v12 = vrot.slane %v3246_v10, %v5181_v7 }
0x1780   :  { %v3147_v16 = vrot.slane %v3146_v15, 4  ;;  %v3145_v22 = vadd.f32 %v3144_v17, %v3143_v14 }
0x1782   :  { %v3148_v18 = vadd.f32 %v3147_v16, %v3146_v15 }
0x1783   :  { %v3105_v19 = vpop.permute.xlu0 %3104 }
0x1784   :  { %v3149_v21 = vrot.slane %v3148_v18, 2  ;;  %v3110_v23 = vrot.slane %v3105_v19, %v5196_v20 }
0x1786   :  { %v3119_v26 = vmul.f32 %v5813_v24, %v3110_v23  ;;  %v3150_v27 = vadd.f32 %v3149_v21, %v3148_v18 }
0x1788   :  { %v3153_v28 = vadd.f32 %v3145_v22, %v3119_v26  ;;  %v3151_v29 = vrot.slane %v3150_v27, 1 }
0x178a   :  { %5059 = vtanh.f32 %v3153_v28  ;;  %v3152_v32 = vadd.f32 %v3151_v29, %v3150_v27 }
0x178d   :  { %v3113_v30 = vpop.permute.xlu1 %3112 }
0x178e   :  { %v3118_v31 = vrot.slane %v3113_v30, %v5196_v20 }
0x1790   :  { %v3120_v33 = vmul.f32 %v5813_v24, %v3118_v31 }
0x1792   :  { %v3154_v34 = vadd.f32 %v3152_v32, %v3120_v33 }
0x1794   :  { %v5060_v25 = vpop.eup %5059  ;;  %5061 = vtanh.f32 %v3154_v34 }
0x1795   :  { %v3205_v36 = vrot.slane %v5060_v25, %v5196_v20 }
0x1797   :  { %3207 = vbcast.lane.b32.xlu0 %v3205_v36, 256 }
0x179b   :  { %3183 = vperm.xlu0 %4901, %v3174_v37  }
0x179e   :  { %v5062_v39 = vpop.eup %5061 }
0x179f   :  { %v3212_v40 = vrot.slane %v5062_v39, %v5196_v20 }
0x17a1   :  { %3214 = vbcast.lane.b32.xlu1 %v3212_v40, 256 }
0x17a5   :  { %3191 = vperm.xlu1 %4902, %v3181_v41  }
0x1809   :  { %v3208_v43 = vpop.permute.xlu0 %3207 }
0x180a   :  { %v3216_v44 = vmul.f32 %v5803_v5, %v3208_v43 }
0x180c   :  { %v3218_v45 = vsel %vm64_vm0, %v3216_v44, 0.0  ;;  %v4864_v44 = vld.sshfl [vmem:[%s6136_s0 + $0x54] sm:$0x11 pattern:$0x75316420] }
0x180d   :  { %v3219_v42 = vrot.slane %v3218_v45, 4 }
0x180f   :  { %v3220_v46 = vadd.f32 %v3219_v42, %v3218_v45  ;;  %v3332_v42 = vrot.slane %v4864_v44, %v5181_v7 }
0x1811   :  { %v3221_v48 = vrot.slane %v3220_v46, 2 }
0x1813   :  { %v3215_v49 = vpop.permute.xlu1 %3214  ;;  %v3222_v51 = vadd.f32 %v3221_v48, %v3220_v46  ;;  %v3325_v46 = vcombine.high %v4864_v44, %v4864_v44 }
0x1814   :  { %v3217_v50 = vmul.f32 %v5803_v5, %v3215_v49 }
0x1815   :  { %v3223_v54 = vrot.slane %v3222_v51, 1 }
0x1816   :  { %v3225_v52 = vsel %vm64_vm0, %v3217_v50, 0.0  ;;  %v3339_v50 = vrot.slane %v3325_v46, %v5181_v7 }
0x1817   :  { %v3226_v53 = vrot.slane %v3225_v52, 4  ;;  %v3224_v58 = vadd.f32 %v3223_v54, %v3222_v51 }
0x1819   :  { %v3227_v55 = vadd.f32 %v3226_v53, %v3225_v52 }
0x181a   :  { %v3184_v56 = vpop.permute.xlu0 %3183 }
0x181b   :  { %v3228_v47 = vrot.slane %v3227_v55, 2  ;;  %v3189_v57 = vrot.slane %v3184_v56, %v5196_v20 }
0x181d   :  { %v3198_v59 = vmul.f32 %v5813_v24, %v3189_v57  ;;  %v3229_v60 = vadd.f32 %v3228_v47, %v3227_v55 }
0x181f   :  { %v3232_v61 = vadd.f32 %v3224_v58, %v3198_v59  ;;  %v3230_v62 = vrot.slane %v3229_v60, 1 }
0x1821   :  { %5063 = vtanh.f32 %v3232_v61  ;;  %v3231_v2 = vadd.f32 %v3230_v62, %v3229_v60 }
0x1824   :  { %v3192_v63 = vpop.permute.xlu1 %3191 }
0x1825   :  { %v3197_v1 = vrot.slane %v3192_v63, %v5196_v20 }
0x1827   :  { %v3199_v3 = vmul.f32 %v5813_v24, %v3197_v1 }
0x1829   :  { %v3233_v0 = vadd.f32 %v3231_v2, %v3199_v3 }
0x182b   :  { %v5064_v4 = vpop.eup %5063  ;;  %5065 = vtanh.f32 %v3233_v0 }
0x182c   :  { %v3284_v8 = vrot.slane %v5064_v4, %v5196_v20 }
0x182e   :  { %3286 = vbcast.lane.b32.xlu0 %v3284_v8, 256 }
0x1832   :  { %3262 = vperm.xlu0 %4901, %v3253_v9  }
0x1835   :  { %v5066_v13 = vpop.eup %5065 }
0x1836   :  { %v3291_v11 = vrot.slane %v5066_v13, %v5196_v20 }
0x1838   :  { %3293 = vbcast.lane.b32.xlu1 %v3291_v11, 256 }
0x183c   :  { %3270 = vperm.xlu1 %4902, %v3260_v12  }
0x18a0   :  { %v3287_v14 = vpop.permute.xlu0 %3286 }
0x18a1   :  { %v3295_v15 = vmul.f32 %v5803_v5, %v3287_v14 }
0x18a3   :  { %v3297_v16 = vsel %vm64_vm0, %v3295_v15, 0.0  ;;  %v4866_v15 = vld.sshfl [vmem:[%s6136_s0 + $0x56] sm:$0x11 pattern:$0x75316420] }
0x18a4   :  { %v3298_v17 = vrot.slane %v3297_v16, 4 }
0x18a6   :  { %v3299_v18 = vadd.f32 %v3298_v17, %v3297_v16  ;;  %v3411_v17 = vrot.slane %v4866_v15, %v5181_v7 }
0x18a8   :  { %v3300_v19 = vrot.slane %v3299_v18, 2 }
0x18aa   :  { %v3294_v21 = vpop.permute.xlu1 %3293  ;;  %v3301_v22 = vadd.f32 %v3300_v19, %v3299_v18  ;;  %v3404_v18 = vcombine.high %v4866_v15, %v4866_v15 }
0x18ab   :  { %v3296_v23 = vmul.f32 %v5803_v5, %v3294_v21 }
0x18ac   :  { %v3302_v28 = vrot.slane %v3301_v22, 1 }
0x18ad   :  { %v3304_v26 = vsel %vm64_vm0, %v3296_v23, 0.0  ;;  %v3418_v23 = vrot.slane %v3404_v18, %v5181_v7 }
0x18ae   :  { %v3305_v27 = vrot.slane %v3304_v26, 4  ;;  %v3303_v33 = vadd.f32 %v3302_v28, %v3301_v22 }
0x18b0   :  { %v3306_v29 = vadd.f32 %v3305_v27, %v3304_v26 }
0x18b1   :  { %v3263_v30 = vpop.permute.xlu0 %3262 }
0x18b2   :  { %v3307_v31 = vrot.slane %v3306_v29, 2  ;;  %v3268_v32 = vrot.slane %v3263_v30, %v5196_v20 }
0x18b4   :  { %v3277_v34 = vmul.f32 %v5813_v24, %v3268_v32  ;;  %v3308_v25 = vadd.f32 %v3307_v31, %v3306_v29 }
0x18b6   :  { %v3311_v35 = vadd.f32 %v3303_v33, %v3277_v34  ;;  %v3309_v36 = vrot.slane %v3308_v25, 1 }
0x18b8   :  { %5067 = vtanh.f32 %v3311_v35  ;;  %v3310_v39 = vadd.f32 %v3309_v36, %v3308_v25 }
0x18bb   :  { %v3271_v37 = vpop.permute.xlu1 %3270 }
0x18bc   :  { %v3276_v38 = vrot.slane %v3271_v37, %v5196_v20 }
0x18be   :  { %v3278_v40 = vmul.f32 %v5813_v24, %v3276_v38 }
0x18c0   :  { %v3312_v41 = vadd.f32 %v3310_v39, %v3278_v40 }
0x18c2   :  { %v5068_v43 = vpop.eup %5067  ;;  %5069 = vtanh.f32 %v3312_v41 }
0x18c3   :  { %v3363_v45 = vrot.slane %v5068_v43, %v5196_v20 }
0x18c5   :  { %3365 = vbcast.lane.b32.xlu0 %v3363_v45, 256 }
0x18c9   :  { %3341 = vperm.xlu0 %4901, %v3332_v42  }
0x18cc   :  { %v5070_v48 = vpop.eup %5069 }
0x18cd   :  { %v3370_v49 = vrot.slane %v5070_v48, %v5196_v20 }
0x18cf   :  { %3372 = vbcast.lane.b32.xlu1 %v3370_v49, 256 }
0x18d3   :  { %3349 = vperm.xlu1 %4902, %v3339_v50  }
0x1937   :  { %v3366_v51 = vpop.permute.xlu0 %3365 }
0x1938   :  { %v3374_v52 = vmul.f32 %v5803_v5, %v3366_v51 }
0x193a   :  { %v3376_v53 = vsel %vm64_vm0, %v3374_v52, 0.0  ;;  %v4868_v52 = vld.sshfl [vmem:[%s6136_s0 + $0x58] sm:$0x11 pattern:$0x75316420] }
0x193b   :  { %v3377_v54 = vrot.slane %v3376_v53, 4 }
0x193d   :  { %v3378_v55 = vadd.f32 %v3377_v54, %v3376_v53  ;;  %v3490_v54 = vrot.slane %v4868_v52, %v5181_v7 }
0x193f   :  { %v3379_v56 = vrot.slane %v3378_v55, 2 }
0x1941   :  { %v3373_v47 = vpop.permute.xlu1 %3372  ;;  %v3380_v58 = vadd.f32 %v3379_v56, %v3378_v55  ;;  %v3483_v55 = vcombine.high %v4868_v52, %v4868_v52 }
0x1942   :  { %v3375_v57 = vmul.f32 %v5803_v5, %v3373_v47 }
0x1943   :  { %v3381_v61 = vrot.slane %v3380_v58, 1 }
0x1944   :  { %v3383_v59 = vsel %vm64_vm0, %v3375_v57, 0.0  ;;  %v3497_v57 = vrot.slane %v3483_v55, %v5181_v7 }
0x1945   :  { %v3384_v60 = vrot.slane %v3383_v59, 4  ;;  %v3382_v3 = vadd.f32 %v3381_v61, %v3380_v58 }
0x1947   :  { %v3385_v62 = vadd.f32 %v3384_v60, %v3383_v59 }
0x1948   :  { %v3342_v63 = vpop.permute.xlu0 %3341 }
0x1949   :  { %v3386_v1 = vrot.slane %v3385_v62, 2  ;;  %v3347_v2 = vrot.slane %v3342_v63, %v5196_v20 }
0x194b   :  { %v3356_v0 = vmul.f32 %v5813_v24, %v3347_v2  ;;  %v3387_v4 = vadd.f32 %v3386_v1, %v3385_v62 }
0x194d   :  { %v3390_v6 = vadd.f32 %v3382_v3, %v3356_v0  ;;  %v3388_v8 = vrot.slane %v3387_v4, 1 }
0x194f   :  { %5071 = vtanh.f32 %v3390_v6  ;;  %v3389_v13 = vadd.f32 %v3388_v8, %v3387_v4 }
0x1952   :  { %v3350_v9 = vpop.permute.xlu1 %3349 }
0x1953   :  { %v3355_v10 = vrot.slane %v3350_v9, %v5196_v20 }
0x1955   :  { %v3357_v11 = vmul.f32 %v5813_v24, %v3355_v10 }
0x1957   :  { %v3391_v12 = vadd.f32 %v3389_v13, %v3357_v11 }
0x1959   :  { %v5072_v14 = vpop.eup %5071  ;;  %5073 = vtanh.f32 %v3391_v12 }
0x195a   :  { %v3442_v16 = vrot.slane %v5072_v14, %v5196_v20 }
0x195c   :  { %3444 = vbcast.lane.b32.xlu0 %v3442_v16, 256 }
0x1960   :  { %3420 = vperm.xlu0 %4901, %v3411_v17  }
0x1963   :  { %v5074_v19 = vpop.eup %5073 }
0x1964   :  { %v3449_v21 = vrot.slane %v5074_v19, %v5196_v20 }
0x1966   :  { %3451 = vbcast.lane.b32.xlu1 %v3449_v21, 256 }
0x196a   :  { %3428 = vperm.xlu1 %4902, %v3418_v23  }
0x19ce   :  { %v3445_v22 = vpop.permute.xlu0 %3444 }
0x19cf   :  { %v3453_v26 = vmul.f32 %v5803_v5, %v3445_v22 }
0x19d1   :  { %v3455_v27 = vsel %vm64_vm0, %v3453_v26, 0.0  ;;  %v4870_v26 = vld.sshfl [vmem:[%s6136_s0 + $0x5a] sm:$0x11 pattern:$0x75316420] }
0x19d2   :  { %v3456_v28 = vrot.slane %v3455_v27, 4 }
0x19d4   :  { %v3457_v29 = vadd.f32 %v3456_v28, %v3455_v27  ;;  %v3569_v28 = vrot.slane %v4870_v26, %v5181_v7 }
0x19d6   :  { %v3458_v30 = vrot.slane %v3457_v29, 2 }
0x19d8   :  { %v3452_v31 = vpop.permute.xlu1 %3451  ;;  %v3459_v33 = vadd.f32 %v3458_v30, %v3457_v29  ;;  %v3562_v29 = vcombine.high %v4870_v26, %v4870_v26 }
0x19d9   :  { %v3454_v32 = vmul.f32 %v5803_v5, %v3452_v31 }
0x19da   :  { %v3460_v35 = vrot.slane %v3459_v33, 1 }
0x19db   :  { %v3462_v34 = vsel %vm64_vm0, %v3454_v32, 0.0  ;;  %v3576_v32 = vrot.slane %v3562_v29, %v5181_v7 }
0x19dc   :  { %v3463_v25 = vrot.slane %v3462_v34, 4  ;;  %v3461_v40 = vadd.f32 %v3460_v35, %v3459_v33 }
0x19de   :  { %v3464_v36 = vadd.f32 %v3463_v25, %v3462_v34 }
0x19df   :  { %v3421_v37 = vpop.permute.xlu0 %3420 }
0x19e0   :  { %v3465_v38 = vrot.slane %v3464_v36, 2  ;;  %v3426_v39 = vrot.slane %v3421_v37, %v5196_v20 }
0x19e2   :  { %v3435_v41 = vmul.f32 %v5813_v24, %v3426_v39  ;;  %v3466_v43 = vadd.f32 %v3465_v38, %v3464_v36 }
0x19e4   :  { %v3469_v44 = vadd.f32 %v3461_v40, %v3435_v41  ;;  %v3467_v45 = vrot.slane %v3466_v43, 1 }
0x19e6   :  { %5075 = vtanh.f32 %v3469_v44  ;;  %v3468_v48 = vadd.f32 %v3467_v45, %v3466_v43 }
0x19e9   :  { %v3429_v42 = vpop.permute.xlu1 %3428 }
0x19ea   :  { %v3434_v46 = vrot.slane %v3429_v42, %v5196_v20 }
0x19ec   :  { %v3436_v49 = vmul.f32 %v5813_v24, %v3434_v46 }
0x19ee   :  { %v3470_v50 = vadd.f32 %v3468_v48, %v3436_v49 }
0x19f0   :  { %v5076_v51 = vpop.eup %5075  ;;  %5077 = vtanh.f32 %v3470_v50 }
0x19f1   :  { %v3521_v53 = vrot.slane %v5076_v51, %v5196_v20 }
0x19f3   :  { %3523 = vbcast.lane.b32.xlu0 %v3521_v53, 256 }
0x19f7   :  { %3499 = vperm.xlu0 %4901, %v3490_v54  }
0x19fa   :  { %v5078_v56 = vpop.eup %5077 }
0x19fb   :  { %v3528_v47 = vrot.slane %v5078_v56, %v5196_v20 }
0x19fd   :  { %3530 = vbcast.lane.b32.xlu1 %v3528_v47, 256 }
0x1a01   :  { %3507 = vperm.xlu1 %4902, %v3497_v57  }
0x1a65   :  { %v3524_v58 = vpop.permute.xlu0 %3523 }
0x1a66   :  { %v3532_v59 = vmul.f32 %v5803_v5, %v3524_v58 }
0x1a68   :  { %v3534_v60 = vsel %vm64_vm0, %v3532_v59, 0.0  ;;  %v4872_v59 = vld.sshfl [vmem:[%s6136_s0 + $0x5c] sm:$0x11 pattern:$0x75316420] }
0x1a69   :  { %v3535_v61 = vrot.slane %v3534_v60, 4 }
0x1a6b   :  { %v3536_v62 = vadd.f32 %v3535_v61, %v3534_v60  ;;  %v3648_v61 = vrot.slane %v4872_v59, %v5181_v7 }
0x1a6d   :  { %v3537_v63 = vrot.slane %v3536_v62, 2 }
0x1a6f   :  { %v3531_v1 = vpop.permute.xlu1 %3530  ;;  %v3538_v3 = vadd.f32 %v3537_v63, %v3536_v62  ;;  %v3641_v62 = vcombine.high %v4872_v59, %v4872_v59 }
0x1a70   :  { %v3533_v2 = vmul.f32 %v5803_v5, %v3531_v1 }
0x1a71   :  { %v3539_v6 = vrot.slane %v3538_v3, 1 }
0x1a72   :  { %v3541_v0 = vsel %vm64_vm0, %v3533_v2, 0.0  ;;  %v3655_v2 = vrot.slane %v3641_v62, %v5181_v7 }
0x1a73   :  { %v3542_v4 = vrot.slane %v3541_v0, 4  ;;  %v3540_v11 = vadd.f32 %v3539_v6, %v3538_v3 }
0x1a75   :  { %v3543_v8 = vadd.f32 %v3542_v4, %v3541_v0 }
0x1a76   :  { %v3500_v9 = vpop.permute.xlu0 %3499 }
0x1a77   :  { %v3544_v10 = vrot.slane %v3543_v8, 2  ;;  %v3505_v13 = vrot.slane %v3500_v9, %v5196_v20 }
0x1a79   :  { %v3514_v12 = vmul.f32 %v5813_v24, %v3505_v13  ;;  %v3545_v14 = vadd.f32 %v3544_v10, %v3543_v8 }
0x1a7b   :  { %v3548_v15 = vadd.f32 %v3540_v11, %v3514_v12  ;;  %v3546_v16 = vrot.slane %v3545_v14, 1 }
0x1a7d   :  { %5079 = vtanh.f32 %v3548_v15  ;;  %v3547_v19 = vadd.f32 %v3546_v16, %v3545_v14 }
0x1a80   :  { %v3508_v17 = vpop.permute.xlu1 %3507 }
0x1a81   :  { %v3513_v18 = vrot.slane %v3508_v17, %v5196_v20 }
0x1a83   :  { %v3515_v21 = vmul.f32 %v5813_v24, %v3513_v18 }
0x1a85   :  { %v3549_v23 = vadd.f32 %v3547_v19, %v3515_v21 }
0x1a87   :  { %v5080_v22 = vpop.eup %5079  ;;  %5081 = vtanh.f32 %v3549_v23 }
0x1a88   :  { %v3600_v27 = vrot.slane %v5080_v22, %v5196_v20 }
0x1a8a   :  { %3602 = vbcast.lane.b32.xlu0 %v3600_v27, 256 }
0x1a8e   :  { %3578 = vperm.xlu0 %4901, %v3569_v28  }
0x1a91   :  { %v5082_v30 = vpop.eup %5081 }
0x1a92   :  { %v3607_v31 = vrot.slane %v5082_v30, %v5196_v20 }
0x1a94   :  { %3609 = vbcast.lane.b32.xlu1 %v3607_v31, 256 }
0x1a98   :  { %3586 = vperm.xlu1 %4902, %v3576_v32  }
0x1afc   :  { %v3603_v33 = vpop.permute.xlu0 %3602 }
0x1afd   :  { %v3611_v34 = vmul.f32 %v5803_v5, %v3603_v33 }
0x1aff   :  { %v3613_v25 = vsel %vm64_vm0, %v3611_v34, 0.0  ;;  %v4874_v34 = vld.sshfl [vmem:[%s6136_s0 + $0x5e] sm:$0x11 pattern:$0x75316420] }
0x1b00   :  { %v3614_v35 = vrot.slane %v3613_v25, 4 }
0x1b02   :  { %v3615_v36 = vadd.f32 %v3614_v35, %v3613_v25  ;;  %v3727_v35 = vrot.slane %v4874_v34, %v5181_v7 }
0x1b04   :  { %v3616_v37 = vrot.slane %v3615_v36, 2 }
0x1b06   :  { %v3610_v38 = vpop.permute.xlu1 %3609  ;;  %v3617_v40 = vadd.f32 %v3616_v37, %v3615_v36  ;;  %v3720_v36 = vcombine.high %v4874_v34, %v4874_v34 }
0x1b07   :  { %v3612_v39 = vmul.f32 %v5803_v5, %v3610_v38 }
0x1b08   :  { %v3618_v44 = vrot.slane %v3617_v40, 1 }
0x1b09   :  { %v3620_v41 = vsel %vm64_vm0, %v3612_v39, 0.0  ;;  %v3734_v39 = vrot.slane %v3720_v36, %v5181_v7 }
0x1b0a   :  { %v3621_v43 = vrot.slane %v3620_v41, 4  ;;  %v3619_v49 = vadd.f32 %v3618_v44, %v3617_v40 }
0x1b0c   :  { %v3622_v45 = vadd.f32 %v3621_v43, %v3620_v41 }
0x1b0d   :  { %v3579_v42 = vpop.permute.xlu0 %3578 }
0x1b0e   :  { %v3623_v46 = vrot.slane %v3622_v45, 2  ;;  %v3584_v48 = vrot.slane %v3579_v42, %v5196_v20 }
0x1b10   :  { %v3593_v50 = vmul.f32 %v5813_v24, %v3584_v48  ;;  %v3624_v51 = vadd.f32 %v3623_v46, %v3622_v45 }
0x1b12   :  { %v3627_v52 = vadd.f32 %v3619_v49, %v3593_v50  ;;  %v3625_v53 = vrot.slane %v3624_v51, 1 }
0x1b14   :  { %5083 = vtanh.f32 %v3627_v52  ;;  %v3626_v56 = vadd.f32 %v3625_v53, %v3624_v51 }
0x1b17   :  { %v3587_v54 = vpop.permute.xlu1 %3586 }
0x1b18   :  { %v3592_v55 = vrot.slane %v3587_v54, %v5196_v20 }
0x1b1a   :  { %v3594_v47 = vmul.f32 %v5813_v24, %v3592_v55 }
0x1b1c   :  { %v3628_v57 = vadd.f32 %v3626_v56, %v3594_v47 }
0x1b1e   :  { %v5084_v58 = vpop.eup %5083  ;;  %5085 = vtanh.f32 %v3628_v57 }
0x1b1f   :  { %v3679_v60 = vrot.slane %v5084_v58, %v5196_v20 }
0x1b21   :  { %3681 = vbcast.lane.b32.xlu0 %v3679_v60, 256 }
0x1b25   :  { %3657 = vperm.xlu0 %4901, %v3648_v61  }
0x1b28   :  { %v5086_v63 = vpop.eup %5085 }
0x1b29   :  { %v3686_v1 = vrot.slane %v5086_v63, %v5196_v20 }
0x1b2b   :  { %3688 = vbcast.lane.b32.xlu1 %v3686_v1, 256 }
0x1b2f   :  { %3665 = vperm.xlu1 %4902, %v3655_v2  }
0x1b93   :  { %v3682_v3 = vpop.permute.xlu0 %3681 }
0x1b94   :  { %v3690_v0 = vmul.f32 %v5803_v5, %v3682_v3 }
0x1b96   :  { %v3692_v4 = vsel %vm64_vm0, %v3690_v0, 0.0  ;;  %v4876_v0 = vld.sshfl [vmem:[%s6136_s0 + $0x60] sm:$0x11 pattern:$0x75316420] }
0x1b97   :  { %v3693_v6 = vrot.slane %v3692_v4, 4 }
0x1b99   :  { %v3694_v8 = vadd.f32 %v3693_v6, %v3692_v4  ;;  %v3806_v6 = vrot.slane %v4876_v0, %v5181_v7 }
0x1b9b   :  { %v3695_v9 = vrot.slane %v3694_v8, 2 }
0x1b9d   :  { %v3689_v10 = vpop.permute.xlu1 %3688  ;;  %v3696_v11 = vadd.f32 %v3695_v9, %v3694_v8  ;;  %v3799_v8 = vcombine.high %v4876_v0, %v4876_v0 }
0x1b9e   :  { %v3691_v13 = vmul.f32 %v5803_v5, %v3689_v10 }
0x1b9f   :  { %v3697_v15 = vrot.slane %v3696_v11, 1 }
0x1ba0   :  { %v3699_v12 = vsel %vm64_vm0, %v3691_v13, 0.0  ;;  %v3813_v13 = vrot.slane %v3799_v8, %v5181_v7 }
0x1ba1   :  { %v3700_v14 = vrot.slane %v3699_v12, 4  ;;  %v3698_v21 = vadd.f32 %v3697_v15, %v3696_v11 }
0x1ba3   :  { %v3701_v16 = vadd.f32 %v3700_v14, %v3699_v12 }
0x1ba4   :  { %v3658_v17 = vpop.permute.xlu0 %3657 }
0x1ba5   :  { %v3702_v18 = vrot.slane %v3701_v16, 2  ;;  %v3663_v19 = vrot.slane %v3658_v17, %v5196_v20 }
0x1ba7   :  { %v3672_v23 = vmul.f32 %v5813_v24, %v3663_v19  ;;  %v3703_v22 = vadd.f32 %v3702_v18, %v3701_v16 }
0x1ba9   :  { %v3706_v26 = vadd.f32 %v3698_v21, %v3672_v23  ;;  %v3704_v27 = vrot.slane %v3703_v22, 1 }
0x1bab   :  { %5087 = vtanh.f32 %v3706_v26  ;;  %v3705_v30 = vadd.f32 %v3704_v27, %v3703_v22 }
0x1bae   :  { %v3666_v28 = vpop.permute.xlu1 %3665 }
0x1baf   :  { %v3671_v29 = vrot.slane %v3666_v28, %v5196_v20 }
0x1bb1   :  { %v3673_v31 = vmul.f32 %v5813_v24, %v3671_v29 }
0x1bb3   :  { %v3707_v32 = vadd.f32 %v3705_v30, %v3673_v31 }
0x1bb5   :  { %v5088_v33 = vpop.eup %5087  ;;  %5089 = vtanh.f32 %v3707_v32 }
0x1bb6   :  { %v3758_v25 = vrot.slane %v5088_v33, %v5196_v20 }
0x1bb8   :  { %3760 = vbcast.lane.b32.xlu0 %v3758_v25, 256 }
0x1bbc   :  { %3736 = vperm.xlu0 %4901, %v3727_v35  }
0x1bbf   :  { %v5090_v37 = vpop.eup %5089 }
0x1bc0   :  { %v3765_v38 = vrot.slane %v5090_v37, %v5196_v20 }
0x1bc2   :  { %3767 = vbcast.lane.b32.xlu1 %v3765_v38, 256 }
0x1bc6   :  { %3744 = vperm.xlu1 %4902, %v3734_v39  }
0x1c2a   :  { %v3761_v40 = vpop.permute.xlu0 %3760 }
0x1c2b   :  { %v3769_v41 = vmul.f32 %v5803_v5, %v3761_v40 }
0x1c2d   :  { %v3771_v43 = vsel %vm64_vm0, %v3769_v41, 0.0  ;;  %v4878_v41 = vld.sshfl [vmem:[%s6136_s0 + $0x62] sm:$0x11 pattern:$0x75316420] }
0x1c2e   :  { %v3772_v44 = vrot.slane %v3771_v43, 4 }
0x1c30   :  { %v3773_v45 = vadd.f32 %v3772_v44, %v3771_v43  ;;  %v3885_v44 = vrot.slane %v4878_v41, %v5181_v7 }
0x1c32   :  { %v3774_v42 = vrot.slane %v3773_v45, 2 }
0x1c34   :  { %v3768_v46 = vpop.permute.xlu1 %3767  ;;  %v3775_v49 = vadd.f32 %v3774_v42, %v3773_v45  ;;  %v3878_v45 = vcombine.high %v4878_v41, %v4878_v41 }
0x1c35   :  { %v3770_v48 = vmul.f32 %v5803_v5, %v3768_v46 }
0x1c36   :  { %v3776_v52 = vrot.slane %v3775_v49, 1 }
0x1c37   :  { %v3778_v50 = vsel %vm64_vm0, %v3770_v48, 0.0  ;;  %v3892_v48 = vrot.slane %v3878_v45, %v5181_v7 }
0x1c38   :  { %v3779_v51 = vrot.slane %v3778_v50, 4  ;;  %v3777_v47 = vadd.f32 %v3776_v52, %v3775_v49 }
0x1c3a   :  { %v3780_v53 = vadd.f32 %v3779_v51, %v3778_v50 }
0x1c3b   :  { %v3737_v54 = vpop.permute.xlu0 %3736 }
0x1c3c   :  { %v3781_v55 = vrot.slane %v3780_v53, 2  ;;  %v3742_v56 = vrot.slane %v3737_v54, %v5196_v20 }
0x1c3e   :  { %v3751_v57 = vmul.f32 %v5813_v24, %v3742_v56  ;;  %v3782_v58 = vadd.f32 %v3781_v55, %v3780_v53 }
0x1c40   :  { %v3785_v59 = vadd.f32 %v3777_v47, %v3751_v57  ;;  %v3783_v60 = vrot.slane %v3782_v58, 1 }
0x1c42   :  { %5091 = vtanh.f32 %v3785_v59  ;;  %v3784_v63 = vadd.f32 %v3783_v60, %v3782_v58 }
0x1c45   :  { %v3745_v61 = vpop.permute.xlu1 %3744 }
0x1c46   :  { %v3750_v62 = vrot.slane %v3745_v61, %v5196_v20 }
0x1c48   :  { %v3752_v1 = vmul.f32 %v5813_v24, %v3750_v62 }
0x1c4a   :  { %v3786_v2 = vadd.f32 %v3784_v63, %v3752_v1 }
0x1c4c   :  { %v5092_v3 = vpop.eup %5091  ;;  %5093 = vtanh.f32 %v3786_v2 }
0x1c4d   :  { %v3837_v4 = vrot.slane %v5092_v3, %v5196_v20 }
0x1c4f   :  { %3839 = vbcast.lane.b32.xlu0 %v3837_v4, 256 }
0x1c53   :  { %3815 = vperm.xlu0 %4901, %v3806_v6  }
0x1c56   :  { %v5094_v9 = vpop.eup %5093 }
0x1c57   :  { %v3844_v10 = vrot.slane %v5094_v9, %v5196_v20 }
0x1c59   :  { %3846 = vbcast.lane.b32.xlu1 %v3844_v10, 256 }
0x1c5d   :  { %3823 = vperm.xlu1 %4902, %v3813_v13  }
0x1cc1   :  { %v3840_v11 = vpop.permute.xlu0 %3839 }
0x1cc2   :  { %v3848_v12 = vmul.f32 %v5803_v5, %v3840_v11 }
0x1cc4   :  { %v3850_v14 = vsel %vm64_vm0, %v3848_v12, 0.0  ;;  %v4880_v12 = vld.sshfl [vmem:[%s6136_s0 + $0x64] sm:$0x11 pattern:$0x75316420] }
0x1cc5   :  { %v3851_v15 = vrot.slane %v3850_v14, 4 }
0x1cc7   :  { %v3852_v16 = vadd.f32 %v3851_v15, %v3850_v14  ;;  %v3964_v15 = vrot.slane %v4880_v12, %v5181_v7 }
0x1cc9   :  { %v3853_v17 = vrot.slane %v3852_v16, 2 }
0x1ccb   :  { %v3847_v18 = vpop.permute.xlu1 %3846  ;;  %v3854_v21 = vadd.f32 %v3853_v17, %v3852_v16  ;;  %v3957_v16 = vcombine.high %v4880_v12, %v4880_v12 }
0x1ccc   :  { %v3849_v19 = vmul.f32 %v5803_v5, %v3847_v18 }
0x1ccd   :  { %v3855_v26 = vrot.slane %v3854_v21, 1 }
0x1cce   :  { %v3857_v23 = vsel %vm64_vm0, %v3849_v19, 0.0  ;;  %v3971_v19 = vrot.slane %v3957_v16, %v5181_v7 }
0x1ccf   :  { %v3858_v22 = vrot.slane %v3857_v23, 4  ;;  %v3856_v31 = vadd.f32 %v3855_v26, %v3854_v21 }
0x1cd1   :  { %v3859_v27 = vadd.f32 %v3858_v22, %v3857_v23 }
0x1cd2   :  { %v3816_v28 = vpop.permute.xlu0 %3815 }
0x1cd3   :  { %v3860_v29 = vrot.slane %v3859_v27, 2  ;;  %v3821_v30 = vrot.slane %v3816_v28, %v5196_v20 }
0x1cd5   :  { %v3830_v32 = vmul.f32 %v5813_v24, %v3821_v30  ;;  %v3861_v33 = vadd.f32 %v3860_v29, %v3859_v27 }
0x1cd7   :  { %v3864_v34 = vadd.f32 %v3856_v31, %v3830_v32  ;;  %v3862_v25 = vrot.slane %v3861_v33, 1 }
0x1cd9   :  { %5095 = vtanh.f32 %v3864_v34  ;;  %v3863_v37 = vadd.f32 %v3862_v25, %v3861_v33 }
0x1cdc   :  { %v3824_v35 = vpop.permute.xlu1 %3823 }
0x1cdd   :  { %v3829_v36 = vrot.slane %v3824_v35, %v5196_v20 }
0x1cdf   :  { %v3831_v38 = vmul.f32 %v5813_v24, %v3829_v36 }
0x1ce1   :  { %v3865_v39 = vadd.f32 %v3863_v37, %v3831_v38 }
0x1ce3   :  { %v5096_v40 = vpop.eup %5095  ;;  %5097 = vtanh.f32 %v3865_v39 }
0x1ce4   :  { %v3916_v43 = vrot.slane %v5096_v40, %v5196_v20 }
0x1ce6   :  { %3918 = vbcast.lane.b32.xlu0 %v3916_v43, 256 }
0x1cea   :  { %3894 = vperm.xlu0 %4901, %v3885_v44  }
0x1ced   :  { %v5098_v42 = vpop.eup %5097 }
0x1cee   :  { %v3923_v46 = vrot.slane %v5098_v42, %v5196_v20 }
0x1cf0   :  { %3925 = vbcast.lane.b32.xlu1 %v3923_v46, 256 }
0x1cf4   :  { %3902 = vperm.xlu1 %4902, %v3892_v48  }
0x1d58   :  { %v3919_v49 = vpop.permute.xlu0 %3918 }
0x1d59   :  { %v3927_v50 = vmul.f32 %v5803_v5, %v3919_v49 }
0x1d5b   :  { %v3929_v51 = vsel %vm64_vm0, %v3927_v50, 0.0  ;;  %v4882_v50 = vld.sshfl [vmem:[%s6136_s0 + $0x66] sm:$0x11 pattern:$0x75316420] }
0x1d5c   :  { %v3930_v52 = vrot.slane %v3929_v51, 4 }
0x1d5e   :  { %v3931_v53 = vadd.f32 %v3930_v52, %v3929_v51  ;;  %v4043_v52 = vrot.slane %v4882_v50, %v5181_v7 }
0x1d60   :  { %v3932_v54 = vrot.slane %v3931_v53, 2 }
0x1d62   :  { %v3926_v55 = vpop.permute.xlu1 %3925  ;;  %v3933_v47 = vadd.f32 %v3932_v54, %v3931_v53  ;;  %v4036_v53 = vcombine.high %v4882_v50, %v4882_v50 }
0x1d63   :  { %v3928_v56 = vmul.f32 %v5803_v5, %v3926_v55 }
0x1d64   :  { %v3934_v59 = vrot.slane %v3933_v47, 1 }
0x1d65   :  { %v3936_v57 = vsel %vm64_vm0, %v3928_v56, 0.0  ;;  %v4050_v56 = vrot.slane %v4036_v53, %v5181_v7 }
0x1d66   :  { %v3937_v58 = vrot.slane %v3936_v57, 4  ;;  %v3935_v1 = vadd.f32 %v3934_v59, %v3933_v47 }
0x1d68   :  { %v3938_v60 = vadd.f32 %v3937_v58, %v3936_v57 }
0x1d69   :  { %v3895_v61 = vpop.permute.xlu0 %3894 }
0x1d6a   :  { %v3939_v62 = vrot.slane %v3938_v60, 2  ;;  %v3900_v63 = vrot.slane %v3895_v61, %v5196_v20 }
0x1d6c   :  { %v3909_v2 = vmul.f32 %v5813_v24, %v3900_v63  ;;  %v3940_v3 = vadd.f32 %v3939_v62, %v3938_v60 }
0x1d6e   :  { %v3943_v0 = vadd.f32 %v3935_v1, %v3909_v2  ;;  %v3941_v4 = vrot.slane %v3940_v3, 1 }
0x1d70   :  { %5099 = vtanh.f32 %v3943_v0  ;;  %v3942_v9 = vadd.f32 %v3941_v4, %v3940_v3 }
0x1d73   :  { %v3903_v6 = vpop.permute.xlu1 %3902 }
0x1d74   :  { %v3908_v8 = vrot.slane %v3903_v6, %v5196_v20 }
0x1d76   :  { %v3910_v10 = vmul.f32 %v5813_v24, %v3908_v8 }
0x1d78   :  { %v3944_v13 = vadd.f32 %v3942_v9, %v3910_v10 }
0x1d7a   :  { %v5100_v11 = vpop.eup %5099  ;;  %5101 = vtanh.f32 %v3944_v13 }
0x1d7b   :  { %v3995_v14 = vrot.slane %v5100_v11, %v5196_v20 }
0x1d7d   :  { %3997 = vbcast.lane.b32.xlu0 %v3995_v14, 256 }
0x1d81   :  { %3973 = vperm.xlu0 %4901, %v3964_v15  }
0x1d84   :  { %v5102_v17 = vpop.eup %5101 }
0x1d85   :  { %v4002_v18 = vrot.slane %v5102_v17, %v5196_v20 }
0x1d87   :  { %4004 = vbcast.lane.b32.xlu1 %v4002_v18, 256 }
0x1d8b   :  { %3981 = vperm.xlu1 %4902, %v3971_v19  }
0x1def   :  { %v3998_v21 = vpop.permute.xlu0 %3997 }
0x1df0   :  { %v4006_v23 = vmul.f32 %v5803_v5, %v3998_v21  ;;  %v4884_v21 = vld.sshfl [vmem:[%s6136_s0 + $0x68] sm:$0x11 pattern:$0x75316420] }
0x1df2   :  { %v4008_v22 = vsel %vm64_vm0, %v4006_v23, 0.0 }
0x1df3   :  { %v4009_v26 = vrot.slane %v4008_v22, 4 }
0x1df5   :  { %v4010_v27 = vadd.f32 %v4009_v26, %v4008_v22  ;;  %v4122_v22 = vrot.slane %v4884_v21, %v5181_v7  ;;  %v4115_v26 = vcombine.high %v4884_v21, %v4884_v21 }
0x1df7   :  { %v4011_v28 = vrot.slane %v4010_v27, 2 }
0x1df9   :  { %v4005_v29 = vpop.permute.xlu1 %4004  ;;  %v4012_v31 = vadd.f32 %v4011_v28, %v4010_v27 }
0x1dfa   :  { %v4007_v30 = vmul.f32 %v5803_v5, %v4005_v29 }
0x1dfb   :  { %v4013_v34 = vrot.slane %v4012_v31, 1 }
0x1dfc   :  { %v4015_v32 = vsel %vm64_vm0, %v4007_v30, 0.0  ;;  %v6008_v30 = vld [vmem:[%s6137_s2] sm:$0xff] }
0x1dfd   :  { %v4016_v33 = vrot.slane %v4015_v32, 4  ;;  %v4014_v38 = vadd.f32 %v4013_v34, %v4012_v31 }
0x1dff   :  { %v4017_v25 = vadd.f32 %v4016_v33, %v4015_v32 }
0x1e00   :  { %v3974_v35 = vpop.permute.xlu0 %3973 }
0x1e01   :  { %v4018_v36 = vrot.slane %v4017_v25, 2  ;;  %v3979_v37 = vrot.slane %v3974_v35, %v5196_v20 }
0x1e03   :  { %v3988_v39 = vmul.f32 %v5813_v24, %v3979_v37  ;;  %v4019_v40 = vadd.f32 %v4018_v36, %v4017_v25 }
0x1e05   :  { %v4022_v41 = vadd.f32 %v4014_v38, %v3988_v39  ;;  %v4020_v43 = vrot.slane %v4019_v40, 1 }
0x1e07   :  { %5103 = vtanh.f32 %v4022_v41  ;;  %v4021_v42 = vadd.f32 %v4020_v43, %v4019_v40 }
0x1e0a   :  { %v3982_v44 = vpop.permute.xlu1 %3981 }
0x1e0b   :  { %v3987_v45 = vrot.slane %v3982_v44, %v5196_v20 }
0x1e0d   :  { %v3989_v46 = vmul.f32 %v5813_v24, %v3987_v45 }
0x1e0f   :  { %v4023_v48 = vadd.f32 %v4021_v42, %v3989_v46  ;;  %v6018_v46 = vld [vmem:[%s6138_s1] sm:$0x1] }
0x1e11   :  { %v5104_v49 = vpop.eup %5103  ;;  %5105 = vtanh.f32 %v4023_v48 }
0x1e12   :  { %v4074_v51 = vrot.slane %v5104_v49, %v5196_v20 }
0x1e14   :  { %4076 = vbcast.lane.b32.xlu0 %v4074_v51, 256 }
0x1e18   :  { %4052 = vperm.xlu0 %4901, %v4043_v52  }
0x1e1b   :  { %v5106_v54 = vpop.eup %5105 }
0x1e1c   :  { %v4081_v55 = vrot.slane %v5106_v54, %v5196_v20 }
0x1e1e   :  { %4083 = vbcast.lane.b32.xlu1 %v4081_v55, 256 }
0x1e22   :  { %4060 = vperm.xlu1 %4902, %v4050_v56  }
0x1e86   :  { %v4077_v47 = vpop.permute.xlu0 %4076 }
0x1e87   :  { %v4085_v57 = vmul.f32 %v5803_v5, %v4077_v47 }
0x1e89   :  { %v4087_v58 = vsel %vm64_vm0, %v4085_v57, 0.0  ;;  %v4886_v57 = vld.sshfl [vmem:[%s6136_s0 + $0x6a] sm:$0x11 pattern:$0x75316420] }
0x1e8a   :  { %v4088_v59 = vrot.slane %v4087_v58, 4 }
0x1e8c   :  { %v4089_v60 = vadd.f32 %v4088_v59, %v4087_v58  ;;  %v4201_v59 = vrot.slane %v4886_v57, %v5181_v7 }
0x1e8e   :  { %v4090_v61 = vrot.slane %v4089_v60, 2 }
0x1e90   :  { %v4084_v62 = vpop.permute.xlu1 %4083  ;;  %v4091_v1 = vadd.f32 %v4090_v61, %v4089_v60  ;;  %v4194_v60 = vcombine.high %v4886_v57, %v4886_v57 }
0x1e91   :  { %v4086_v63 = vmul.f32 %v5803_v5, %v4084_v62 }
0x1e92   :  { %v4092_v0 = vrot.slane %v4091_v1, 1 }
0x1e93   :  { %v4094_v2 = vsel %vm64_vm0, %v4086_v63, 0.0  ;;  %v4208_v63 = vrot.slane %v4194_v60, %v5181_v7 }
0x1e94   :  { %v4095_v3 = vrot.slane %v4094_v2, 4  ;;  %v4093_v10 = vadd.f32 %v4092_v0, %v4091_v1 }
0x1e96   :  { %v4096_v4 = vadd.f32 %v4095_v3, %v4094_v2 }
0x1e97   :  { %v4053_v6 = vpop.permute.xlu0 %4052 }
0x1e98   :  { %v4097_v8 = vrot.slane %v4096_v4, 2  ;;  %v4058_v9 = vrot.slane %v4053_v6, %v5196_v20 }
0x1e9a   :  { %v4067_v13 = vmul.f32 %v5813_v24, %v4058_v9  ;;  %v4098_v11 = vadd.f32 %v4097_v8, %v4096_v4 }
0x1e9c   :  { %v4101_v12 = vadd.f32 %v4093_v10, %v4067_v13  ;;  %v4099_v14 = vrot.slane %v4098_v11, 1 }
0x1e9e   :  { %5107 = vtanh.f32 %v4101_v12  ;;  %v4100_v16 = vadd.f32 %v4099_v14, %v4098_v11 }
0x1ea1   :  { %v4061_v15 = vpop.permute.xlu1 %4060 }
0x1ea2   :  { %v4066_v5 = vrot.slane %v4061_v15, %v5196_v20 }
0x1ea4   :  { %v4068_v17 = vmul.f32 %v5813_v24, %v4066_v5  ;;  %v4129_v24 = vrot.slane %v4115_v26, %v5181_v7 }
0x1ea6   :  { %v4102_v18 = vadd.f32 %v4100_v16, %v4068_v17 }
0x1ea8   :  { %v5108_v19 = vpop.eup %5107  ;;  %5109 = vtanh.f32 %v4102_v18 }
0x1ea9   :  { %v4153_v23 = vrot.slane %v5108_v19, %v5196_v20 }
0x1eab   :  { %4155 = vbcast.lane.b32.xlu0 %v4153_v23, 256 }
0x1eaf   :  { %4131 = vperm.xlu0 %4901, %v4122_v22  }
0x1eb2   :  { %v5110_v27 = vpop.eup %5109 }
0x1eb3   :  { %v4160_v28 = vrot.slane %v5110_v27, %v5196_v20 }
0x1eb5   :  { %4162 = vbcast.lane.b32.xlu1 %v4160_v28, 256 }
0x1eb9   :  { %4139 = vperm.xlu1 %4902, %v4129_v24  }
0x1f1d   :  { %v4156_v29 = vpop.permute.xlu0 %4155 }
0x1f1e   :  { %v4164_v31 = vmul.f32 %v6008_v30, %v4156_v29 }
0x1f20   :  { %v4166_v32 = vsel %vm64_vm0, %v4164_v31, 0.0  ;;  %v4888_v31 = vld.sshfl [vmem:[%s6136_s0 + $0x6c] sm:$0x11 pattern:$0x75316420] }
0x1f21   :  { %v4167_v33 = vrot.slane %v4166_v32, 4 }
0x1f23   :  { %v4168_v34 = vadd.f32 %v4167_v33, %v4166_v32  ;;  %v4280_v33 = vrot.slane %v4888_v31, %v5181_v7 }
0x1f25   :  { %v4169_v25 = vrot.slane %v4168_v34, 2 }
0x1f27   :  { %v4163_v35 = vpop.permute.xlu1 %4162  ;;  %v4170_v37 = vadd.f32 %v4169_v25, %v4168_v34  ;;  %v4273_v34 = vcombine.high %v4888_v31, %v4888_v31 }
0x1f28   :  { %v4165_v36 = vmul.f32 %v6008_v30, %v4163_v35 }
0x1f29   :  { %v4171_v40 = vrot.slane %v4170_v37, 1 }
0x1f2a   :  { %v4173_v38 = vsel %vm64_vm0, %v4165_v36, 0.0  ;;  %v4287_v36 = vrot.slane %v4273_v34, %v5181_v7 }
0x1f2b   :  { %v4174_v39 = vrot.slane %v4173_v38, 4  ;;  %v4172_v42 = vadd.f32 %v4171_v40, %v4170_v37 }
0x1f2d   :  { %v4175_v41 = vadd.f32 %v4174_v39, %v4173_v38 }
0x1f2e   :  { %v4132_v43 = vpop.permute.xlu0 %4131 }
0x1f2f   :  { %v4176_v44 = vrot.slane %v4175_v41, 2  ;;  %v4137_v45 = vrot.slane %v4132_v43, %v5196_v20 }
0x1f31   :  { %v4146_v48 = vmul.f32 %v6018_v46, %v4137_v45  ;;  %v4177_v49 = vadd.f32 %v4176_v44, %v4175_v41 }
0x1f33   :  { %v4180_v50 = vadd.f32 %v4172_v42, %v4146_v48  ;;  %v4178_v51 = vrot.slane %v4177_v49, 1 }
0x1f35   :  { %5111 = vtanh.f32 %v4180_v50  ;;  %v4179_v54 = vadd.f32 %v4178_v51, %v4177_v49 }
0x1f38   :  { %v4140_v52 = vpop.permute.xlu1 %4139 }
0x1f39   :  { %v4145_v53 = vrot.slane %v4140_v52, %v5196_v20 }
0x1f3b   :  { %v4147_v55 = vmul.f32 %v6018_v46, %v4145_v53 }
0x1f3d   :  { %v4181_v56 = vadd.f32 %v4179_v54, %v4147_v55 }
0x1f3f   :  { %v5112_v47 = vpop.eup %5111  ;;  %5113 = vtanh.f32 %v4181_v56 }
0x1f40   :  { %v4232_v58 = vrot.slane %v5112_v47, %v5196_v20 }
0x1f42   :  { %4234 = vbcast.lane.b32.xlu0 %v4232_v58, 256 }
0x1f46   :  { %4210 = vperm.xlu0 %4901, %v4201_v59  }
0x1f49   :  { %v5114_v61 = vpop.eup %5113 }
0x1f4a   :  { %v4239_v62 = vrot.slane %v5114_v61, %v5196_v20 }
0x1f4c   :  { %4241 = vbcast.lane.b32.xlu1 %v4239_v62, 256 }
0x1f50   :  { %4218 = vperm.xlu1 %4902, %v4208_v63  }
0x1fb4   :  { %v4235_v1 = vpop.permute.xlu0 %4234 }
0x1fb5   :  { %v4243_v2 = vmul.f32 %v6008_v30, %v4235_v1 }
0x1fb7   :  { %v4245_v3 = vsel %vm64_vm0, %v4243_v2, 0.0  ;;  %v4890_v2 = vld.sshfl [vmem:[%s6136_s0 + $0x6e] sm:$0x11 pattern:$0x75316420] }
0x1fb8   :  { %v4246_v0 = vrot.slane %v4245_v3, 4 }
0x1fba   :  { %v4247_v4 = vadd.f32 %v4246_v0, %v4245_v3  ;;  %v4359_v0 = vrot.slane %v4890_v2, %v5181_v7 }
0x1fbc   :  { %v4248_v6 = vrot.slane %v4247_v4, 2 }
0x1fbe   :  { %v4242_v8 = vpop.permute.xlu1 %4241  ;;  %v4249_v10 = vadd.f32 %v4248_v6, %v4247_v4  ;;  %v4352_v4 = vcombine.high %v4890_v2, %v4890_v2 }
0x1fbf   :  { %v4244_v9 = vmul.f32 %v6008_v30, %v4242_v8 }
0x1fc0   :  { %v4250_v12 = vrot.slane %v4249_v10, 1 }
0x1fc1   :  { %v4252_v13 = vsel %vm64_vm0, %v4244_v9, 0.0  ;;  %v4366_v9 = vrot.slane %v4352_v4, %v5181_v7 }
0x1fc2   :  { %v4253_v11 = vrot.slane %v4252_v13, 4  ;;  %v4251_v17 = vadd.f32 %v4250_v12, %v4249_v10 }
0x1fc4   :  { %v4254_v14 = vadd.f32 %v4253_v11, %v4252_v13 }
0x1fc5   :  { %v4211_v15 = vpop.permute.xlu0 %4210 }
0x1fc6   :  { %v4255_v5 = vrot.slane %v4254_v14, 2  ;;  %v4216_v16 = vrot.slane %v4211_v15, %v5196_v20 }
0x1fc8   :  { %v4225_v18 = vmul.f32 %v6018_v46, %v4216_v16  ;;  %v4256_v19 = vadd.f32 %v4255_v5, %v4254_v14 }
0x1fca   :  { %v4259_v21 = vadd.f32 %v4251_v17, %v4225_v18  ;;  %v4257_v23 = vrot.slane %v4256_v19, 1 }
0x1fcc   :  { %5115 = vtanh.f32 %v4259_v21  ;;  %v4258_v27 = vadd.f32 %v4257_v23, %v4256_v19 }
0x1fcf   :  { %v4219_v22 = vpop.permute.xlu1 %4218 }
0x1fd0   :  { %v4224_v26 = vrot.slane %v4219_v22, %v5196_v20 }
0x1fd2   :  { %v4226_v28 = vmul.f32 %v6018_v46, %v4224_v26 }
0x1fd4   :  { %v4260_v24 = vadd.f32 %v4258_v27, %v4226_v28 }
0x1fd6   :  { %v5116_v29 = vpop.eup %5115  ;;  %5117 = vtanh.f32 %v4260_v24 }
0x1fd7   :  { %v4311_v32 = vrot.slane %v5116_v29, %v5196_v20 }
0x1fd9   :  { %4313 = vbcast.lane.b32.xlu0 %v4311_v32, 256 }
0x1fdd   :  { %4289 = vperm.xlu0 %4901, %v4280_v33  }
0x1fe0   :  { %v5118_v25 = vpop.eup %5117 }
0x1fe1   :  { %v4318_v35 = vrot.slane %v5118_v25, %v5196_v20 }
0x1fe3   :  { %4320 = vbcast.lane.b32.xlu1 %v4318_v35, 256 }
0x1fe7   :  { %4297 = vperm.xlu1 %4902, %v4287_v36  }
0x204b   :  { %v4314_v37 = vpop.permute.xlu0 %4313 }
0x204c   :  { %v4322_v38 = vmul.f32 %v6008_v30, %v4314_v37 }
0x204e   :  { %v4324_v39 = vsel %vm64_vm0, %v4322_v38, 0.0  ;;  %v4892_v38 = vld.sshfl [vmem:[%s6136_s0 + $0x70] sm:$0x11 pattern:$0x75316420] }
0x204f   :  { %v4325_v40 = vrot.slane %v4324_v39, 4 }
0x2051   :  { %v4326_v41 = vadd.f32 %v4325_v40, %v4324_v39  ;;  %v4438_v40 = vrot.slane %v4892_v38, %v5181_v7 }
0x2053   :  { %v4327_v43 = vrot.slane %v4326_v41, 2 }
0x2055   :  { %v4321_v44 = vpop.permute.xlu1 %4320  ;;  %v4328_v42 = vadd.f32 %v4327_v43, %v4326_v41  ;;  %v4431_v41 = vcombine.high %v4892_v38, %v4892_v38 }
0x2056   :  { %v4323_v45 = vmul.f32 %v6008_v30, %v4321_v44 }
0x2057   :  { %v4329_v50 = vrot.slane %v4328_v42, 1 }
0x2058   :  { %v4331_v48 = vsel %vm64_vm0, %v4323_v45, 0.0  ;;  %v4445_v45 = vrot.slane %v4431_v41, %v5181_v7 }
0x2059   :  { %v4332_v49 = vrot.slane %v4331_v48, 4  ;;  %v4330_v55 = vadd.f32 %v4329_v50, %v4328_v42 }
0x205b   :  { %v4333_v51 = vadd.f32 %v4332_v49, %v4331_v48 }
0x205c   :  { %v4290_v52 = vpop.permute.xlu0 %4289 }
0x205d   :  { %v4334_v53 = vrot.slane %v4333_v51, 2  ;;  %v4295_v54 = vrot.slane %v4290_v52, %v5196_v20 }
0x205f   :  { %v4304_v56 = vmul.f32 %v6018_v46, %v4295_v54  ;;  %v4335_v47 = vadd.f32 %v4334_v53, %v4333_v51 }
0x2061   :  { %v4338_v57 = vadd.f32 %v4330_v55, %v4304_v56  ;;  %v4336_v58 = vrot.slane %v4335_v47, 1 }
0x2063   :  { %5119 = vtanh.f32 %v4338_v57  ;;  %v4337_v61 = vadd.f32 %v4336_v58, %v4335_v47 }
0x2066   :  { %v4298_v59 = vpop.permute.xlu1 %4297 }
0x2067   :  { %v4303_v60 = vrot.slane %v4298_v59, %v5196_v20 }
0x2069   :  { %v4305_v62 = vmul.f32 %v6018_v46, %v4303_v60 }
0x206b   :  { %v4339_v63 = vadd.f32 %v4337_v61, %v4305_v62 }
0x206d   :  { %v5120_v1 = vpop.eup %5119  ;;  %5121 = vtanh.f32 %v4339_v63 }
0x206e   :  { %v4390_v3 = vrot.slane %v5120_v1, %v5196_v20 }
0x2070   :  { %4392 = vbcast.lane.b32.xlu0 %v4390_v3, 256 }
0x2074   :  { %4368 = vperm.xlu0 %4901, %v4359_v0  }
0x2077   :  { %v5122_v6 = vpop.eup %5121 }
0x2078   :  { %v4397_v8 = vrot.slane %v5122_v6, %v5196_v20 }
0x207a   :  { %4399 = vbcast.lane.b32.xlu1 %v4397_v8, 256 }
0x207e   :  { %4376 = vperm.xlu1 %4902, %v4366_v9  }
0x20e2   :  { %v4393_v10 = vpop.permute.xlu0 %4392 }
0x20e3   :  { %v4401_v13 = vmul.f32 %v6008_v30, %v4393_v10 }
0x20e5   :  { %v4403_v11 = vsel %vm64_vm0, %v4401_v13, 0.0  ;;  %v4894_v13 = vld.sshfl [vmem:[%s6136_s0 + $0x72] sm:$0x11 pattern:$0x75316420] }
0x20e6   :  { %v4404_v12 = vrot.slane %v4403_v11, 4 }
0x20e8   :  { %v4405_v14 = vadd.f32 %v4404_v12, %v4403_v11  ;;  %v4517_v12 = vrot.slane %v4894_v13, %v5181_v7 }
0x20ea   :  { %v4406_v15 = vrot.slane %v4405_v14, 2 }
0x20ec   :  { %v4400_v5 = vpop.permute.xlu1 %4399  ;;  %v4407_v17 = vadd.f32 %v4406_v15, %v4405_v14  ;;  %v4510_v14 = vcombine.high %v4894_v13, %v4894_v13 }
0x20ed   :  { %v4402_v16 = vmul.f32 %v6008_v30, %v4400_v5 }
0x20ee   :  { %v4408_v21 = vrot.slane %v4407_v17, 1 }
0x20ef   :  { %v4410_v18 = vsel %vm64_vm0, %v4402_v16, 0.0  ;;  %v4524_v16 = vrot.slane %v4510_v14, %v5181_v7 }
0x20f0   :  { %v4411_v19 = vrot.slane %v4410_v18, 4  ;;  %v4409_v28 = vadd.f32 %v4408_v21, %v4407_v17 }
0x20f2   :  { %v4412_v23 = vadd.f32 %v4411_v19, %v4410_v18 }
0x20f3   :  { %v4369_v22 = vpop.permute.xlu0 %4368 }
0x20f4   :  { %v4413_v26 = vrot.slane %v4412_v23, 2  ;;  %v4374_v27 = vrot.slane %v4369_v22, %v5196_v20 }
0x20f6   :  { %v4383_v24 = vmul.f32 %v6018_v46, %v4374_v27  ;;  %v4414_v29 = vadd.f32 %v4413_v26, %v4412_v23 }
0x20f8   :  { %v4417_v31 = vadd.f32 %v4409_v28, %v4383_v24  ;;  %v4415_v32 = vrot.slane %v4414_v29, 1 }
0x20fa   :  { %5123 = vtanh.f32 %v4417_v31  ;;  %v4416_v25 = vadd.f32 %v4415_v32, %v4414_v29 }
0x20fd   :  { %v4377_v33 = vpop.permute.xlu1 %4376 }
0x20fe   :  { %v4382_v34 = vrot.slane %v4377_v33, %v5196_v20 }
0x2100   :  { %v4384_v35 = vmul.f32 %v6018_v46, %v4382_v34 }
0x2102   :  { %v4418_v36 = vadd.f32 %v4416_v25, %v4384_v35 }
0x2104   :  { %v5124_v37 = vpop.eup %5123  ;;  %5125 = vtanh.f32 %v4418_v36 }
0x2105   :  { %v4469_v39 = vrot.slane %v5124_v37, %v5196_v20 }
0x2107   :  { %4471 = vbcast.lane.b32.xlu0 %v4469_v39, 256 }
0x210b   :  { %4447 = vperm.xlu0 %4901, %v4438_v40  }
0x210e   :  { %v5126_v43 = vpop.eup %5125 }
0x210f   :  { %v4476_v44 = vrot.slane %v5126_v43, %v5196_v20 }
0x2111   :  { %4478 = vbcast.lane.b32.xlu1 %v4476_v44, 256 }
0x2115   :  { %4455 = vperm.xlu1 %4902, %v4445_v45  }
0x2179   :  { %v4472_v42 = vpop.permute.xlu0 %4471 }
0x217a   :  { %v4480_v48 = vmul.f32 %v6008_v30, %v4472_v42 }
0x217c   :  { %v4482_v49 = vsel %vm64_vm0, %v4480_v48, 0.0  ;;  %v4896_v48 = vld.sshfl [vmem:[%s6136_s0 + $0x74] sm:$0x11 pattern:$0x75316420] }
0x217d   :  { %v4483_v50 = vrot.slane %v4482_v49, 4 }
0x217f   :  { %v4484_v51 = vadd.f32 %v4483_v50, %v4482_v49  ;;  %v4596_v50 = vrot.slane %v4896_v48, %v5181_v7 }
0x2181   :  { %v4485_v52 = vrot.slane %v4484_v51, 2 }
0x2183   :  { %v4479_v53 = vpop.permute.xlu1 %4478  ;;  %v4486_v55 = vadd.f32 %v4485_v52, %v4484_v51  ;;  %v4589_v51 = vcombine.high %v4896_v48, %v4896_v48 }
0x2184   :  { %v4481_v54 = vmul.f32 %v6008_v30, %v4479_v53 }
0x2185   :  { %v4487_v57 = vrot.slane %v4486_v55, 1 }
0x2186   :  { %v4489_v56 = vsel %vm64_vm0, %v4481_v54, 0.0  ;;  %v4603_v54 = vrot.slane %v4589_v51, %v5181_v7 }
0x2187   :  { %v4490_v47 = vrot.slane %v4489_v56, 4  ;;  %v4488_v62 = vadd.f32 %v4487_v57, %v4486_v55 }
0x2189   :  { %v4491_v58 = vadd.f32 %v4490_v47, %v4489_v56 }
0x218a   :  { %v4448_v59 = vpop.permute.xlu0 %4447 }
0x218b   :  { %v4492_v60 = vrot.slane %v4491_v58, 2  ;;  %v4453_v61 = vrot.slane %v4448_v59, %v5196_v20 }
0x218d   :  { %v4462_v63 = vmul.f32 %v6018_v46, %v4453_v61  ;;  %v4493_v1 = vadd.f32 %v4492_v60, %v4491_v58 }
0x218f   :  { %v4496_v2 = vadd.f32 %v4488_v62, %v4462_v63  ;;  %v4494_v3 = vrot.slane %v4493_v1, 1 }
0x2191   :  { %5127 = vtanh.f32 %v4496_v2  ;;  %v4495_v6 = vadd.f32 %v4494_v3, %v4493_v1 }
0x2194   :  { %v4456_v0 = vpop.permute.xlu1 %4455 }
0x2195   :  { %v4461_v4 = vrot.slane %v4456_v0, %v5196_v20 }
0x2197   :  { %v4463_v8 = vmul.f32 %v6018_v46, %v4461_v4 }
0x2199   :  { %v4497_v9 = vadd.f32 %v4495_v6, %v4463_v8 }
0x219b   :  { %v5128_v10 = vpop.eup %5127  ;;  %5129 = vtanh.f32 %v4497_v9 }
0x219c   :  { %v4548_v11 = vrot.slane %v5128_v10, %v5196_v20 }
0x219e   :  { %4550 = vbcast.lane.b32.xlu0 %v4548_v11, 256 }
0x21a2   :  { %4526 = vperm.xlu0 %4901, %v4517_v12  }
0x21a5   :  { %v5130_v15 = vpop.eup %5129 }
0x21a6   :  { %v4555_v5 = vrot.slane %v5130_v15, %v5196_v20 }
0x21a8   :  { %4557 = vbcast.lane.b32.xlu1 %v4555_v5, 256 }
0x21ac   :  { %4534 = vperm.xlu1 %4902, %v4524_v16  }
0x2210   :  { %v4551_v17 = vpop.permute.xlu0 %4550 }
0x2211   :  { %v4559_v18 = vmul.f32 %v6008_v30, %v4551_v17 }
0x2213   :  { %v4561_v19 = vsel %vm64_vm0, %v4559_v18, 0.0  ;;  %v4898_v18 = vld.sshfl [vmem:[%s6136_s0 + $0x76] sm:$0x11 pattern:$0x75316420] }
0x2214   :  { %v4562_v21 = vrot.slane %v4561_v19, 4 }
0x2216   :  { %v4563_v23 = vadd.f32 %v4562_v21, %v4561_v19  ;;  %v4675_v21 = vrot.slane %v4898_v18, %v5181_v7 }
0x2218   :  { %v4564_v22 = vrot.slane %v4563_v23, 2 }
0x221a   :  { %v4558_v26 = vpop.permute.xlu1 %4557  ;;  %v4565_v28 = vadd.f32 %v4564_v22, %v4563_v23  ;;  %v4668_v23 = vcombine.high %v4898_v18, %v4898_v18 }
0x221b   :  { %v4560_v27 = vmul.f32 %v6008_v30, %v4558_v26 }
0x221c   :  { %v4566_v31 = vrot.slane %v4565_v28, 1 }
0x221d   :  { %v4568_v24 = vsel %vm64_vm0, %v4560_v27, 0.0  ;;  %v4682_v27 = vrot.slane %v4668_v23, %v5181_v7 }
0x221e   :  { %v4569_v29 = vrot.slane %v4568_v24, 4  ;;  %v4567_v35 = vadd.f32 %v4566_v31, %v4565_v28 }
0x2220   :  { %v4570_v32 = vadd.f32 %v4569_v29, %v4568_v24 }
0x2221   :  { %v4527_v33 = vpop.permute.xlu0 %4526 }
0x2222   :  { %v4571_v34 = vrot.slane %v4570_v32, 2  ;;  %v4532_v25 = vrot.slane %v4527_v33, %v5196_v20 }
0x2224   :  { %v4541_v36 = vmul.f32 %v6018_v46, %v4532_v25  ;;  %v4572_v37 = vadd.f32 %v4571_v34, %v4570_v32 }
0x2226   :  { %v4575_v38 = vadd.f32 %v4567_v35, %v4541_v36  ;;  %v4573_v39 = vrot.slane %v4572_v37, 1 }
0x2228   :  { %5131 = vtanh.f32 %v4575_v38  ;;  %v4574_v43 = vadd.f32 %v4573_v39, %v4572_v37 }
0x222b   :  { %v4535_v40 = vpop.permute.xlu1 %4534 }
0x222c   :  { %v4540_v41 = vrot.slane %v4535_v40, %v5196_v20 }
0x222e   :  { %v4542_v44 = vmul.f32 %v6018_v46, %v4540_v41 }
0x2230   :  { %v4576_v45 = vadd.f32 %v4574_v43, %v4542_v44 }
0x2232   :  { %v5132_v42 = vpop.eup %5131  ;;  %5133 = vtanh.f32 %v4576_v45 }
0x2233   :  { %v4627_v49 = vrot.slane %v5132_v42, %v5196_v20 }
0x2235   :  { %4629 = vbcast.lane.b32.xlu0 %v4627_v49, 256 }
0x2239   :  { %4605 = vperm.xlu0 %4901, %v4596_v50  }
0x223c   :  { %v5134_v52 = vpop.eup %5133 }
0x223d   :  { %v4634_v53 = vrot.slane %v5134_v52, %v5196_v20 }
0x223f   :  { %4636 = vbcast.lane.b32.xlu1 %v4634_v53, 256 }
0x2243   :  { %4613 = vperm.xlu1 %4902, %v4603_v54  }
0x22a7   :  { %v4630_v55 = vpop.permute.xlu0 %4629 }
0x22a8   :  { %v4638_v56 = vmul.f32 %v6008_v30, %v4630_v55 }
0x22aa   :  { %v4640_v47 = vsel %vm64_vm0, %v4638_v56, 0.0 }
0x22ab   :  { %v4641_v57 = vrot.slane %v4640_v47, 4 }
0x22ad   :  { %v4642_v58 = vadd.f32 %v4641_v57, %v4640_v47  ;;  %v4737_v47 = vld [vmem:[%s6139_s3] sm:$0xff] }
0x22af   :  { %v4643_v59 = vrot.slane %v4642_v58, 2 }
0x22b1   :  { %v4637_v60 = vpop.permute.xlu1 %4636  ;;  %v4644_v62 = vadd.f32 %v4643_v59, %v4642_v58 }
0x22b2   :  { %v4639_v61 = vmul.f32 %v6008_v30, %v4637_v60 }
0x22b3   :  { %v4645_v2 = vrot.slane %v4644_v62, 1 }
0x22b4   :  { %v4647_v63 = vsel %vm64_vm0, %v4639_v61, 0.0 }
0x22b5   :  { %v4648_v1 = vrot.slane %v4647_v63, 4  ;;  %v4646_v8 = vadd.f32 %v4645_v2, %v4644_v62 }
0x22b7   :  { %v4649_v3 = vadd.f32 %v4648_v1, %v4647_v63 }
0x22b8   :  { %v4606_v0 = vpop.permute.xlu0 %4605 }
0x22b9   :  { %v4650_v4 = vrot.slane %v4649_v3, 2  ;;  %v4611_v6 = vrot.slane %v4606_v0, %v5196_v20 }
0x22bb   :  { %v4620_v9 = vmul.f32 %v6018_v46, %v4611_v6  ;;  %v4651_v10 = vadd.f32 %v4650_v4, %v4649_v3 }
0x22bd   :  { %v4654_v13 = vadd.f32 %v4646_v8, %v4620_v9  ;;  %v4652_v11 = vrot.slane %v4651_v10, 1 }
0x22bf   :  { %5135 = vtanh.f32 %v4654_v13  ;;  %v4653_v15 = vadd.f32 %v4652_v11, %v4651_v10 }
0x22c2   :  { %v4614_v12 = vpop.permute.xlu1 %4613 }
0x22c3   :  { %v4619_v14 = vrot.slane %v4614_v12, %v5196_v20 }
0x22c5   :  { %v4621_v5 = vmul.f32 %v6018_v46, %v4619_v14 }
0x22c7   :  { %v4655_v16 = vadd.f32 %v4653_v15, %v4621_v5 }
0x22c9   :  { %v5136_v17 = vpop.eup %5135  ;;  %5137 = vtanh.f32 %v4655_v16 }
0x22ca   :  { %v4706_v19 = vrot.slane %v5136_v17, %v5196_v20 }
0x22cc   :  { %4708 = vbcast.lane.b32.xlu0 %v4706_v19, 256 }
0x22d0   :  { %4684 = vperm.xlu0 %4901, %v4675_v21  }
0x22d3   :  { %v5138_v22 = vpop.eup %5137 }
0x22d4   :  { %v4713_v26 = vrot.slane %v5138_v22, %v5196_v20 }
0x22d6   :  { %4715 = vbcast.lane.b32.xlu1 %v4713_v26, 256 }
0x22da   :  { %4692 = vperm.xlu1 %4902, %v4682_v27  }
0x233e   :  { %v4709_v28 = vpop.permute.xlu0 %4708 }
0x233f   :  { %v4717_v24 = vmul.f32 %v6008_v30, %v4709_v28 }
0x2341   :  { %v4719_v29 = vsel %vm64_vm0, %v4717_v24, 0.0 }
0x2342   :  { %v4720_v31 = vrot.slane %v4719_v29, 4 }
0x2344   :  { %v4721_v32 = vadd.f32 %v4720_v31, %v4719_v29 }
0x2346   :  { %v4722_v33 = vrot.slane %v4721_v32, 2 }
0x2348   :  { %v4716_v34 = vpop.permute.xlu1 %4715  ;;  %v4723_v35 = vadd.f32 %v4722_v33, %v4721_v32 }
0x2349   :  { %v4718_v25 = vmul.f32 %v6008_v30, %v4716_v34 }
0x234a   :  { %v4724_v38 = vrot.slane %v4723_v35, 1 }
0x234b   :  { %v4726_v36 = vsel %vm64_vm0, %v4718_v25, 0.0 }
0x234c   :  { %v4727_v37 = vrot.slane %v4726_v36, 4  ;;  %v4725_v43 = vadd.f32 %v4724_v38, %v4723_v35 }
0x234e   :  { %v4728_v39 = vadd.f32 %v4727_v37, %v4726_v36 }
0x234f   :  { %v4685_v40 = vpop.permute.xlu0 %4684 }
0x2350   :  { %v4729_v7 = vrot.slane %v4728_v39, 2  ;;  %v4690_v41 = vrot.slane %v4685_v40, %v5196_v20 }
0x2352   :  { %v4699_v44 = vmul.f32 %v6018_v46, %v4690_v41  ;;  %v4730_v45 = vadd.f32 %v4729_v7, %v4728_v39 }
0x2354   :  { %v4733_v42 = vadd.f32 %v4725_v43, %v4699_v44  ;;  %v4731_v48 = vrot.slane %v4730_v45, 1 }
0x2356   :  { %5139 = vtanh.f32 %v4733_v42  ;;  %v4732_v50 = vadd.f32 %v4731_v48, %v4730_v45 }
0x2359   :  { %v4693_v49 = vpop.permute.xlu1 %4692 }
0x235a   :  { %v4698_v30 = vrot.slane %v4693_v49, %v5196_v20 }
0x235c   :  { %v4700_v51 = vmul.f32 %v6018_v46, %v4698_v30 }
0x235e   :  { %v4734_v52 = vadd.f32 %v4732_v50, %v4700_v51 }
0x2360   :  { %v5140_v53 = vpop.eup %5139  ;;  %5141 = vtanh.f32 %v4734_v52 }
0x2361   :  { %v4741_v54 = vrot.slane %v5140_v53, %v5196_v20 }
0x2363   :  { %4743 = vbcast.lane.b32.xlu0 %v4741_v54, 256 }
0x236a   :  { %v5142_v55 = vpop.eup %5141 }
0x236b   :  { %v4748_v56 = vrot.slane %v5142_v55, %v5196_v20 }
0x236d   :  { %4750 = vbcast.lane.b32.xlu1 %v4748_v56, 256 }
0x23d5   :  { %v4744_v57 = vpop.permute.xlu0 %4743 }
0x23d6   :  { %v4752_v58 = vmul.f32 %v4744_v57, %v4737_v47 }
0x23d8   :  { %v4755_v59 = vsel %vm4754_vm1, %v4752_v58, 0.0 }
0x23d9   :  { %v4756_v60 = vrot.slane %v4755_v59, 4 }
0x23db   :  { %v4757_v46 = vadd.f32 %v4756_v60, %v4755_v59 }
0x23dd   :  { %v4758_v63 = vrot.slane %v4757_v46, 2 }
0x23df   :  { %v4751_v61 = vpop.permute.xlu1 %4750  ;;  %v4759_v3 = vadd.f32 %v4758_v63, %v4757_v46 }
0x23e0   :  { %v4753_v62 = vmul.f32 %v4751_v61, %v4737_v47 }
0x23e1   :  { %v4760_v20 = vrot.slane %v4759_v3, 1 }
0x23e2   :  { %v4762_v1 = vsel %vm4754_vm1, %v4753_v62, 0.0 }
0x23e3   :  { %v4763_v2 = vrot.slane %v4762_v1, 4  ;;  %v4761_v9 = vadd.f32 %v4760_v20, %v4759_v3 }
0x23e5   :  { %v4764_v0 = vadd.f32 %v4763_v2, %v4762_v1 }
0x23e7   :  { %v4765_v4 = vrot.slane %v4764_v0, 2 }
0x23e9   :  { %v4766_v6 = vadd.f32 %v4765_v4, %v4764_v0 }
0x23eb   :  { %v4767_v8 = vrot.slane %v4766_v6, 1 }
0x23ed   :  { %v4768_v10 = vadd.f32 %v4767_v8, %v4766_v6 }
0x23ef   :  { %v4772_v13 = vsel %vm4771_vm2, %v4768_v10, %v4761_v9 }
0x23f0   :  { %4775 = vst.msk [vmem:[%s6140_s4] sm:$0x3] %vm4774_vm3, %v4772_v13 }

</bundles_post_ra>
